<compile_context>
chip_gen: v7x
topology: tpu7x:2x2x1
jax: 0.10.0
libtpu: 0.0.40
codegen_flags: <defaults>
</compile_context>

<pallas_src>
import functools

import jax
import jax.numpy as jnp
from jax.experimental import pallas as pl
from jax.experimental.pallas import tpu as pltpu


def _round_up(x, m):
    return (x + m - 1) // m * m


_VMEM_LIMIT = 32 * 1024 * 1024   # safe scoped-VMEM budget on v5e / v6e / v7x


# ---------------------------- Pallas kernels ----------------------------

def _mm_kernel(a_ref, w_ref, scale_ref, shift_ref, o_ref, *, relu):
    """acc = A@W (bf16 in, f32 acc); epilogue: per-channel affine (+ReLU)."""
    acc = jnp.dot(a_ref[...], w_ref[...], preferred_element_type=jnp.float32)
    y = acc * scale_ref[...] + shift_ref[...]
    if relu:
        y = jnp.maximum(y, 0.0)
    o_ref[...] = y.astype(o_ref.dtype)


def _mm_res_kernel(a_ref, w_ref, res_ref, scale_ref, shift_ref, o_ref, *, relu):
    """Same as _mm_kernel but with a fused residual add before the affine."""
    acc = jnp.dot(a_ref[...], w_ref[...], preferred_element_type=jnp.float32)
    acc = acc + res_ref[...]                     # fused residual add (f32)
    y = acc * scale_ref[...] + shift_ref[...]    # fused next-stage BN affine
    if relu:
        y = jnp.maximum(y, 0.0)
    o_ref[...] = y.astype(o_ref.dtype)


def _mm_dual_kernel(a_ref, w_ref, scale_ref, shift_ref, raw_ref, act_ref):
    """Emit both the raw conv output (residual path) and BN+ReLU'd activation."""
    acc = jnp.dot(a_ref[...], w_ref[...], preferred_element_type=jnp.float32)
    raw_ref[...] = acc
    act_ref[...] = jnp.maximum(acc * scale_ref[...] + shift_ref[...], 0.0
                               ).astype(act_ref.dtype)


def _head_kernel(x_ref, w_ref, b_ref, o_ref, *, inv_hw):
    """Fused global average pool (over HW) + Linear classifier."""
    x = x_ref[...].astype(jnp.float32)                 # (N, HW, C)
    feat = jnp.sum(x, axis=1) * inv_hw                 # (N, C) mean over HW
    o_ref[...] = (jnp.dot(feat, w_ref[...], preferred_element_type=jnp.float32)
                  + b_ref[...])


# ---------------------------- kernel wrappers ----------------------------

def fused_matmul(a, w, scale, shift, *, residual=None, relu=True, dual=False,
                 out_dtype=jnp.bfloat16, tm=1024):
    """(M,K)@(K,Cout) with fused BN-affine/ReLU/residual epilogue.

    M is tiled (default 1024 rows -> a few MiB of double-buffered VMEM even for
    K=576, safe on v7x's 64 MiB; v6e could take 2048+).  K and Cout use
    full-extent blocks so no HBM padding/slicing glue is required.
    """
    M, K = a.shape
    K2, Cout = w.shape
    assert K == K2
    TM = min(tm, _round_up(M, 8))
    grid_m = pl.cdiv(M, TM)
    Mp = grid_m * TM
    if Mp != M:                                   # remainder tile only
        a = jnp.pad(a, ((0, Mp - M), (0, 0)))
        if residual is not None:
            residual = jnp.pad(residual, ((0, Mp - M), (0, 0)))

    scale2 = scale.reshape(1, Cout).astype(jnp.float32)
    shift2 = shift.reshape(1, Cout).astype(jnp.float32)

    a_spec = pl.BlockSpec((TM, K), lambda i: (i, 0))
    w_spec = pl.BlockSpec((K, Cout), lambda i: (0, 0))    # resident across grid
    v_spec = pl.BlockSpec((1, Cout), lambda i: (0, 0))
    res_spec = pl.BlockSpec((TM, Cout), lambda i: (i, 0))
    out_spec = pl.BlockSpec((TM, Cout), lambda i: (i, 0))
    cparams = pltpu.CompilerParams(
        dimension_semantics=("parallel",),        # shard M across TCs on v7x
        vmem_limit_bytes=_VMEM_LIMIT)

    if dual:
        raw, act = pl.pallas_call(
            _mm_dual_kernel,
            out_shape=(jax.ShapeDtypeStruct((Mp, Cout), jnp.float32),
                       jax.ShapeDtypeStruct((Mp, Cout), out_dtype)),
            grid=(grid_m,),
            in_specs=[a_spec, w_spec, v_spec, v_spec],
            out_specs=(pl.BlockSpec((TM, Cout), lambda i: (i, 0)),
                       pl.BlockSpec((TM, Cout), lambda i: (i, 0))),
            compiler_params=cparams,
        )(a, w, scale2, shift2)
        return raw[:M], act[:M]

    if residual is not None:
        out = pl.pallas_call(
            functools.partial(_mm_res_kernel, relu=relu),
            out_shape=jax.ShapeDtypeStruct((Mp, Cout), out_dtype),
            grid=(grid_m,),
            in_specs=[a_spec, w_spec, res_spec, v_spec, v_spec],
            out_specs=out_spec,
            compiler_params=cparams,
        )(a, w, residual, scale2, shift2)
        return out[:M]

    out = pl.pallas_call(
        functools.partial(_mm_kernel, relu=relu),
        out_shape=jax.ShapeDtypeStruct((Mp, Cout), out_dtype),
        grid=(grid_m,),
        in_specs=[a_spec, w_spec, v_spec, v_spec],
        out_specs=out_spec,
        compiler_params=cparams,
    )(a, w, scale2, shift2)
    return out[:M]


def pallas_avgpool_fc(x_nhwc, fc_w, fc_b):
    """Fused global-average-pool + FC head in a single small pallas_call."""
    N, H, W, C = x_nhwc.shape
    HW = H * W
    ncls = fc_w.shape[0]
    x3 = x_nhwc.reshape(N, HW, C)
    wm = jnp.transpose(fc_w).astype(jnp.float32)          # (C, num_classes)
    b2 = fc_b.reshape(1, ncls).astype(jnp.float32)
    return pl.pallas_call(
        functools.partial(_head_kernel, inv_hw=1.0 / HW),
        out_shape=jax.ShapeDtypeStruct((N, ncls), jnp.float32),
        grid=(1,),
        in_specs=[pl.BlockSpec((N, HW, C), lambda i: (0, 0, 0)),
                  pl.BlockSpec((C, ncls), lambda i: (0, 0)),
                  pl.BlockSpec((1, ncls), lambda i: (0, 0))],
        out_specs=pl.BlockSpec((N, ncls), lambda i: (0, 0)),
        compiler_params=pltpu.CompilerParams(
            dimension_semantics=("arbitrary",),
            vmem_limit_bytes=_VMEM_LIMIT),
    )(x3, wm, b2)


# ---------------------------- conv glue ----------------------------

def _im2col(x, kh, kw, stride, pad):
    """NHWC -> (N*Ho*Wo, kh*kw*C), feature order (kh, kw, C).  bf16 JAX glue.

    # TODO(synk): replace with an in-kernel tap-reduction (taps as a grid axis
    # accumulating into VMEM scratch) to remove the kh*kw x HBM patch blow-up
    # at large batch/resolution; kept as glue here for lowering robustness.
    """
    N, H, W, C = x.shape
    if pad:
        x = jnp.pad(x, ((0, 0), (pad, pad), (pad, pad), (0, 0)))
    Ho = (H + 2 * pad - kh) // stride + 1
    Wo = (W + 2 * pad - kw) // stride + 1
    cols = []
    for i in range(kh):
        for j in range(kw):
            cols.append(x[:, i:i + stride * (Ho - 1) + 1:stride,
                           j:j + stride * (Wo - 1) + 1:stride, :])
    patches = cols[0] if len(cols) == 1 else jnp.concatenate(cols, axis=-1)
    return patches.reshape(N * Ho * Wo, kh * kw * C), (N, Ho, Wo)


def conv_fused(x_nhwc, w_oihw, scale, shift, *, stride, pad, residual=None,
               relu=True, dual=False, out_dtype=jnp.bfloat16):
    """PyTorch conv (OIHW, bias=False) -> im2col (bf16) + fused Pallas matmul."""
    cout, cin, kh, kw = w_oihw.shape
    cols, (N, Ho, Wo) = _im2col(x_nhwc.astype(jnp.bfloat16), kh, kw, stride, pad)
    wm = jnp.transpose(w_oihw, (2, 3, 1, 0)).reshape(kh * kw * cin, cout)
    wm = wm.astype(jnp.bfloat16)
    res2d = None
    if residual is not None:
        res2d = residual.reshape(N * Ho * Wo, cout).astype(jnp.float32)
    out = fused_matmul(cols, wm, scale, shift, residual=res2d, relu=relu,
                       dual=dual, out_dtype=out_dtype)
    if dual:
        raw, act = out
        return raw.reshape(N, Ho, Wo, cout), act.reshape(N, Ho, Wo, cout)
    return out.reshape(N, Ho, Wo, cout)


def _bn_affine(bn, eps=1e-5):
    gamma, beta, mean, var = bn
    scale = gamma * jax.lax.rsqrt(var + eps)
    shift = beta - mean * scale
    return scale, shift


# ---------------------------- params + forward ----------------------------

def init_params(key, num_classes=10):
    widths = [16, 16, 32, 64]                  # WRN-10-1
    keys = iter(jax.random.split(key, 64))

    def conv_w(cout, cin, kh, kw):
        fan = cin * kh * kw
        return (jax.random.normal(next(keys), (cout, cin, kh, kw), jnp.float32)
                * (2.0 / fan) ** 0.5)

    def bn_p(c):                               # (gamma, beta, running_mean, running_var)
        return (1.0 + 0.1 * jax.random.normal(next(keys), (c,), jnp.float32),
                0.1 * jax.random.normal(next(keys), (c,), jnp.float32),
                0.1 * jax.random.normal(next(keys), (c,), jnp.float32),
                jnp.ones((c,), jnp.float32))

    params = {'conv1': conv_w(widths[0], 3, 3, 3)}
    params['block1'] = {'bn1': bn_p(widths[0]),
                        'conv1': conv_w(widths[1], widths[0], 3, 3),
                        'bn2': bn_p(widths[1]),
                        'conv2': conv_w(widths[1], widths[1], 3, 3)}
    params['block2'] = {'bn1': bn_p(widths[1]),
                        'conv1': conv_w(widths[2], widths[1], 3, 3),
                        'bn2': bn_p(widths[2]),
                        'conv2': conv_w(widths[2], widths[2], 3, 3),
                        'shortcut': conv_w(widths[2], widths[1], 1, 1)}
    params['block3'] = {'bn1': bn_p(widths[2]),
                        'conv1': conv_w(widths[3], widths[2], 3, 3),
                        'bn2': bn_p(widths[3]),
                        'conv2': conv_w(widths[3], widths[3], 3, 3),
                        'shortcut': conv_w(widths[3], widths[2], 1, 1)}
    params['bn_final'] = bn_p(widths[3])
    # FC_Classifier: Linear(nChannels=64 -> num_classes)
    params['fc_w'] = (jax.random.normal(next(keys), (num_classes, widths[3]),
                                        jnp.float32) * (1.0 / widths[3]) ** 0.5)
    params['fc_b'] = jnp.zeros((num_classes,), jnp.float32)
    return params


def networks_forward(params, x_nchw):
    # Networks.forward: out = backbone(x); out = classifier(out)
    x = jnp.transpose(x_nchw, (0, 2, 3, 1)).astype(jnp.float32)   # NCHW -> NHWC

    # Stem conv; block1.bn1+ReLU fused into its epilogue. Dual output keeps the
    # raw pre-activation tensor for block1's identity residual.
    s, b = _bn_affine(params['block1']['bn1'])
    x0_raw, a0 = conv_fused(x, params['conv1'], s, b, stride=1, pad=1, dual=True)

    # ---- block1 (equalInOut, stride 1) ----
    p1 = params['block1']
    s, b = _bn_affine(p1['bn2'])                  # bn2+relu fused into conv1
    mid = conv_fused(a0, p1['conv1'], s, b, stride=1, pad=1, relu=True)
    s, b = _bn_affine(params['block2']['bn1'])    # next block's pre-activation
    o1 = conv_fused(mid, p1['conv2'], s, b, stride=1, pad=1,
                    residual=x0_raw, relu=True)   # +x fused, then bn1+relu

    # ---- block2 (projection shortcut, stride 2) ----
    p2 = params['block2']
    c2 = p2['conv1'].shape[0]
    s, b = _bn_affine(p2['bn2'])
    mid = conv_fused(o1, p2['conv1'], s, b, stride=2, pad=1, relu=True)
    sc = conv_fused(o1, p2['shortcut'], jnp.ones((c2,), jnp.float32),
                    jnp.zeros((c2,), jnp.float32), stride=2, pad=0,
                    relu=False, out_dtype=jnp.float32)      # plain 1x1 conv
    s, b = _bn_affine(params['block3']['bn1'])
    o2 = conv_fused(mid, p2['conv2'], s, b, stride=1, pad=1,
                    residual=sc, relu=True)

    # ---- block3 (projection shortcut, stride 2) ----
    p3 = params['block3']
    c3 = p3['conv1'].shape[0]
    s, b = _bn_affine(p3['bn2'])
    mid = conv_fused(o2, p3['conv1'], s, b, stride=2, pad=1, relu=True)
    sc = conv_fused(o2, p3['shortcut'], jnp.ones((c3,), jnp.float32),
                    jnp.zeros((c3,), jnp.float32), stride=2, pad=0,
                    relu=False, out_dtype=jnp.float32)
    s, b = _bn_affine(params['bn_final'])          # final BN+ReLU fused here
    o3 = conv_fused(mid, p3['conv2'], s, b, stride=1, pad=1,
                    residual=sc, relu=True)

    # ---- fused global avg-pool + FC classifier (single kernel) ----
    logits = pallas_avgpool_fc(o3, params['fc_w'], params['fc_b'])
    return logits


# TODO(synk): Losses / adv_loss / nat_loss objects in __init__ are training-time
# criteria and are not part of Networks.forward, so they are not implemented here.

if __name__ == "__main__":
    key = jax.random.PRNGKey(0)
    k_params, k_x = jax.random.split(key)
    num_classes = 10
    params = init_params(k_params, num_classes=num_classes)
    x = jax.random.normal(k_x, (2, 3, 16, 16), jnp.float32)        # NCHW like PyTorch

    fwd = jax.jit(networks_forward)
    logits = fwd(params, x)
    jax.block_until_ready(logits)
    assert logits.shape == (2, num_classes), logits.shape
    assert bool(jnp.all(jnp.isfinite(logits)))
    print("KERNEL_OK")
</pallas_src>

<mosaic_0001>
module attributes {stable_mosaic.version = 11 : i64} {
  func.func @_mm_dual_kernel(%arg0: i32, %arg1: memref<512x27xbf16, #tpu.memory_space<vmem>>, %arg2: memref<27x16xbf16, #tpu.memory_space<vmem>>, %arg3: memref<1x16xf32, #tpu.memory_space<vmem>>, %arg4: memref<1x16xf32, #tpu.memory_space<vmem>>, %arg5: memref<512x16xf32, #tpu.memory_space<vmem>>, %arg6: memref<512x16xbf16, #tpu.memory_space<vmem>>) attributes {dimension_semantics = [#tpu.dimension_semantics<parallel>], iteration_bounds = array<i64: 1>, scalar_prefetch = 0 : i64, scratch_operands = 0 : i64, tpu.core_type = #tpu.core_type<tc>, window_params = [{transform_indices = @transform_0, window_bounds = array<i64: 512, 27>}, {pipeline_mode = #tpu.pipeline_mode<synchronous>, transform_indices = @transform_1, window_bounds = array<i64: 27, 16>}, {pipeline_mode = #tpu.pipeline_mode<synchronous>, transform_indices = @transform_2, window_bounds = array<i64: 1, 16>}, {pipeline_mode = #tpu.pipeline_mode<synchronous>, transform_indices = @transform_3, window_bounds = array<i64: 1, 16>}, {transform_indices = @transform_4, window_bounds = array<i64: 512, 16>}, {transform_indices = @transform_5, window_bounds = array<i64: 512, 16>}]} {
    %c0 = arith.constant 0 : index
    %c0_0 = arith.constant 0 : index
    %0 = vector.load %arg1[%c0, %c0_0] : memref<512x27xbf16, #tpu.memory_space<vmem>>, vector<512x27xbf16>
    %c0_1 = arith.constant 0 : index
    %c0_2 = arith.constant 0 : index
    %1 = vector.load %arg2[%c0_1, %c0_2] : memref<27x16xbf16, #tpu.memory_space<vmem>>, vector<27x16xbf16>
    %cst = arith.constant dense<0.000000e+00> : vector<512x16xf32>
    %2 = tpu.matmul %0, %1, %cst {dimension_numbers = #tpu.dot_dimension_numbers<[1], [0], [0], [1], [0, 0, 1, 1], [], []>} : vector<512x27xbf16>, vector<27x16xbf16>, vector<512x16xf32> -> vector<512x16xf32>
    %c0_3 = arith.constant 0 : index
    %c0_4 = arith.constant 0 : index
    %3 = vector.load %arg5[%c0_3, %c0_4] : memref<512x16xf32, #tpu.memory_space<vmem>>, vector<512x16xf32>
    tpu.vector_store %arg5[%c0_3, %c0_4], %2 {strides = array<i32>} : memref<512x16xf32, #tpu.memory_space<vmem>>, vector<512x16xf32>,
    %c0_5 = arith.constant 0 : index
    %c0_6 = arith.constant 0 : index
    %4 = vector.load %arg3[%c0_5, %c0_6] : memref<1x16xf32, #tpu.memory_space<vmem>>, vector<1x16xf32>
    %5 = vector.broadcast %4 : vector<1x16xf32> to vector<512x16xf32>
    %6 = arith.mulf %2, %5 : vector<512x16xf32>
    %c0_7 = arith.constant 0 : index
    %c0_8 = arith.constant 0 : index
    %7 = vector.load %arg4[%c0_7, %c0_8] : memref<1x16xf32, #tpu.memory_space<vmem>>, vector<1x16xf32>
    %8 = vector.broadcast %7 : vector<1x16xf32> to vector<512x16xf32>
    %9 = arith.addf %6, %8 : vector<512x16xf32>
    %cst_9 = arith.constant 0.000000e+00 : f32
    %10 = vector.broadcast %cst_9 : f32 to vector<512x16xf32>
    %11 = arith.maximumf %9, %10 : vector<512x16xf32>
    %12 = arith.truncf %11 : vector<512x16xf32> to vector<512x16xbf16>
    %c0_10 = arith.constant 0 : index
    %c0_11 = arith.constant 0 : index
    %13 = vector.load %arg6[%c0_10, %c0_11] : memref<512x16xbf16, #tpu.memory_space<vmem>>, vector<512x16xbf16>
    tpu.vector_store %arg6[%c0_10, %c0_11], %12 {strides = array<i32>} : memref<512x16xbf16, #tpu.memory_space<vmem>>, vector<512x16xbf16>,
    return
  }
  func.func @transform_0(%arg0: i32) -> (i32, i32) {
    %c0_i32 = arith.constant 0 : i32
    %c0_i32_0 = arith.constant 0 : i32
    return %arg0, %c0_i32 : i32, i32
  }
  func.func @transform_1(%arg0: i32) -> (i32, i32) {
    %c0_i32 = arith.constant 0 : i32
    %c0_i32_0 = arith.constant 0 : i32
    %c0_i32_1 = arith.constant 0 : i32
    return %c0_i32, %c0_i32_0 : i32, i32
  }
  func.func @transform_2(%arg0: i32) -> (i32, i32) {
    %c0_i32 = arith.constant 0 : i32
    %c0_i32_0 = arith.constant 0 : i32
    %c0_i32_1 = arith.constant 0 : i32
    return %c0_i32, %c0_i32_0 : i32, i32
  }
  func.func @transform_3(%arg0: i32) -> (i32, i32) {
    %c0_i32 = arith.constant 0 : i32
    %c0_i32_0 = arith.constant 0 : i32
    %c0_i32_1 = arith.constant 0 : i32
    return %c0_i32, %c0_i32_0 : i32, i32
  }
  func.func @transform_4(%arg0: i32) -> (i32, i32) {
    %c0_i32 = arith.constant 0 : i32
    %c0_i32_0 = arith.constant 0 : i32
    return %arg0, %c0_i32 : i32, i32
  }
  func.func @transform_5(%arg0: i32) -> (i32, i32) {
    %c0_i32 = arith.constant 0 : i32
    %c0_i32_0 = arith.constant 0 : i32
    return %arg0, %c0_i32 : i32, i32
  }
}

module attributes {stable_mosaic.version = 11 : i64} {
  func.func @_mm_kernel(%arg0: i32, %arg1: memref<512x144xbf16, #tpu.memory_space<vmem>>, %arg2: memref<144x16xbf16, #tpu.memory_space<vmem>>, %arg3: memref<1x16xf32, #tpu.memory_space<vmem>>, %arg4: memref<1x16xf32, #tpu.memory_space<vmem>>, %arg5: memref<512x16xbf16, #tpu.memory_space<vmem>>) attributes {dimension_semantics = [#tpu.dimension_semantics<parallel>], iteration_bounds = array<i64: 1>, scalar_prefetch = 0 : i64, scratch_operands = 0 : i64, tpu.core_type = #tpu.core_type<tc>, window_params = [{transform_indices = @transform_0, window_bounds = array<i64: 512, 144>}, {pipeline_mode = #tpu.pipeline_mode<synchronous>, transform_indices = @transform_1, window_bounds = array<i64: 144, 16>}, {pipeline_mode = #tpu.pipeline_mode<synchronous>, transform_indices = @transform_2, window_bounds = array<i64: 1, 16>}, {pipeline_mode = #tpu.pipeline_mode<synchronous>, transform_indices = @transform_3, window_bounds = array<i64: 1, 16>}, {transform_indices = @transform_4, window_bounds = array<i64: 512, 16>}]} {
    %c0 = arith.constant 0 : index
    %c0_0 = arith.constant 0 : index
    %0 = vector.load %arg1[%c0, %c0_0] : memref<512x144xbf16, #tpu.memory_space<vmem>>, vector<512x144xbf16>
    %c0_1 = arith.constant 0 : index
    %c0_2 = arith.constant 0 : index
    %1 = vector.load %arg2[%c0_1, %c0_2] : memref<144x16xbf16, #tpu.memory_space<vmem>>, vector<144x16xbf16>
    %cst = arith.constant dense<0.000000e+00> : vector<512x16xf32>
    %2 = tpu.matmul %0, %1, %cst {dimension_numbers = #tpu.dot_dimension_numbers<[1], [0], [0], [1], [0, 0, 1, 1], [], []>} : vector<512x144xbf16>, vector<144x16xbf16>, vector<512x16xf32> -> vector<512x16xf32>
    %c0_3 = arith.constant 0 : index
    %c0_4 = arith.constant 0 : index
    %3 = vector.load %arg3[%c0_3, %c0_4] : memref<1x16xf32, #tpu.memory_space<vmem>>, vector<1x16xf32>
    %4 = vector.broadcast %3 : vector<1x16xf32> to vector<512x16xf32>
    %5 = arith.mulf %2, %4 : vector<512x16xf32>
    %c0_5 = arith.constant 0 : index
    %c0_6 = arith.constant 0 : index
    %6 = vector.load %arg4[%c0_5, %c0_6] : memref<1x16xf32, #tpu.memory_space<vmem>>, vector<1x16xf32>
    %7 = vector.broadcast %6 : vector<1x16xf32> to vector<512x16xf32>
    %8 = arith.addf %5, %7 : vector<512x16xf32>
    %cst_7 = arith.constant 0.000000e+00 : f32
    %9 = vector.broadcast %cst_7 : f32 to vector<512x16xf32>
    %10 = arith.maximumf %8, %9 : vector<512x16xf32>
    %11 = arith.truncf %10 : vector<512x16xf32> to vector<512x16xbf16>
    %c0_8 = arith.constant 0 : index
    %c0_9 = arith.constant 0 : index
    %12 = vector.load %arg5[%c0_8, %c0_9] : memref<512x16xbf16, #tpu.memory_space<vmem>>, vector<512x16xbf16>
    tpu.vector_store %arg5[%c0_8, %c0_9], %11 {strides = array<i32>} : memref<512x16xbf16, #tpu.memory_space<vmem>>, vector<512x16xbf16>,
    return
  }
  func.func @transform_0(%arg0: i32) -> (i32, i32) {
    %c0_i32 = arith.constant 0 : i32
    %c0_i32_0 = arith.constant 0 : i32
    return %arg0, %c0_i32 : i32, i32
  }
  func.func @transform_1(%arg0: i32) -> (i32, i32) {
    %c0_i32 = arith.constant 0 : i32
    %c0_i32_0 = arith.constant 0 : i32
    %c0_i32_1 = arith.constant 0 : i32
    return %c0_i32, %c0_i32_0 : i32, i32
  }
  func.func @transform_2(%arg0: i32) -> (i32, i32) {
    %c0_i32 = arith.constant 0 : i32
    %c0_i32_0 = arith.constant 0 : i32
    %c0_i32_1 = arith.constant 0 : i32
    return %c0_i32, %c0_i32_0 : i32, i32
  }
  func.func @transform_3(%arg0: i32) -> (i32, i32) {
    %c0_i32 = arith.constant 0 : i32
    %c0_i32_0 = arith.constant 0 : i32
    %c0_i32_1 = arith.constant 0 : i32
    return %c0_i32, %c0_i32_0 : i32, i32
  }
  func.func @transform_4(%arg0: i32) -> (i32, i32) {
    %c0_i32 = arith.constant 0 : i32
    %c0_i32_0 = arith.constant 0 : i32
    return %arg0, %c0_i32 : i32, i32
  }
}

module attributes {stable_mosaic.version = 11 : i64} {
  func.func @_mm_res_kernel(%arg0: i32, %arg1: memref<512x144xbf16, #tpu.memory_space<vmem>>, %arg2: memref<144x16xbf16, #tpu.memory_space<vmem>>, %arg3: memref<512x16xf32, #tpu.memory_space<vmem>>, %arg4: memref<1x16xf32, #tpu.memory_space<vmem>>, %arg5: memref<1x16xf32, #tpu.memory_space<vmem>>, %arg6: memref<512x16xbf16, #tpu.memory_space<vmem>>) attributes {dimension_semantics = [#tpu.dimension_semantics<parallel>], iteration_bounds = array<i64: 1>, scalar_prefetch = 0 : i64, scratch_operands = 0 : i64, tpu.core_type = #tpu.core_type<tc>, window_params = [{transform_indices = @transform_0, window_bounds = array<i64: 512, 144>}, {pipeline_mode = #tpu.pipeline_mode<synchronous>, transform_indices = @transform_1, window_bounds = array<i64: 144, 16>}, {transform_indices = @transform_2, window_bounds = array<i64: 512, 16>}, {pipeline_mode = #tpu.pipeline_mode<synchronous>, transform_indices = @transform_3, window_bounds = array<i64: 1, 16>}, {pipeline_mode = #tpu.pipeline_mode<synchronous>, transform_indices = @transform_4, window_bounds = array<i64: 1, 16>}, {transform_indices = @transform_5, window_bounds = array<i64: 512, 16>}]} {
    %c0 = arith.constant 0 : index
    %c0_0 = arith.constant 0 : index
    %0 = vector.load %arg1[%c0, %c0_0] : memref<512x144xbf16, #tpu.memory_space<vmem>>, vector<512x144xbf16>
    %c0_1 = arith.constant 0 : index
    %c0_2 = arith.constant 0 : index
    %1 = vector.load %arg2[%c0_1, %c0_2] : memref<144x16xbf16, #tpu.memory_space<vmem>>, vector<144x16xbf16>
    %cst = arith.constant dense<0.000000e+00> : vector<512x16xf32>
    %2 = tpu.matmul %0, %1, %cst {dimension_numbers = #tpu.dot_dimension_numbers<[1], [0], [0], [1], [0, 0, 1, 1], [], []>} : vector<512x144xbf16>, vector<144x16xbf16>, vector<512x16xf32> -> vector<512x16xf32>
    %c0_3 = arith.constant 0 : index
    %c0_4 = arith.constant 0 : index
    %3 = vector.load %arg3[%c0_3, %c0_4] : memref<512x16xf32, #tpu.memory_space<vmem>>, vector<512x16xf32>
    %4 = arith.addf %2, %3 : vector<512x16xf32>
    %c0_5 = arith.constant 0 : index
    %c0_6 = arith.constant 0 : index
    %5 = vector.load %arg4[%c0_5, %c0_6] : memref<1x16xf32, #tpu.memory_space<vmem>>, vector<1x16xf32>
    %6 = vector.broadcast %5 : vector<1x16xf32> to vector<512x16xf32>
    %7 = arith.mulf %4, %6 : vector<512x16xf32>
    %c0_7 = arith.constant 0 : index
    %c0_8 = arith.constant 0 : index
    %8 = vector.load %arg5[%c0_7, %c0_8] : memref<1x16xf32, #tpu.memory_space<vmem>>, vector<1x16xf32>
    %9 = vector.broadcast %8 : vector<1x16xf32> to vector<512x16xf32>
    %10 = arith.addf %7, %9 : vector<512x16xf32>
    %cst_9 = arith.constant 0.000000e+00 : f32
    %11 = vector.broadcast %cst_9 : f32 to vector<512x16xf32>
    %12 = arith.maximumf %10, %11 : vector<512x16xf32>
    %13 = arith.truncf %12 : vector<512x16xf32> to vector<512x16xbf16>
    %c0_10 = arith.constant 0 : index
    %c0_11 = arith.constant 0 : index
    %14 = vector.load %arg6[%c0_10, %c0_11] : memref<512x16xbf16, #tpu.memory_space<vmem>>, vector<512x16xbf16>
    tpu.vector_store %arg6[%c0_10, %c0_11], %13 {strides = array<i32>} : memref<512x16xbf16, #tpu.memory_space<vmem>>, vector<512x16xbf16>,
    return
  }
  func.func @transform_0(%arg0: i32) -> (i32, i32) {
    %c0_i32 = arith.constant 0 : i32
    %c0_i32_0 = arith.constant 0 : i32
    return %arg0, %c0_i32 : i32, i32
  }
  func.func @transform_1(%arg0: i32) -> (i32, i32) {
    %c0_i32 = arith.constant 0 : i32
    %c0_i32_0 = arith.constant 0 : i32
    %c0_i32_1 = arith.constant 0 : i32
    return %c0_i32, %c0_i32_0 : i32, i32
  }
  func.func @transform_2(%arg0: i32) -> (i32, i32) {
    %c0_i32 = arith.constant 0 : i32
    %c0_i32_0 = arith.constant 0 : i32
    return %arg0, %c0_i32 : i32, i32
  }
  func.func @transform_3(%arg0: i32) -> (i32, i32) {
    %c0_i32 = arith.constant 0 : i32
    %c0_i32_0 = arith.constant 0 : i32
    %c0_i32_1 = arith.constant 0 : i32
    return %c0_i32, %c0_i32_0 : i32, i32
  }
  func.func @transform_4(%arg0: i32) -> (i32, i32) {
    %c0_i32 = arith.constant 0 : i32
    %c0_i32_0 = arith.constant 0 : i32
    %c0_i32_1 = arith.constant 0 : i32
    return %c0_i32, %c0_i32_0 : i32, i32
  }
  func.func @transform_5(%arg0: i32) -> (i32, i32) {
    %c0_i32 = arith.constant 0 : i32
    %c0_i32_0 = arith.constant 0 : i32
    return %arg0, %c0_i32 : i32, i32
  }
}

module attributes {stable_mosaic.version = 11 : i64} {
  func.func @_mm_kernel(%arg0: i32, %arg1: memref<128x144xbf16, #tpu.memory_space<vmem>>, %arg2: memref<144x32xbf16, #tpu.memory_space<vmem>>, %arg3: memref<1x32xf32, #tpu.memory_space<vmem>>, %arg4: memref<1x32xf32, #tpu.memory_space<vmem>>, %arg5: memref<128x32xbf16, #tpu.memory_space<vmem>>) attributes {dimension_semantics = [#tpu.dimension_semantics<parallel>], iteration_bounds = array<i64: 1>, scalar_prefetch = 0 : i64, scratch_operands = 0 : i64, tpu.core_type = #tpu.core_type<tc>, window_params = [{transform_indices = @transform_0, window_bounds = array<i64: 128, 144>}, {pipeline_mode = #tpu.pipeline_mode<synchronous>, transform_indices = @transform_1, window_bounds = array<i64: 144, 32>}, {pipeline_mode = #tpu.pipeline_mode<synchronous>, transform_indices = @transform_2, window_bounds = array<i64: 1, 32>}, {pipeline_mode = #tpu.pipeline_mode<synchronous>, transform_indices = @transform_3, window_bounds = array<i64: 1, 32>}, {transform_indices = @transform_4, window_bounds = array<i64: 128, 32>}]} {
    %c0 = arith.constant 0 : index
    %c0_0 = arith.constant 0 : index
    %0 = vector.load %arg1[%c0, %c0_0] : memref<128x144xbf16, #tpu.memory_space<vmem>>, vector<128x144xbf16>
    %c0_1 = arith.constant 0 : index
    %c0_2 = arith.constant 0 : index
    %1 = vector.load %arg2[%c0_1, %c0_2] : memref<144x32xbf16, #tpu.memory_space<vmem>>, vector<144x32xbf16>
    %cst = arith.constant dense<0.000000e+00> : vector<128x32xf32>
    %2 = tpu.matmul %0, %1, %cst {dimension_numbers = #tpu.dot_dimension_numbers<[1], [0], [0], [1], [0, 0, 1, 1], [], []>} : vector<128x144xbf16>, vector<144x32xbf16>, vector<128x32xf32> -> vector<128x32xf32>
    %c0_3 = arith.constant 0 : index
    %c0_4 = arith.constant 0 : index
    %3 = vector.load %arg3[%c0_3, %c0_4] : memref<1x32xf32, #tpu.memory_space<vmem>>, vector<1x32xf32>
    %4 = vector.broadcast %3 : vector<1x32xf32> to vector<128x32xf32>
    %5 = arith.mulf %2, %4 : vector<128x32xf32>
    %c0_5 = arith.constant 0 : index
    %c0_6 = arith.constant 0 : index
    %6 = vector.load %arg4[%c0_5, %c0_6] : memref<1x32xf32, #tpu.memory_space<vmem>>, vector<1x32xf32>
    %7 = vector.broadcast %6 : vector<1x32xf32> to vector<128x32xf32>
    %8 = arith.addf %5, %7 : vector<128x32xf32>
    %cst_7 = arith.constant 0.000000e+00 : f32
    %9 = vector.broadcast %cst_7 : f32 to vector<128x32xf32>
    %10 = arith.maximumf %8, %9 : vector<128x32xf32>
    %11 = arith.truncf %10 : vector<128x32xf32> to vector<128x32xbf16>
    %c0_8 = arith.constant 0 : index
    %c0_9 = arith.constant 0 : index
    %12 = vector.load %arg5[%c0_8, %c0_9] : memref<128x32xbf16, #tpu.memory_space<vmem>>, vector<128x32xbf16>
    tpu.vector_store %arg5[%c0_8, %c0_9], %11 {strides = array<i32>} : memref<128x32xbf16, #tpu.memory_space<vmem>>, vector<128x32xbf16>,
    return
  }
  func.func @transform_0(%arg0: i32) -> (i32, i32) {
    %c0_i32 = arith.constant 0 : i32
    %c0_i32_0 = arith.constant 0 : i32
    return %arg0, %c0_i32 : i32, i32
  }
  func.func @transform_1(%arg0: i32) -> (i32, i32) {
    %c0_i32 = arith.constant 0 : i32
    %c0_i32_0 = arith.constant 0 : i32
    %c0_i32_1 = arith.constant 0 : i32
    return %c0_i32, %c0_i32_0 : i32, i32
  }
  func.func @transform_2(%arg0: i32) -> (i32, i32) {
    %c0_i32 = arith.constant 0 : i32
    %c0_i32_0 = arith.constant 0 : i32
    %c0_i32_1 = arith.constant 0 : i32
    return %c0_i32, %c0_i32_0 : i32, i32
  }
  func.func @transform_3(%arg0: i32) -> (i32, i32) {
    %c0_i32 = arith.constant 0 : i32
    %c0_i32_0 = arith.constant 0 : i32
    %c0_i32_1 = arith.constant 0 : i32
    return %c0_i32, %c0_i32_0 : i32, i32
  }
  func.func @transform_4(%arg0: i32) -> (i32, i32) {
    %c0_i32 = arith.constant 0 : i32
    %c0_i32_0 = arith.constant 0 : i32
    return %arg0, %c0_i32 : i32, i32
  }
}

module attributes {stable_mosaic.version = 11 : i64} {
  func.func @_mm_kernel(%arg0: i32, %arg1: memref<128x16xbf16, #tpu.memory_space<vmem>>, %arg2: memref<16x32xbf16, #tpu.memory_space<vmem>>, %arg3: memref<1x32xf32, #tpu.memory_space<vmem>>, %arg4: memref<1x32xf32, #tpu.memory_space<vmem>>, %arg5: memref<128x32xf32, #tpu.memory_space<vmem>>) attributes {dimension_semantics = [#tpu.dimension_semantics<parallel>], iteration_bounds = array<i64: 1>, scalar_prefetch = 0 : i64, scratch_operands = 0 : i64, tpu.core_type = #tpu.core_type<tc>, window_params = [{transform_indices = @transform_0, window_bounds = array<i64: 128, 16>}, {pipeline_mode = #tpu.pipeline_mode<synchronous>, transform_indices = @transform_1, window_bounds = array<i64: 16, 32>}, {pipeline_mode = #tpu.pipeline_mode<synchronous>, transform_indices = @transform_2, window_bounds = array<i64: 1, 32>}, {pipeline_mode = #tpu.pipeline_mode<synchronous>, transform_indices = @transform_3, window_bounds = array<i64: 1, 32>}, {transform_indices = @transform_4, window_bounds = array<i64: 128, 32>}]} {
    %c0 = arith.constant 0 : index
    %c0_0 = arith.constant 0 : index
    %0 = vector.load %arg1[%c0, %c0_0] : memref<128x16xbf16, #tpu.memory_space<vmem>>, vector<128x16xbf16>
    %c0_1 = arith.constant 0 : index
    %c0_2 = arith.constant 0 : index
    %1 = vector.load %arg2[%c0_1, %c0_2] : memref<16x32xbf16, #tpu.memory_space<vmem>>, vector<16x32xbf16>
    %cst = arith.constant dense<0.000000e+00> : vector<128x32xf32>
    %2 = tpu.matmul %0, %1, %cst {dimension_numbers = #tpu.dot_dimension_numbers<[1], [0], [0], [1], [0, 0, 1, 1], [], []>} : vector<128x16xbf16>, vector<16x32xbf16>, vector<128x32xf32> -> vector<128x32xf32>
    %c0_3 = arith.constant 0 : index
    %c0_4 = arith.constant 0 : index
    %3 = vector.load %arg3[%c0_3, %c0_4] : memref<1x32xf32, #tpu.memory_space<vmem>>, vector<1x32xf32>
    %4 = vector.broadcast %3 : vector<1x32xf32> to vector<128x32xf32>
    %5 = arith.mulf %2, %4 : vector<128x32xf32>
    %c0_5 = arith.constant 0 : index
    %c0_6 = arith.constant 0 : index
    %6 = vector.load %arg4[%c0_5, %c0_6] : memref<1x32xf32, #tpu.memory_space<vmem>>, vector<1x32xf32>
    %7 = vector.broadcast %6 : vector<1x32xf32> to vector<128x32xf32>
    %8 = arith.addf %5, %7 : vector<128x32xf32>
    %c0_7 = arith.constant 0 : index
    %c0_8 = arith.constant 0 : index
    %9 = vector.load %arg5[%c0_7, %c0_8] : memref<128x32xf32, #tpu.memory_space<vmem>>, vector<128x32xf32>
    tpu.vector_store %arg5[%c0_7, %c0_8], %8 {strides = array<i32>} : memref<128x32xf32, #tpu.memory_space<vmem>>, vector<128x32xf32>,
    return
  }
  func.func @transform_0(%arg0: i32) -> (i32, i32) {
    %c0_i32 = arith.constant 0 : i32
    %c0_i32_0 = arith.constant 0 : i32
    return %arg0, %c0_i32 : i32, i32
  }
  func.func @transform_1(%arg0: i32) -> (i32, i32) {
    %c0_i32 = arith.constant 0 : i32
    %c0_i32_0 = arith.constant 0 : i32
    %c0_i32_1 = arith.constant 0 : i32
    return %c0_i32, %c0_i32_0 : i32, i32
  }
  func.func @transform_2(%arg0: i32) -> (i32, i32) {
    %c0_i32 = arith.constant 0 : i32
    %c0_i32_0 = arith.constant 0 : i32
    %c0_i32_1 = arith.constant 0 : i32
    return %c0_i32, %c0_i32_0 : i32, i32
  }
  func.func @transform_3(%arg0: i32) -> (i32, i32) {
    %c0_i32 = arith.constant 0 : i32
    %c0_i32_0 = arith.constant 0 : i32
    %c0_i32_1 = arith.constant 0 : i32
    return %c0_i32, %c0_i32_0 : i32, i32
  }
  func.func @transform_4(%arg0: i32) -> (i32, i32) {
    %c0_i32 = arith.constant 0 : i32
    %c0_i32_0 = arith.constant 0 : i32
    return %arg0, %c0_i32 : i32, i32
  }
}

module attributes {stable_mosaic.version = 11 : i64} {
  func.func @_mm_res_kernel(%arg0: i32, %arg1: memref<128x288xbf16, #tpu.memory_space<vmem>>, %arg2: memref<288x32xbf16, #tpu.memory_space<vmem>>, %arg3: memref<128x32xf32, #tpu.memory_space<vmem>>, %arg4: memref<1x32xf32, #tpu.memory_space<vmem>>, %arg5: memref<1x32xf32, #tpu.memory_space<vmem>>, %arg6: memref<128x32xbf16, #tpu.memory_space<vmem>>) attributes {dimension_semantics = [#tpu.dimension_semantics<parallel>], iteration_bounds = array<i64: 1>, scalar_prefetch = 0 : i64, scratch_operands = 0 : i64, tpu.core_type = #tpu.core_type<tc>, window_params = [{transform_indices = @transform_0, window_bounds = array<i64: 128, 288>}, {pipeline_mode = #tpu.pipeline_mode<synchronous>, transform_indices = @transform_1, window_bounds = array<i64: 288, 32>}, {transform_indices = @transform_2, window_bounds = array<i64: 128, 32>}, {pipeline_mode = #tpu.pipeline_mode<synchronous>, transform_indices = @transform_3, window_bounds = array<i64: 1, 32>}, {pipeline_mode = #tpu.pipeline_mode<synchronous>, transform_indices = @transform_4, window_bounds = array<i64: 1, 32>}, {transform_indices = @transform_5, window_bounds = array<i64: 128, 32>}]} {
    %c0 = arith.constant 0 : index
    %c0_0 = arith.constant 0 : index
    %0 = vector.load %arg1[%c0, %c0_0] : memref<128x288xbf16, #tpu.memory_space<vmem>>, vector<128x288xbf16>
    %c0_1 = arith.constant 0 : index
    %c0_2 = arith.constant 0 : index
    %1 = vector.load %arg2[%c0_1, %c0_2] : memref<288x32xbf16, #tpu.memory_space<vmem>>, vector<288x32xbf16>
    %cst = arith.constant dense<0.000000e+00> : vector<128x32xf32>
    %2 = tpu.matmul %0, %1, %cst {dimension_numbers = #tpu.dot_dimension_numbers<[1], [0], [0], [1], [0, 0, 1, 1], [], []>} : vector<128x288xbf16>, vector<288x32xbf16>, vector<128x32xf32> -> vector<128x32xf32>
    %c0_3 = arith.constant 0 : index
    %c0_4 = arith.constant 0 : index
    %3 = vector.load %arg3[%c0_3, %c0_4] : memref<128x32xf32, #tpu.memory_space<vmem>>, vector<128x32xf32>
    %4 = arith.addf %2, %3 : vector<128x32xf32>
    %c0_5 = arith.constant 0 : index
    %c0_6 = arith.constant 0 : index
    %5 = vector.load %arg4[%c0_5, %c0_6] : memref<1x32xf32, #tpu.memory_space<vmem>>, vector<1x32xf32>
    %6 = vector.broadcast %5 : vector<1x32xf32> to vector<128x32xf32>
    %7 = arith.mulf %4, %6 : vector<128x32xf32>
    %c0_7 = arith.constant 0 : index
    %c0_8 = arith.constant 0 : index
    %8 = vector.load %arg5[%c0_7, %c0_8] : memref<1x32xf32, #tpu.memory_space<vmem>>, vector<1x32xf32>
    %9 = vector.broadcast %8 : vector<1x32xf32> to vector<128x32xf32>
    %10 = arith.addf %7, %9 : vector<128x32xf32>
    %cst_9 = arith.constant 0.000000e+00 : f32
    %11 = vector.broadcast %cst_9 : f32 to vector<128x32xf32>
    %12 = arith.maximumf %10, %11 : vector<128x32xf32>
    %13 = arith.truncf %12 : vector<128x32xf32> to vector<128x32xbf16>
    %c0_10 = arith.constant 0 : index
    %c0_11 = arith.constant 0 : index
    %14 = vector.load %arg6[%c0_10, %c0_11] : memref<128x32xbf16, #tpu.memory_space<vmem>>, vector<128x32xbf16>
    tpu.vector_store %arg6[%c0_10, %c0_11], %13 {strides = array<i32>} : memref<128x32xbf16, #tpu.memory_space<vmem>>, vector<128x32xbf16>,
    return
  }
  func.func @transform_0(%arg0: i32) -> (i32, i32) {
    %c0_i32 = arith.constant 0 : i32
    %c0_i32_0 = arith.constant 0 : i32
    return %arg0, %c0_i32 : i32, i32
  }
  func.func @transform_1(%arg0: i32) -> (i32, i32) {
    %c0_i32 = arith.constant 0 : i32
    %c0_i32_0 = arith.constant 0 : i32
    %c0_i32_1 = arith.constant 0 : i32
    return %c0_i32, %c0_i32_0 : i32, i32
  }
  func.func @transform_2(%arg0: i32) -> (i32, i32) {
    %c0_i32 = arith.constant 0 : i32
    %c0_i32_0 = arith.constant 0 : i32
    return %arg0, %c0_i32 : i32, i32
  }
  func.func @transform_3(%arg0: i32) -> (i32, i32) {
    %c0_i32 = arith.constant 0 : i32
    %c0_i32_0 = arith.constant 0 : i32
    %c0_i32_1 = arith.constant 0 : i32
    return %c0_i32, %c0_i32_0 : i32, i32
  }
  func.func @transform_4(%arg0: i32) -> (i32, i32) {
    %c0_i32 = arith.constant 0 : i32
    %c0_i32_0 = arith.constant 0 : i32
    %c0_i32_1 = arith.constant 0 : i32
    return %c0_i32, %c0_i32_0 : i32, i32
  }
  func.func @transform_5(%arg0: i32) -> (i32, i32) {
    %c0_i32 = arith.constant 0 : i32
    %c0_i32_0 = arith.constant 0 : i32
    return %arg0, %c0_i32 : i32, i32
  }
}

module attributes {stable_mosaic.version = 11 : i64} {
  func.func @_mm_kernel(%arg0: i32, %arg1: memref<32x288xbf16, #tpu.memory_space<vmem>>, %arg2: memref<288x64xbf16, #tpu.memory_space<vmem>>, %arg3: memref<1x64xf32, #tpu.memory_space<vmem>>, %arg4: memref<1x64xf32, #tpu.memory_space<vmem>>, %arg5: memref<32x64xbf16, #tpu.memory_space<vmem>>) attributes {dimension_semantics = [#tpu.dimension_semantics<parallel>], iteration_bounds = array<i64: 1>, scalar_prefetch = 0 : i64, scratch_operands = 0 : i64, tpu.core_type = #tpu.core_type<tc>, window_params = [{transform_indices = @transform_0, window_bounds = array<i64: 32, 288>}, {pipeline_mode = #tpu.pipeline_mode<synchronous>, transform_indices = @transform_1, window_bounds = array<i64: 288, 64>}, {pipeline_mode = #tpu.pipeline_mode<synchronous>, transform_indices = @transform_2, window_bounds = array<i64: 1, 64>}, {pipeline_mode = #tpu.pipeline_mode<synchronous>, transform_indices = @transform_3, window_bounds = array<i64: 1, 64>}, {transform_indices = @transform_4, window_bounds = array<i64: 32, 64>}]} {
    %c0 = arith.constant 0 : index
    %c0_0 = arith.constant 0 : index
    %0 = vector.load %arg1[%c0, %c0_0] : memref<32x288xbf16, #tpu.memory_space<vmem>>, vector<32x288xbf16>
    %c0_1 = arith.constant 0 : index
    %c0_2 = arith.constant 0 : index
    %1 = vector.load %arg2[%c0_1, %c0_2] : memref<288x64xbf16, #tpu.memory_space<vmem>>, vector<288x64xbf16>
    %cst = arith.constant dense<0.000000e+00> : vector<32x64xf32>
    %2 = tpu.matmul %0, %1, %cst {dimension_numbers = #tpu.dot_dimension_numbers<[1], [0], [0], [1], [0, 0, 1, 1], [], []>} : vector<32x288xbf16>, vector<288x64xbf16>, vector<32x64xf32> -> vector<32x64xf32>
    %c0_3 = arith.constant 0 : index
    %c0_4 = arith.constant 0 : index
    %3 = vector.load %arg3[%c0_3, %c0_4] : memref<1x64xf32, #tpu.memory_space<vmem>>, vector<1x64xf32>
    %4 = vector.broadcast %3 : vector<1x64xf32> to vector<32x64xf32>
    %5 = arith.mulf %2, %4 : vector<32x64xf32>
    %c0_5 = arith.constant 0 : index
    %c0_6 = arith.constant 0 : index
    %6 = vector.load %arg4[%c0_5, %c0_6] : memref<1x64xf32, #tpu.memory_space<vmem>>, vector<1x64xf32>
    %7 = vector.broadcast %6 : vector<1x64xf32> to vector<32x64xf32>
    %8 = arith.addf %5, %7 : vector<32x64xf32>
    %cst_7 = arith.constant 0.000000e+00 : f32
    %9 = vector.broadcast %cst_7 : f32 to vector<32x64xf32>
    %10 = arith.maximumf %8, %9 : vector<32x64xf32>
    %11 = arith.truncf %10 : vector<32x64xf32> to vector<32x64xbf16>
    %c0_8 = arith.constant 0 : index
    %c0_9 = arith.constant 0 : index
    %12 = vector.load %arg5[%c0_8, %c0_9] : memref<32x64xbf16, #tpu.memory_space<vmem>>, vector<32x64xbf16>
    tpu.vector_store %arg5[%c0_8, %c0_9], %11 {strides = array<i32>} : memref<32x64xbf16, #tpu.memory_space<vmem>>, vector<32x64xbf16>,
    return
  }
  func.func @transform_0(%arg0: i32) -> (i32, i32) {
    %c0_i32 = arith.constant 0 : i32
    %c0_i32_0 = arith.constant 0 : i32
    return %arg0, %c0_i32 : i32, i32
  }
  func.func @transform_1(%arg0: i32) -> (i32, i32) {
    %c0_i32 = arith.constant 0 : i32
    %c0_i32_0 = arith.constant 0 : i32
    %c0_i32_1 = arith.constant 0 : i32
    return %c0_i32, %c0_i32_0 : i32, i32
  }
  func.func @transform_2(%arg0: i32) -> (i32, i32) {
    %c0_i32 = arith.constant 0 : i32
    %c0_i32_0 = arith.constant 0 : i32
    %c0_i32_1 = arith.constant 0 : i32
    return %c0_i32, %c0_i32_0 : i32, i32
  }
  func.func @transform_3(%arg0: i32) -> (i32, i32) {
    %c0_i32 = arith.constant 0 : i32
    %c0_i32_0 = arith.constant 0 : i32
    %c0_i32_1 = arith.constant 0 : i32
    return %c0_i32, %c0_i32_0 : i32, i32
  }
  func.func @transform_4(%arg0: i32) -> (i32, i32) {
    %c0_i32 = arith.constant 0 : i32
    %c0_i32_0 = arith.constant 0 : i32
    return %arg0, %c0_i32 : i32, i32
  }
}

module attributes {stable_mosaic.version = 11 : i64} {
  func.func @_mm_res_kernel(%arg0: i32, %arg1: memref<32x576xbf16, #tpu.memory_space<vmem>>, %arg2: memref<576x64xbf16, #tpu.memory_space<vmem>>, %arg3: memref<32x64xf32, #tpu.memory_space<vmem>>, %arg4: memref<1x64xf32, #tpu.memory_space<vmem>>, %arg5: memref<1x64xf32, #tpu.memory_space<vmem>>, %arg6: memref<32x64xbf16, #tpu.memory_space<vmem>>) attributes {dimension_semantics = [#tpu.dimension_semantics<parallel>], iteration_bounds = array<i64: 1>, scalar_prefetch = 0 : i64, scratch_operands = 0 : i64, tpu.core_type = #tpu.core_type<tc>, window_params = [{transform_indices = @transform_0, window_bounds = array<i64: 32, 576>}, {pipeline_mode = #tpu.pipeline_mode<synchronous>, transform_indices = @transform_1, window_bounds = array<i64: 576, 64>}, {transform_indices = @transform_2, window_bounds = array<i64: 32, 64>}, {pipeline_mode = #tpu.pipeline_mode<synchronous>, transform_indices = @transform_3, window_bounds = array<i64: 1, 64>}, {pipeline_mode = #tpu.pipeline_mode<synchronous>, transform_indices = @transform_4, window_bounds = array<i64: 1, 64>}, {transform_indices = @transform_5, window_bounds = array<i64: 32, 64>}]} {
    %c0 = arith.constant 0 : index
    %c0_0 = arith.constant 0 : index
    %0 = vector.load %arg1[%c0, %c0_0] : memref<32x576xbf16, #tpu.memory_space<vmem>>, vector<32x576xbf16>
    %c0_1 = arith.constant 0 : index
    %c0_2 = arith.constant 0 : index
    %1 = vector.load %arg2[%c0_1, %c0_2] : memref<576x64xbf16, #tpu.memory_space<vmem>>, vector<576x64xbf16>
    %cst = arith.constant dense<0.000000e+00> : vector<32x64xf32>
    %2 = tpu.matmul %0, %1, %cst {dimension_numbers = #tpu.dot_dimension_numbers<[1], [0], [0], [1], [0, 0, 1, 1], [], []>} : vector<32x576xbf16>, vector<576x64xbf16>, vector<32x64xf32> -> vector<32x64xf32>
    %c0_3 = arith.constant 0 : index
    %c0_4 = arith.constant 0 : index
    %3 = vector.load %arg3[%c0_3, %c0_4] : memref<32x64xf32, #tpu.memory_space<vmem>>, vector<32x64xf32>
    %4 = arith.addf %2, %3 : vector<32x64xf32>
    %c0_5 = arith.constant 0 : index
    %c0_6 = arith.constant 0 : index
    %5 = vector.load %arg4[%c0_5, %c0_6] : memref<1x64xf32, #tpu.memory_space<vmem>>, vector<1x64xf32>
    %6 = vector.broadcast %5 : vector<1x64xf32> to vector<32x64xf32>
    %7 = arith.mulf %4, %6 : vector<32x64xf32>
    %c0_7 = arith.constant 0 : index
    %c0_8 = arith.constant 0 : index
    %8 = vector.load %arg5[%c0_7, %c0_8] : memref<1x64xf32, #tpu.memory_space<vmem>>, vector<1x64xf32>
    %9 = vector.broadcast %8 : vector<1x64xf32> to vector<32x64xf32>
    %10 = arith.addf %7, %9 : vector<32x64xf32>
    %cst_9 = arith.constant 0.000000e+00 : f32
    %11 = vector.broadcast %cst_9 : f32 to vector<32x64xf32>
    %12 = arith.maximumf %10, %11 : vector<32x64xf32>
    %13 = arith.truncf %12 : vector<32x64xf32> to vector<32x64xbf16>
    %c0_10 = arith.constant 0 : index
    %c0_11 = arith.constant 0 : index
    %14 = vector.load %arg6[%c0_10, %c0_11] : memref<32x64xbf16, #tpu.memory_space<vmem>>, vector<32x64xbf16>
    tpu.vector_store %arg6[%c0_10, %c0_11], %13 {strides = array<i32>} : memref<32x64xbf16, #tpu.memory_space<vmem>>, vector<32x64xbf16>,
    return
  }
  func.func @transform_0(%arg0: i32) -> (i32, i32) {
    %c0_i32 = arith.constant 0 : i32
    %c0_i32_0 = arith.constant 0 : i32
    return %arg0, %c0_i32 : i32, i32
  }
  func.func @transform_1(%arg0: i32) -> (i32, i32) {
    %c0_i32 = arith.constant 0 : i32
    %c0_i32_0 = arith.constant 0 : i32
    %c0_i32_1 = arith.constant 0 : i32
    return %c0_i32, %c0_i32_0 : i32, i32
  }
  func.func @transform_2(%arg0: i32) -> (i32, i32) {
    %c0_i32 = arith.constant 0 : i32
    %c0_i32_0 = arith.constant 0 : i32
    return %arg0, %c0_i32 : i32, i32
  }
  func.func @transform_3(%arg0: i32) -> (i32, i32) {
    %c0_i32 = arith.constant 0 : i32
    %c0_i32_0 = arith.constant 0 : i32
    %c0_i32_1 = arith.constant 0 : i32
    return %c0_i32, %c0_i32_0 : i32, i32
  }
  func.func @transform_4(%arg0: i32) -> (i32, i32) {
    %c0_i32 = arith.constant 0 : i32
    %c0_i32_0 = arith.constant 0 : i32
    %c0_i32_1 = arith.constant 0 : i32
    return %c0_i32, %c0_i32_0 : i32, i32
  }
  func.func @transform_5(%arg0: i32) -> (i32, i32) {
    %c0_i32 = arith.constant 0 : i32
    %c0_i32_0 = arith.constant 0 : i32
    return %arg0, %c0_i32 : i32, i32
  }
}

module attributes {stable_mosaic.version = 11 : i64} {
  func.func @_mm_kernel(%arg0: i32, %arg1: memref<32x32xbf16, #tpu.memory_space<vmem>>, %arg2: memref<32x64xbf16, #tpu.memory_space<vmem>>, %arg3: memref<1x64xf32, #tpu.memory_space<vmem>>, %arg4: memref<1x64xf32, #tpu.memory_space<vmem>>, %arg5: memref<32x64xf32, #tpu.memory_space<vmem>>) attributes {dimension_semantics = [#tpu.dimension_semantics<parallel>], iteration_bounds = array<i64: 1>, scalar_prefetch = 0 : i64, scratch_operands = 0 : i64, tpu.core_type = #tpu.core_type<tc>, window_params = [{transform_indices = @transform_0, window_bounds = array<i64: 32, 32>}, {pipeline_mode = #tpu.pipeline_mode<synchronous>, transform_indices = @transform_1, window_bounds = array<i64: 32, 64>}, {pipeline_mode = #tpu.pipeline_mode<synchronous>, transform_indices = @transform_2, window_bounds = array<i64: 1, 64>}, {pipeline_mode = #tpu.pipeline_mode<synchronous>, transform_indices = @transform_3, window_bounds = array<i64: 1, 64>}, {transform_indices = @transform_4, window_bounds = array<i64: 32, 64>}]} {
    %c0 = arith.constant 0 : index
    %c0_0 = arith.constant 0 : index
    %0 = vector.load %arg1[%c0, %c0_0] : memref<32x32xbf16, #tpu.memory_space<vmem>>, vector<32x32xbf16>
    %c0_1 = arith.constant 0 : index
    %c0_2 = arith.constant 0 : index
    %1 = vector.load %arg2[%c0_1, %c0_2] : memref<32x64xbf16, #tpu.memory_space<vmem>>, vector<32x64xbf16>
    %cst = arith.constant dense<0.000000e+00> : vector<32x64xf32>
    %2 = tpu.matmul %0, %1, %cst {dimension_numbers = #tpu.dot_dimension_numbers<[1], [0], [0], [1], [0, 0, 1, 1], [], []>} : vector<32x32xbf16>, vector<32x64xbf16>, vector<32x64xf32> -> vector<32x64xf32>
    %c0_3 = arith.constant 0 : index
    %c0_4 = arith.constant 0 : index
    %3 = vector.load %arg3[%c0_3, %c0_4] : memref<1x64xf32, #tpu.memory_space<vmem>>, vector<1x64xf32>
    %4 = vector.broadcast %3 : vector<1x64xf32> to vector<32x64xf32>
    %5 = arith.mulf %2, %4 : vector<32x64xf32>
    %c0_5 = arith.constant 0 : index
    %c0_6 = arith.constant 0 : index
    %6 = vector.load %arg4[%c0_5, %c0_6] : memref<1x64xf32, #tpu.memory_space<vmem>>, vector<1x64xf32>
    %7 = vector.broadcast %6 : vector<1x64xf32> to vector<32x64xf32>
    %8 = arith.addf %5, %7 : vector<32x64xf32>
    %c0_7 = arith.constant 0 : index
    %c0_8 = arith.constant 0 : index
    %9 = vector.load %arg5[%c0_7, %c0_8] : memref<32x64xf32, #tpu.memory_space<vmem>>, vector<32x64xf32>
    tpu.vector_store %arg5[%c0_7, %c0_8], %8 {strides = array<i32>} : memref<32x64xf32, #tpu.memory_space<vmem>>, vector<32x64xf32>,
    return
  }
  func.func @transform_0(%arg0: i32) -> (i32, i32) {
    %c0_i32 = arith.constant 0 : i32
    %c0_i32_0 = arith.constant 0 : i32
    return %arg0, %c0_i32 : i32, i32
  }
  func.func @transform_1(%arg0: i32) -> (i32, i32) {
    %c0_i32 = arith.constant 0 : i32
    %c0_i32_0 = arith.constant 0 : i32
    %c0_i32_1 = arith.constant 0 : i32
    return %c0_i32, %c0_i32_0 : i32, i32
  }
  func.func @transform_2(%arg0: i32) -> (i32, i32) {
    %c0_i32 = arith.constant 0 : i32
    %c0_i32_0 = arith.constant 0 : i32
    %c0_i32_1 = arith.constant 0 : i32
    return %c0_i32, %c0_i32_0 : i32, i32
  }
  func.func @transform_3(%arg0: i32) -> (i32, i32) {
    %c0_i32 = arith.constant 0 : i32
    %c0_i32_0 = arith.constant 0 : i32
    %c0_i32_1 = arith.constant 0 : i32
    return %c0_i32, %c0_i32_0 : i32, i32
  }
  func.func @transform_4(%arg0: i32) -> (i32, i32) {
    %c0_i32 = arith.constant 0 : i32
    %c0_i32_0 = arith.constant 0 : i32
    return %arg0, %c0_i32 : i32, i32
  }
}

module attributes {stable_mosaic.version = 11 : i64} {
  func.func @_head_kernel(%arg0: i32, %arg1: memref<2x16x64xbf16, #tpu.memory_space<vmem>>, %arg2: memref<64x10xf32, #tpu.memory_space<vmem>>, %arg3: memref<1x10xf32, #tpu.memory_space<vmem>>, %arg4: memref<2x10xf32, #tpu.memory_space<vmem>>) attributes {dimension_semantics = [#tpu.dimension_semantics<arbitrary>], iteration_bounds = array<i64: 1>, scalar_prefetch = 0 : i64, scratch_operands = 0 : i64, tpu.core_type = #tpu.core_type<tc>, window_params = [{pipeline_mode = #tpu.pipeline_mode<synchronous>, transform_indices = @transform_0, window_bounds = array<i64: 2, 16, 64>}, {pipeline_mode = #tpu.pipeline_mode<synchronous>, transform_indices = @transform_1, window_bounds = array<i64: 64, 10>}, {pipeline_mode = #tpu.pipeline_mode<synchronous>, transform_indices = @transform_2, window_bounds = array<i64: 1, 10>}, {pipeline_mode = #tpu.pipeline_mode<synchronous>, transform_indices = @transform_3, window_bounds = array<i64: 2, 10>}]} {
    %c0 = arith.constant 0 : index
    %c0_0 = arith.constant 0 : index
    %c0_1 = arith.constant 0 : index
    %0 = vector.load %arg1[%c0, %c0_0, %c0_1] : memref<2x16x64xbf16, #tpu.memory_space<vmem>>, vector<2x16x64xbf16>
    %1 = arith.extf %0 : vector<2x16x64xbf16> to vector<2x16x64xf32>
    %cst = arith.constant dense<0.000000e+00> : vector<2x64xf32>
    %2 = vector.multi_reduction <add>, %1, %cst [1] : vector<2x16x64xf32> to vector<2x64xf32>
    %cst_2 = arith.constant 6.250000e-02 : f32
    %3 = vector.broadcast %cst_2 : f32 to vector<2x64xf32>
    %4 = arith.mulf %2, %3 : vector<2x64xf32>
    %c0_3 = arith.constant 0 : index
    %c0_4 = arith.constant 0 : index
    %5 = vector.load %arg2[%c0_3, %c0_4] : memref<64x10xf32, #tpu.memory_space<vmem>>, vector<64x10xf32>
    %cst_5 = arith.constant dense<0.000000e+00> : vector<2x10xf32>
    %6 = tpu.matmul %4, %5, %cst_5 {dimension_numbers = #tpu.dot_dimension_numbers<[1], [0], [0], [1], [0, 0, 1, 1], [], []>} : vector<2x64xf32>, vector<64x10xf32>, vector<2x10xf32> -> vector<2x10xf32>
    %c0_6 = arith.constant 0 : index
    %c0_7 = arith.constant 0 : index
    %7 = vector.load %arg3[%c0_6, %c0_7] : memref<1x10xf32, #tpu.memory_space<vmem>>, vector<1x10xf32>
    %8 = vector.broadcast %7 : vector<1x10xf32> to vector<2x10xf32>
    %9 = arith.addf %6, %8 : vector<2x10xf32>
    %c0_8 = arith.constant 0 : index
    %c0_9 = arith.constant 0 : index
    %10 = vector.load %arg4[%c0_8, %c0_9] : memref<2x10xf32, #tpu.memory_space<vmem>>, vector<2x10xf32>
    tpu.vector_store %arg4[%c0_8, %c0_9], %9 {strides = array<i32>} : memref<2x10xf32, #tpu.memory_space<vmem>>, vector<2x10xf32>,
    return
  }
  func.func @transform_0(%arg0: i32) -> (i32, i32, i32) {
    %c0_i32 = arith.constant 0 : i32
    %c0_i32_0 = arith.constant 0 : i32
    %c0_i32_1 = arith.constant 0 : i32
    %c0_i32_2 = arith.constant 0 : i32
    return %c0_i32, %c0_i32_0, %c0_i32_1 : i32, i32, i32
  }
  func.func @transform_1(%arg0: i32) -> (i32, i32) {
    %c0_i32 = arith.constant 0 : i32
    %c0_i32_0 = arith.constant 0 : i32
    %c0_i32_1 = arith.constant 0 : i32
    return %c0_i32, %c0_i32_0 : i32, i32
  }
  func.func @transform_2(%arg0: i32) -> (i32, i32) {
    %c0_i32 = arith.constant 0 : i32
    %c0_i32_0 = arith.constant 0 : i32
    %c0_i32_1 = arith.constant 0 : i32
    return %c0_i32, %c0_i32_0 : i32, i32
  }
  func.func @transform_3(%arg0: i32) -> (i32, i32) {
    %c0_i32 = arith.constant 0 : i32
    %c0_i32_0 = arith.constant 0 : i32
    %c0_i32_1 = arith.constant 0 : i32
    return %c0_i32, %c0_i32_0 : i32, i32
  }
}

</mosaic_0001>

<bundles_post_ra>
// kernel: networks_forward.10
= control target key start
LH: loop header
LB: loop body
LE: loop exit
PB: predicated region body
PF: predicated region fallthrough
CT: control target
= control target key end

     0   :  { %vm356_vm0 = vcmask 1044480   ;;  %vm357_vm1 = vcmask 1045504   ;;  %vm259_vm2 = vcmask 220160   ;;  %v1589_v1 = vmov 65535   ;;  %s2404_s1 = inlined_call_operand.vmem [shape: bf16[27,16], index: 1, kind: input, shape index: {}]   ;;  %s2405_s0 = inlined_call_operand.vmem [shape: bf16[512,27], index: 0, kind: input, shape index: {}]   ;;  %s2406_s2 = inlined_call_operand.vmem [shape: f32[1,16], index: 2, kind: input, shape index: {}]   ;;  %s2407_s3 = inlined_call_operand.vmem [shape: f32[1,16], index: 3, kind: input, shape index: {}]   ;;  %s2408_s4 = inlined_call_operand.vmem [shape: f32[512,16], index: 4, kind: output, shape index: {0}]   ;;  %s2409_s5 = inlined_call_operand.vmem [shape: bf16[512,16], index: 5, kind: output, shape index: {1}]  }
   0x1   :  { %v1555_v0 = vld [vmem:[%s2404_s1] sm:$0xff]   ;;  %v358_v2 = vsel %vm356_vm0, 4294967295, %v1589_v1  ;;  %v1556_v3 = vld [vmem:[%s2404_s1 + $0x8] sm:$0x3f]   ;;  %v1561_v10 = vld [vmem:[%s2405_s0 + $0x10] sm:$0xff]   ;;  %vm652_vm3 = vcmask 130048  }
   0x2   :  { %1482 = vmatprep.subr.bf16.mxu0 %v1555_v0  ;;  %1550 = vmatprep.subr.bf16.mxu1 %v1555_v0  ;;  %v359_v4 = vsel %vm357_vm1, %v358_v2, 0  ;;  %v1557_v5 = vld [vmem:[%s2405_s0] sm:$0xff]   ;;  %v1559_v8 = vld [vmem:[%s2405_s0 + $0x8] sm:$0xff]   ;;  %v1562_v11 = vld [vmem:[%s2405_s0 + $0x90] sm:$0xff]   ;;  %vm1179_vm4 = vcmask 125952  }
   0x3   :  { %1483 = vmatpush3.bf16.msra.mxu0 %v1555_v0  ;;  %1552 = vmatpush3.bf16.msra.mxu1 %v1555_v0  ;;  %v361_v6 = vand.u32 %v1556_v3, %v359_v4  ;;  %v1558_v7 = vld [vmem:[%s2405_s0 + $0x80] sm:$0xff]   ;;  %v1560_v9 = vld [vmem:[%s2405_s0 + $0x88] sm:$0xff]   ;;  %v1563_v12 = vld [vmem:[%s2405_s0 + $0x18] sm:$0xff]  }
   0x4   :  { %1486 = vmatprep.mubr.msk.bf16.mxu0 %vm259_vm2, %v1557_v5  ;;  %1518 = vmatprep.mubr.msk.bf16.mxu1 %vm259_vm2, %v1558_v7  ;;  %v1564_v13 = vld [vmem:[%s2405_s0 + $0x98] sm:$0xff]   ;;  %v1565_v14 = vld [vmem:[%s2405_s0 + $0x20] sm:$0xff]   ;;  %v1567_v16 = vld [vmem:[%s2405_s0 + $0x28] sm:$0xff]  }
   0x5   :  { %1484 = vmatprep.subr.bf16.mxu0 %v361_v6  ;;  %1551 = vmatprep.subr.bf16.mxu1 %v361_v6  ;;  %v1566_v15 = vld [vmem:[%s2405_s0 + $0xa0] sm:$0xff]   ;;  %v1568_v17 = vld [vmem:[%s2405_s0 + $0xa8] sm:$0xff]   ;;  %v1569_v18 = vld [vmem:[%s2405_s0 + $0x30] sm:$0xff]  }
   0x6   :  { %v1570_v19 = vld [vmem:[%s2405_s0 + $0xb0] sm:$0xff]   ;;  %v1571_v20 = vld [vmem:[%s2405_s0 + $0x38] sm:$0xff]   ;;  %v1573_v22 = vld [vmem:[%s2405_s0 + $0x40] sm:$0xff]  }
   0x7   :  { %1485 = vmatpush3.bf16.msra.mxu0 %v361_v6  ;;  %1553 = vmatpush3.bf16.msra.mxu1 %v361_v6  ;;  %v1572_v21 = vld [vmem:[%s2405_s0 + $0xb8] sm:$0xff]   ;;  %v1574_v23 = vld [vmem:[%s2405_s0 + $0xc0] sm:$0xff]   ;;  %v1575_v24 = vld [vmem:[%s2405_s0 + $0x48] sm:$0xff]  }
   0x8   :  { %v1576_v25 = vld [vmem:[%s2405_s0 + $0xc8] sm:$0xff]   ;;  %v1577_v26 = vld [vmem:[%s2405_s0 + $0x50] sm:$0xff]   ;;  %v1579_v28 = vld [vmem:[%s2405_s0 + $0x58] sm:$0xff]  }
   0x9   :  { %v1578_v27 = vld [vmem:[%s2405_s0 + $0xd0] sm:$0xff]   ;;  %v1580_v29 = vld [vmem:[%s2405_s0 + $0xd8] sm:$0xff]   ;;  %v1581_v30 = vld [vmem:[%s2405_s0 + $0x60] sm:$0xff]  }
   0xa   :  { %1487 = vmatmul.mubr.msk.bf16.vlgmr.msra.gmra.mrb[0].mxu0 %vm259_vm2, %v1559_v8  ;;  %1519 = vmatmul.mubr.msk.bf16.vlgmr.msra.gmra.mrb[0].mxu1 %vm259_vm2, %v1560_v9  ;;  %v1582_v31 = vld [vmem:[%s2405_s0 + $0xe0] sm:$0xff]   ;;  %v1583_v32 = vld [vmem:[%s2405_s0 + $0x68] sm:$0xff]   ;;  %v1585_v34 = vld [vmem:[%s2405_s0 + $0x70] sm:$0xff]  }
   0xb   :  { %1490 = vmatprep.mubr.msk.bf16.mxu0 %vm259_vm2, %v1561_v10  ;;  %1522 = vmatprep.mubr.msk.bf16.mxu1 %vm259_vm2, %v1562_v11  ;;  %v1584_v33 = vld [vmem:[%s2405_s0 + $0xe8] sm:$0xff]   ;;  %v1586_v35 = vld [vmem:[%s2405_s0 + $0xf0] sm:$0xff]   ;;  %v1587_v36 = vld [vmem:[%s2405_s0 + $0x78] sm:$0xff]  }
   0xc   :  { %v1588_v37 = vld [vmem:[%s2405_s0 + $0xf8] sm:$0xff]   ;;  %v1757_v38 = vld [vmem:[%s2406_s2] ss:$0 sm:$0xff] }
   0xd   :  { %v1762_v40 = vld [vmem:[%s2407_s3] ss:$0 sm:$0xff] }
  0x12   :  { %1491 = vmatmul.mubr.msk.bf16.gmra.mrb[4].mxu0 %vm259_vm2, %v1563_v12  ;;  %1523 = vmatmul.mubr.msk.bf16.gmra.mrb[4].mxu1 %vm259_vm2, %v1564_v13 }
  0x13   :  { %1494 = vmatprep.mubr.msk.bf16.mxu0 %vm259_vm2, %v1565_v14  ;;  %1526 = vmatprep.mubr.msk.bf16.mxu1 %vm259_vm2, %v1566_v15 }
  0x1a   :  { %1495 = vmatmul.mubr.msk.bf16.gmra.mrb[8].mxu0 %vm259_vm2, %v1567_v16  ;;  %1527 = vmatmul.mubr.msk.bf16.gmra.mrb[8].mxu1 %vm259_vm2, %v1568_v17 }
  0x1b   :  { %1498 = vmatprep.mubr.msk.bf16.mxu0 %vm259_vm2, %v1569_v18  ;;  %1530 = vmatprep.mubr.msk.bf16.mxu1 %vm259_vm2, %v1570_v19 }
  0x22   :  { %1499 = vmatmul.mubr.msk.bf16.gmra.mrb[12].mxu0 %vm259_vm2, %v1571_v20  ;;  %1531 = vmatmul.mubr.msk.bf16.gmra.mrb[12].mxu1 %vm259_vm2, %v1572_v21 }
  0x23   :  { %1502 = vmatprep.mubr.msk.bf16.mxu0 %vm259_vm2, %v1573_v22  ;;  %1534 = vmatprep.mubr.msk.bf16.mxu1 %vm259_vm2, %v1574_v23 }
  0x2a   :  { %1503 = vmatmul.mubr.msk.bf16.gmra.mrb[16].mxu0 %vm259_vm2, %v1575_v24  ;;  %1535 = vmatmul.mubr.msk.bf16.gmra.mrb[16].mxu1 %vm259_vm2, %v1576_v25 }
  0x2b   :  { %1506 = vmatprep.mubr.msk.bf16.mxu0 %vm259_vm2, %v1577_v26  ;;  %1538 = vmatprep.mubr.msk.bf16.mxu1 %vm259_vm2, %v1578_v27 }
  0x32   :  { %1507 = vmatmul.mubr.msk.bf16.gmra.mrb[20].mxu0 %vm259_vm2, %v1579_v28  ;;  %1539 = vmatmul.mubr.msk.bf16.gmra.mrb[20].mxu1 %vm259_vm2, %v1580_v29 }
  0x33   :  { %1510 = vmatprep.mubr.msk.bf16.mxu0 %vm259_vm2, %v1581_v30  ;;  %1542 = vmatprep.mubr.msk.bf16.mxu1 %vm259_vm2, %v1582_v31 }
  0x3a   :  { %1511 = vmatmul.mubr.msk.bf16.gmra.mrb[24].mxu0 %vm259_vm2, %v1583_v32  ;;  %1543 = vmatmul.mubr.msk.bf16.gmra.mrb[24].mxu1 %vm259_vm2, %v1584_v33 }
  0x3b   :  { %1514 = vmatprep.mubr.msk.bf16.mxu0 %vm259_vm2, %v1585_v34  ;;  %1546 = vmatprep.mubr.msk.bf16.mxu1 %vm259_vm2, %v1586_v35 }
  0x42   :  { %1515 = vmatmul.mubr.msk.bf16.gmra.mrb[28].mxu0 %vm259_vm2, %v1587_v36  ;;  %1547 = vmatmul.mubr.msk.bf16.gmra.mrb[28].mxu1 %vm259_vm2, %v1588_v37 }
  0xdd   :  { %v1488_v39 = vpop.f32.mrb[0].mxu0  ;;  %v1520_v41 = vpop.f32.mrb[0].mxu1 }
  0xde   :  { %655 = vst.msk [vmem:[%s2408_s4 + $0x10] sm:$0xff] %vm652_vm3, %v1488_v39  ;;  %v726_v42 = vmul.f32 %v1488_v39, %v1757_v38  ;;  %687 = vst.msk [vmem:[%s2408_s4 + $0x110] sm:$0xff] %vm652_vm3, %v1520_v41  ;;  %v758_v43 = vmul.f32 %v1520_v41, %v1757_v38  ;;  %v397_v44 = vpop.f32.mrb[1].mxu0  ;;  %v525_v45 = vpop.f32.mrb[1].mxu1 }
  0xdf   :  { %653 = vst.msk [vmem:[%s2408_s4] sm:$0xff] %vm652_vm3, %v397_v44  ;;  %v724_v46 = vmul.f32 %v1757_v38, %v397_v44  ;;  %685 = vst.msk [vmem:[%s2408_s4 + $0x100] sm:$0xff] %vm652_vm3, %v525_v45  ;;  %v756_v47 = vmul.f32 %v1757_v38, %v525_v45  ;;  %v1489_v48 = vpop.f32.mrb[2].mxu0  ;;  %v1521_v49 = vpop.f32.mrb[2].mxu1 }
  0xe0   :  { %v797_v50 = vadd.f32 %v1762_v40, %v726_v42  ;;  %v829_v51 = vadd.f32 %v1762_v40, %v758_v43  ;;  %656 = vst.msk [vmem:[%s2408_s4 + $0x18] sm:$0xff] %vm652_vm3, %v1489_v48  ;;  %v727_v52 = vmul.f32 %v1489_v48, %v1757_v38  ;;  %688 = vst.msk [vmem:[%s2408_s4 + $0x118] sm:$0xff] %vm652_vm3, %v1521_v49  ;;  %v400_v54 = vpop.f32.mrb[3].mxu0  ;;  %v528_v55 = vpop.f32.mrb[3].mxu1 }
  0xe1   :  { %v759_v53 = vmul.f32 %v1521_v49, %v1757_v38  ;;  %v795_v56 = vadd.f32 %v1762_v40, %v724_v46  ;;  %v827_v57 = vadd.f32 %v1762_v40, %v756_v47  ;;  %654 = vst.msk [vmem:[%s2408_s4 + $0x8] sm:$0xff] %vm652_vm3, %v400_v54  ;;  %v725_v58 = vmul.f32 %v1757_v38, %v400_v54 }
  0xe2   :  { %686 = vst.msk [vmem:[%s2408_s4 + $0x108] sm:$0xff] %vm652_vm3, %v528_v55  ;;  %v757_v59 = vmul.f32 %v1757_v38, %v528_v55  ;;  %v861_v60 = vmax.f32 %v797_v50, 0.0  ;;  %v893_v61 = vmax.f32 %v829_v51, 0.0  ;;  %v798_v62 = vadd.f32 %v1762_v40, %v727_v52 }
  0xe3   :  { %v830_v63 = vadd.f32 %v1762_v40, %v759_v53  ;;  %v859_v0 = vmax.f32 %v795_v56, 0.0  ;;  %v891_v1 = vmax.f32 %v827_v57, 0.0  ;;  %v796_v2 = vadd.f32 %v1762_v40, %v725_v58 }
  0xe4   :  { %v828_v3 = vadd.f32 %v1762_v40, %v757_v59  ;;  %v1386_v4 = vpack.c.bf16 %v861_v60, %v861_v60  ;;  %v1418_v5 = vpack.c.bf16 %v893_v61, %v893_v61  ;;  %v862_v6 = vmax.f32 %v798_v62, 0.0 }
  0xe5   :  { %v894_v7 = vmax.f32 %v830_v63, 0.0  ;;  %v1384_v8 = vpack.c.bf16 %v859_v0, %v859_v0  ;;  %v1416_v9 = vpack.c.bf16 %v891_v1, %v891_v1  ;;  %v860_v10 = vmax.f32 %v796_v2, 0.0  ;;  %v1492_v12 = vpop.f32.mrb[4].mxu0  ;;  %v1524_v13 = vpop.f32.mrb[4].mxu1 }
  0xe6   :  { %v892_v11 = vmax.f32 %v828_v3, 0.0  ;;  %1182 = vst.msk [vmem:[%s2409_s5 + $0x8] sm:$0xf] %vm1179_vm4, %v1386_v4  ;;  %1214 = vst.msk [vmem:[%s2409_s5 + $0x88] sm:$0xf] %vm1179_vm4, %v1418_v5  ;;  %v1387_v14 = vpack.c.bf16 %v862_v6, %v862_v6  ;;  %v730_v16 = vmul.f32 %v1492_v12, %v1757_v38  ;;  %v762_v17 = vmul.f32 %v1524_v13, %v1757_v38  ;;  %v413_v18 = vpop.f32.mrb[5].mxu0 }
  0xe7   :  { %v1419_v15 = vpack.c.bf16 %v894_v7, %v894_v7  ;;  %659 = vst.msk [vmem:[%s2408_s4 + $0x30] sm:$0xff] %vm652_vm3, %v1492_v12  ;;  %691 = vst.msk [vmem:[%s2408_s4 + $0x130] sm:$0xff] %vm652_vm3, %v1524_v13  ;;  %v541_v19 = vpop.f32.mrb[5].mxu1  ;;  %v1385_v20 = vpack.c.bf16 %v860_v10, %v860_v10  ;;  %v728_v22 = vmul.f32 %v1757_v38, %v413_v18  ;;  %v1493_v24 = vpop.f32.mrb[6].mxu0 }
  0xe8   :  { %1180 = vst.msk [vmem:[%s2409_s5] sm:$0xf] %vm1179_vm4, %v1384_v8  ;;  %1212 = vst.msk [vmem:[%s2409_s5 + $0x80] sm:$0xf] %vm1179_vm4, %v1416_v9  ;;  %v1417_v21 = vpack.c.bf16 %v892_v11, %v892_v11  ;;  %v760_v23 = vmul.f32 %v1757_v38, %v541_v19  ;;  %v1525_v25 = vpop.f32.mrb[6].mxu1  ;;  %v801_v26 = vadd.f32 %v1762_v40, %v730_v16  ;;  %v416_v30 = vpop.f32.mrb[7].mxu0 }
  0xe9   :  { %657 = vst.msk [vmem:[%s2408_s4 + $0x20] sm:$0xff] %vm652_vm3, %v413_v18  ;;  %689 = vst.msk [vmem:[%s2408_s4 + $0x120] sm:$0xff] %vm652_vm3, %v541_v19  ;;  %v833_v27 = vadd.f32 %v1762_v40, %v762_v17  ;;  %v731_v28 = vmul.f32 %v1493_v24, %v1757_v38  ;;  %v763_v29 = vmul.f32 %v1525_v25, %v1757_v38  ;;  %v544_v31 = vpop.f32.mrb[7].mxu1 }
  0xea   :  { %1183 = vst.msk [vmem:[%s2409_s5 + $0xc] sm:$0xf] %vm1179_vm4, %v1387_v14  ;;  %1215 = vst.msk [vmem:[%s2409_s5 + $0x8c] sm:$0xf] %vm1179_vm4, %v1419_v15  ;;  %v799_v32 = vadd.f32 %v1762_v40, %v728_v22  ;;  %v831_v33 = vadd.f32 %v1762_v40, %v760_v23  ;;  %v729_v34 = vmul.f32 %v1757_v38, %v416_v30  ;;  %v865_v36 = vmax.f32 %v801_v26, 0.0 }
  0xeb   :  { %660 = vst.msk [vmem:[%s2408_s4 + $0x38] sm:$0xff] %vm652_vm3, %v1493_v24  ;;  %692 = vst.msk [vmem:[%s2408_s4 + $0x138] sm:$0xff] %vm652_vm3, %v1525_v25  ;;  %v761_v35 = vmul.f32 %v1757_v38, %v544_v31  ;;  %v897_v37 = vmax.f32 %v833_v27, 0.0  ;;  %v802_v39 = vadd.f32 %v1762_v40, %v731_v28  ;;  %v834_v41 = vadd.f32 %v1762_v40, %v763_v29 }
  0xec   :  { %1181 = vst.msk [vmem:[%s2409_s5 + $0x4] sm:$0xf] %vm1179_vm4, %v1385_v20  ;;  %1213 = vst.msk [vmem:[%s2409_s5 + $0x84] sm:$0xf] %vm1179_vm4, %v1417_v21  ;;  %v863_v42 = vmax.f32 %v799_v32, 0.0  ;;  %v895_v43 = vmax.f32 %v831_v33, 0.0  ;;  %v800_v44 = vadd.f32 %v1762_v40, %v729_v34  ;;  %v1390_v46 = vpack.c.bf16 %v865_v36, %v865_v36 }
  0xed   :  { %658 = vst.msk [vmem:[%s2408_s4 + $0x28] sm:$0xff] %vm652_vm3, %v416_v30  ;;  %690 = vst.msk [vmem:[%s2408_s4 + $0x128] sm:$0xff] %vm652_vm3, %v544_v31  ;;  %v832_v45 = vadd.f32 %v1762_v40, %v761_v35  ;;  %v1422_v47 = vpack.c.bf16 %v897_v37, %v897_v37  ;;  %v866_v48 = vmax.f32 %v802_v39, 0.0  ;;  %v898_v49 = vmax.f32 %v834_v41, 0.0  ;;  %v1496_v54 = vpop.f32.mrb[8].mxu0  ;;  %v1528_v55 = vpop.f32.mrb[8].mxu1 }
  0xee   :  { %v1388_v50 = vpack.c.bf16 %v863_v42, %v863_v42  ;;  %v1420_v51 = vpack.c.bf16 %v895_v43, %v895_v43  ;;  %v864_v52 = vmax.f32 %v800_v44, 0.0  ;;  %1186 = vst.msk [vmem:[%s2409_s5 + $0x18] sm:$0xf] %vm1179_vm4, %v1390_v46  ;;  %v734_v58 = vmul.f32 %v1496_v54, %v1757_v38  ;;  %v429_v60 = vpop.f32.mrb[9].mxu0  ;;  %v557_v61 = vpop.f32.mrb[9].mxu1 }
  0xef   :  { %v896_v53 = vmax.f32 %v832_v45, 0.0  ;;  %1218 = vst.msk [vmem:[%s2409_s5 + $0x98] sm:$0xf] %vm1179_vm4, %v1422_v47  ;;  %v1391_v56 = vpack.c.bf16 %v866_v48, %v866_v48  ;;  %v1423_v57 = vpack.c.bf16 %v898_v49, %v898_v49  ;;  %v766_v59 = vmul.f32 %v1528_v55, %v1757_v38  ;;  %v1497_v2 = vpop.f32.mrb[10].mxu0  ;;  %v1529_v3 = vpop.f32.mrb[10].mxu1 }
  0xf0   :  { %663 = vst.msk [vmem:[%s2408_s4 + $0x50] sm:$0xff] %vm652_vm3, %v1496_v54  ;;  %695 = vst.msk [vmem:[%s2408_s4 + $0x150] sm:$0xff] %vm652_vm3, %v1528_v55  ;;  %v1389_v62 = vpack.c.bf16 %v864_v52, %v864_v52  ;;  %v732_v0 = vmul.f32 %v1757_v38, %v429_v60  ;;  %v764_v1 = vmul.f32 %v1757_v38, %v557_v61  ;;  %v432_v8 = vpop.f32.mrb[11].mxu0  ;;  %v560_v9 = vpop.f32.mrb[11].mxu1 }
  0xf1   :  { %1184 = vst.msk [vmem:[%s2409_s5 + $0x10] sm:$0xf] %vm1179_vm4, %v1388_v50  ;;  %1216 = vst.msk [vmem:[%s2409_s5 + $0x90] sm:$0xf] %vm1179_vm4, %v1420_v51  ;;  %v1421_v63 = vpack.c.bf16 %v896_v53, %v896_v53  ;;  %v805_v4 = vadd.f32 %v1762_v40, %v734_v58  ;;  %v837_v5 = vadd.f32 %v1762_v40, %v766_v59 }
  0xf2   :  { %661 = vst.msk [vmem:[%s2408_s4 + $0x40] sm:$0xff] %vm652_vm3, %v429_v60  ;;  %693 = vst.msk [vmem:[%s2408_s4 + $0x140] sm:$0xff] %vm652_vm3, %v557_v61  ;;  %v735_v6 = vmul.f32 %v1497_v2, %v1757_v38  ;;  %v767_v7 = vmul.f32 %v1529_v3, %v1757_v38  ;;  %v803_v10 = vadd.f32 %v1762_v40, %v732_v0 }
  0xf3   :  { %1187 = vst.msk [vmem:[%s2409_s5 + $0x1c] sm:$0xf] %vm1179_vm4, %v1391_v56  ;;  %1219 = vst.msk [vmem:[%s2409_s5 + $0x9c] sm:$0xf] %vm1179_vm4, %v1423_v57  ;;  %v835_v11 = vadd.f32 %v1762_v40, %v764_v1  ;;  %v733_v12 = vmul.f32 %v1757_v38, %v432_v8  ;;  %v765_v13 = vmul.f32 %v1757_v38, %v560_v9  ;;  %v869_v14 = vmax.f32 %v805_v4, 0.0 }
  0xf4   :  { %664 = vst.msk [vmem:[%s2408_s4 + $0x58] sm:$0xff] %vm652_vm3, %v1497_v2  ;;  %696 = vst.msk [vmem:[%s2408_s4 + $0x158] sm:$0xff] %vm652_vm3, %v1529_v3  ;;  %v901_v15 = vmax.f32 %v837_v5, 0.0  ;;  %v806_v16 = vadd.f32 %v1762_v40, %v735_v6  ;;  %v838_v17 = vadd.f32 %v1762_v40, %v767_v7  ;;  %v867_v18 = vmax.f32 %v803_v10, 0.0 }
  0xf5   :  { %1185 = vst.msk [vmem:[%s2409_s5 + $0x14] sm:$0xf] %vm1179_vm4, %v1389_v62  ;;  %1217 = vst.msk [vmem:[%s2409_s5 + $0x94] sm:$0xf] %vm1179_vm4, %v1421_v63  ;;  %v899_v19 = vmax.f32 %v835_v11, 0.0  ;;  %v804_v20 = vadd.f32 %v1762_v40, %v733_v12  ;;  %v836_v21 = vadd.f32 %v1762_v40, %v765_v13  ;;  %v1394_v22 = vpack.c.bf16 %v869_v14, %v869_v14  ;;  %v1500_v30 = vpop.f32.mrb[12].mxu0 }
  0xf6   :  { %662 = vst.msk [vmem:[%s2408_s4 + $0x48] sm:$0xff] %vm652_vm3, %v432_v8  ;;  %694 = vst.msk [vmem:[%s2408_s4 + $0x148] sm:$0xff] %vm652_vm3, %v560_v9  ;;  %v1426_v23 = vpack.c.bf16 %v901_v15, %v901_v15  ;;  %v870_v24 = vmax.f32 %v806_v16, 0.0  ;;  %v902_v25 = vmax.f32 %v838_v17, 0.0  ;;  %v1392_v26 = vpack.c.bf16 %v867_v18, %v867_v18  ;;  %v1532_v31 = vpop.f32.mrb[12].mxu1  ;;  %v445_v36 = vpop.f32.mrb[13].mxu0 }
  0xf7   :  { %v1424_v27 = vpack.c.bf16 %v899_v19, %v899_v19  ;;  %v868_v28 = vmax.f32 %v804_v20, 0.0  ;;  %v900_v29 = vmax.f32 %v836_v21, 0.0  ;;  %1190 = vst.msk [vmem:[%s2409_s5 + $0x28] sm:$0xf] %vm1179_vm4, %v1394_v22  ;;  %v738_v34 = vmul.f32 %v1500_v30, %v1757_v38  ;;  %v573_v37 = vpop.f32.mrb[13].mxu1  ;;  %v1501_v44 = vpop.f32.mrb[14].mxu0 }
  0xf8   :  { %1222 = vst.msk [vmem:[%s2409_s5 + $0xa8] sm:$0xf] %vm1179_vm4, %v1426_v23  ;;  %v1395_v32 = vpack.c.bf16 %v870_v24, %v870_v24  ;;  %v1427_v33 = vpack.c.bf16 %v902_v25, %v902_v25  ;;  %v770_v35 = vmul.f32 %v1532_v31, %v1757_v38  ;;  %1188 = vst.msk [vmem:[%s2409_s5 + $0x20] sm:$0xf] %vm1179_vm4, %v1392_v26  ;;  %v1533_v45 = vpop.f32.mrb[14].mxu1  ;;  %v448_v50 = vpop.f32.mrb[15].mxu0 }
  0xf9   :  { %667 = vst.msk [vmem:[%s2408_s4 + $0x70] sm:$0xff] %vm652_vm3, %v1500_v30  ;;  %699 = vst.msk [vmem:[%s2408_s4 + $0x170] sm:$0xff] %vm652_vm3, %v1532_v31  ;;  %v1393_v39 = vpack.c.bf16 %v868_v28, %v868_v28  ;;  %v1425_v41 = vpack.c.bf16 %v900_v29, %v900_v29  ;;  %v736_v42 = vmul.f32 %v1757_v38, %v445_v36  ;;  %v576_v51 = vpop.f32.mrb[15].mxu1 }
  0xfa   :  { %1220 = vst.msk [vmem:[%s2409_s5 + $0xa0] sm:$0xf] %vm1179_vm4, %v1424_v27  ;;  %v768_v43 = vmul.f32 %v1757_v38, %v573_v37  ;;  %1191 = vst.msk [vmem:[%s2409_s5 + $0x2c] sm:$0xf] %vm1179_vm4, %v1395_v32  ;;  %v809_v46 = vadd.f32 %v1762_v40, %v738_v34  ;;  %v841_v47 = vadd.f32 %v1762_v40, %v770_v35 }
  0xfb   :  { %665 = vst.msk [vmem:[%s2408_s4 + $0x60] sm:$0xff] %vm652_vm3, %v445_v36  ;;  %697 = vst.msk [vmem:[%s2408_s4 + $0x160] sm:$0xff] %vm652_vm3, %v573_v37  ;;  %v739_v48 = vmul.f32 %v1501_v44, %v1757_v38  ;;  %v771_v49 = vmul.f32 %v1533_v45, %v1757_v38  ;;  %v807_v52 = vadd.f32 %v1762_v40, %v736_v42 }
  0xfc   :  { %1223 = vst.msk [vmem:[%s2409_s5 + $0xac] sm:$0xf] %vm1179_vm4, %v1427_v33  ;;  %1189 = vst.msk [vmem:[%s2409_s5 + $0x24] sm:$0xf] %vm1179_vm4, %v1393_v39  ;;  %v839_v53 = vadd.f32 %v1762_v40, %v768_v43  ;;  %v737_v54 = vmul.f32 %v1757_v38, %v448_v50  ;;  %v769_v55 = vmul.f32 %v1757_v38, %v576_v51  ;;  %v873_v56 = vmax.f32 %v809_v46, 0.0 }
  0xfd   :  { %668 = vst.msk [vmem:[%s2408_s4 + $0x78] sm:$0xff] %vm652_vm3, %v1501_v44  ;;  %700 = vst.msk [vmem:[%s2408_s4 + $0x178] sm:$0xff] %vm652_vm3, %v1533_v45  ;;  %v905_v57 = vmax.f32 %v841_v47, 0.0  ;;  %v810_v58 = vadd.f32 %v1762_v40, %v739_v48  ;;  %v842_v59 = vadd.f32 %v1762_v40, %v771_v49  ;;  %v871_v60 = vmax.f32 %v807_v52, 0.0  ;;  %v1504_v8 = vpop.f32.mrb[16].mxu0  ;;  %v1536_v9 = vpop.f32.mrb[16].mxu1 }
  0xfe   :  { %1221 = vst.msk [vmem:[%s2409_s5 + $0xa4] sm:$0xf] %vm1179_vm4, %v1425_v41  ;;  %v903_v61 = vmax.f32 %v839_v53, 0.0  ;;  %v808_v62 = vadd.f32 %v1762_v40, %v737_v54  ;;  %v840_v63 = vadd.f32 %v1762_v40, %v769_v55  ;;  %v1398_v0 = vpack.c.bf16 %v873_v56, %v873_v56  ;;  %v461_v14 = vpop.f32.mrb[17].mxu0  ;;  %v589_v15 = vpop.f32.mrb[17].mxu1 }
  0xff   :  { %666 = vst.msk [vmem:[%s2408_s4 + $0x68] sm:$0xff] %vm652_vm3, %v448_v50  ;;  %698 = vst.msk [vmem:[%s2408_s4 + $0x168] sm:$0xff] %vm652_vm3, %v576_v51  ;;  %v1430_v1 = vpack.c.bf16 %v905_v57, %v905_v57  ;;  %v874_v2 = vmax.f32 %v810_v58, 0.0  ;;  %v906_v3 = vmax.f32 %v842_v59, 0.0  ;;  %v1396_v4 = vpack.c.bf16 %v871_v60, %v871_v60  ;;  %v1505_v20 = vpop.f32.mrb[18].mxu0  ;;  %v1537_v21 = vpop.f32.mrb[18].mxu1 }
 0x100   :  { %v1428_v5 = vpack.c.bf16 %v903_v61, %v903_v61  ;;  %v872_v6 = vmax.f32 %v808_v62, 0.0  ;;  %v904_v7 = vmax.f32 %v840_v63, 0.0  ;;  %1194 = vst.msk [vmem:[%s2409_s5 + $0x38] sm:$0xf] %vm1179_vm4, %v1398_v0  ;;  %v742_v12 = vmul.f32 %v1504_v8, %v1757_v38  ;;  %v464_v26 = vpop.f32.mrb[19].mxu0  ;;  %v592_v27 = vpop.f32.mrb[19].mxu1 }
 0x101   :  { %1226 = vst.msk [vmem:[%s2409_s5 + $0xb8] sm:$0xf] %vm1179_vm4, %v1430_v1  ;;  %v1399_v10 = vpack.c.bf16 %v874_v2, %v874_v2  ;;  %v1431_v11 = vpack.c.bf16 %v906_v3, %v906_v3  ;;  %v774_v13 = vmul.f32 %v1536_v9, %v1757_v38  ;;  %1192 = vst.msk [vmem:[%s2409_s5 + $0x30] sm:$0xf] %vm1179_vm4, %v1396_v4 }
 0x102   :  { %671 = vst.msk [vmem:[%s2408_s4 + $0x90] sm:$0xff] %vm652_vm3, %v1504_v8  ;;  %703 = vst.msk [vmem:[%s2408_s4 + $0x190] sm:$0xff] %vm652_vm3, %v1536_v9  ;;  %v1397_v16 = vpack.c.bf16 %v872_v6, %v872_v6  ;;  %v1429_v17 = vpack.c.bf16 %v904_v7, %v904_v7  ;;  %v740_v18 = vmul.f32 %v1757_v38, %v461_v14 }
 0x103   :  { %1224 = vst.msk [vmem:[%s2409_s5 + $0xb0] sm:$0xf] %vm1179_vm4, %v1428_v5  ;;  %v772_v19 = vmul.f32 %v1757_v38, %v589_v15  ;;  %1195 = vst.msk [vmem:[%s2409_s5 + $0x3c] sm:$0xf] %vm1179_vm4, %v1399_v10  ;;  %v813_v22 = vadd.f32 %v1762_v40, %v742_v12  ;;  %v845_v23 = vadd.f32 %v1762_v40, %v774_v13 }
 0x104   :  { %669 = vst.msk [vmem:[%s2408_s4 + $0x80] sm:$0xff] %vm652_vm3, %v461_v14  ;;  %701 = vst.msk [vmem:[%s2408_s4 + $0x180] sm:$0xff] %vm652_vm3, %v589_v15  ;;  %v743_v24 = vmul.f32 %v1505_v20, %v1757_v38  ;;  %v775_v25 = vmul.f32 %v1537_v21, %v1757_v38  ;;  %v811_v28 = vadd.f32 %v1762_v40, %v740_v18 }
 0x105   :  { %1227 = vst.msk [vmem:[%s2409_s5 + $0xbc] sm:$0xf] %vm1179_vm4, %v1431_v11  ;;  %1193 = vst.msk [vmem:[%s2409_s5 + $0x34] sm:$0xf] %vm1179_vm4, %v1397_v16  ;;  %v843_v29 = vadd.f32 %v1762_v40, %v772_v19  ;;  %v741_v30 = vmul.f32 %v1757_v38, %v464_v26  ;;  %v773_v31 = vmul.f32 %v1757_v38, %v592_v27  ;;  %v877_v32 = vmax.f32 %v813_v22, 0.0  ;;  %v1508_v50 = vpop.f32.mrb[20].mxu0 }
 0x106   :  { %672 = vst.msk [vmem:[%s2408_s4 + $0x98] sm:$0xff] %vm652_vm3, %v1505_v20  ;;  %704 = vst.msk [vmem:[%s2408_s4 + $0x198] sm:$0xff] %vm652_vm3, %v1537_v21  ;;  %v909_v33 = vmax.f32 %v845_v23, 0.0  ;;  %v814_v34 = vadd.f32 %v1762_v40, %v743_v24  ;;  %v846_v35 = vadd.f32 %v1762_v40, %v775_v25  ;;  %v875_v36 = vmax.f32 %v811_v28, 0.0  ;;  %v1540_v51 = vpop.f32.mrb[20].mxu1  ;;  %v477_v56 = vpop.f32.mrb[21].mxu0 }
 0x107   :  { %1225 = vst.msk [vmem:[%s2409_s5 + $0xb4] sm:$0xf] %vm1179_vm4, %v1429_v17  ;;  %v907_v37 = vmax.f32 %v843_v29, 0.0  ;;  %v812_v39 = vadd.f32 %v1762_v40, %v741_v30  ;;  %v844_v41 = vadd.f32 %v1762_v40, %v773_v31  ;;  %v1402_v42 = vpack.c.bf16 %v877_v32, %v877_v32  ;;  %v605_v57 = vpop.f32.mrb[21].mxu1  ;;  %v1509_v62 = vpop.f32.mrb[22].mxu0 }
 0x108   :  { %670 = vst.msk [vmem:[%s2408_s4 + $0x88] sm:$0xff] %vm652_vm3, %v464_v26  ;;  %702 = vst.msk [vmem:[%s2408_s4 + $0x188] sm:$0xff] %vm652_vm3, %v592_v27  ;;  %v1434_v43 = vpack.c.bf16 %v909_v33, %v909_v33  ;;  %v878_v44 = vmax.f32 %v814_v34, 0.0  ;;  %v910_v45 = vmax.f32 %v846_v35, 0.0  ;;  %v1400_v46 = vpack.c.bf16 %v875_v36, %v875_v36  ;;  %v1541_v63 = vpop.f32.mrb[22].mxu1  ;;  %v480_v4 = vpop.f32.mrb[23].mxu0 }
 0x109   :  { %v1432_v47 = vpack.c.bf16 %v907_v37, %v907_v37  ;;  %v876_v48 = vmax.f32 %v812_v39, 0.0  ;;  %v908_v49 = vmax.f32 %v844_v41, 0.0  ;;  %1198 = vst.msk [vmem:[%s2409_s5 + $0x48] sm:$0xf] %vm1179_vm4, %v1402_v42  ;;  %v746_v54 = vmul.f32 %v1508_v50, %v1757_v38  ;;  %v608_v5 = vpop.f32.mrb[23].mxu1 }
 0x10a   :  { %1230 = vst.msk [vmem:[%s2409_s5 + $0xc8] sm:$0xf] %vm1179_vm4, %v1434_v43  ;;  %v1403_v52 = vpack.c.bf16 %v878_v44, %v878_v44  ;;  %v1435_v53 = vpack.c.bf16 %v910_v45, %v910_v45  ;;  %v778_v55 = vmul.f32 %v1540_v51, %v1757_v38  ;;  %1196 = vst.msk [vmem:[%s2409_s5 + $0x40] sm:$0xf] %vm1179_vm4, %v1400_v46 }
 0x10b   :  { %675 = vst.msk [vmem:[%s2408_s4 + $0xb0] sm:$0xff] %vm652_vm3, %v1508_v50  ;;  %707 = vst.msk [vmem:[%s2408_s4 + $0x1b0] sm:$0xff] %vm652_vm3, %v1540_v51  ;;  %v1401_v58 = vpack.c.bf16 %v876_v48, %v876_v48  ;;  %v1433_v59 = vpack.c.bf16 %v908_v49, %v908_v49  ;;  %v744_v60 = vmul.f32 %v1757_v38, %v477_v56 }
 0x10c   :  { %1228 = vst.msk [vmem:[%s2409_s5 + $0xc0] sm:$0xf] %vm1179_vm4, %v1432_v47  ;;  %v776_v61 = vmul.f32 %v1757_v38, %v605_v57  ;;  %1199 = vst.msk [vmem:[%s2409_s5 + $0x4c] sm:$0xf] %vm1179_vm4, %v1403_v52  ;;  %v817_v0 = vadd.f32 %v1762_v40, %v746_v54  ;;  %v849_v1 = vadd.f32 %v1762_v40, %v778_v55 }
 0x10d   :  { %673 = vst.msk [vmem:[%s2408_s4 + $0xa0] sm:$0xff] %vm652_vm3, %v477_v56  ;;  %705 = vst.msk [vmem:[%s2408_s4 + $0x1a0] sm:$0xff] %vm652_vm3, %v605_v57  ;;  %v747_v2 = vmul.f32 %v1509_v62, %v1757_v38  ;;  %v779_v3 = vmul.f32 %v1541_v63, %v1757_v38  ;;  %v815_v6 = vadd.f32 %v1762_v40, %v744_v60  ;;  %v1512_v26 = vpop.f32.mrb[24].mxu0  ;;  %v1544_v27 = vpop.f32.mrb[24].mxu1 }
 0x10e   :  { %1231 = vst.msk [vmem:[%s2409_s5 + $0xcc] sm:$0xf] %vm1179_vm4, %v1435_v53  ;;  %1197 = vst.msk [vmem:[%s2409_s5 + $0x44] sm:$0xf] %vm1179_vm4, %v1401_v58  ;;  %v847_v7 = vadd.f32 %v1762_v40, %v776_v61  ;;  %v745_v8 = vmul.f32 %v1757_v38, %v480_v4  ;;  %v777_v9 = vmul.f32 %v1757_v38, %v608_v5  ;;  %v881_v10 = vmax.f32 %v817_v0, 0.0  ;;  %v493_v32 = vpop.f32.mrb[25].mxu0 }
 0x10f   :  { %676 = vst.msk [vmem:[%s2408_s4 + $0xb8] sm:$0xff] %vm652_vm3, %v1509_v62  ;;  %708 = vst.msk [vmem:[%s2408_s4 + $0x1b8] sm:$0xff] %vm652_vm3, %v1541_v63  ;;  %v913_v11 = vmax.f32 %v849_v1, 0.0  ;;  %v818_v12 = vadd.f32 %v1762_v40, %v747_v2  ;;  %v850_v13 = vadd.f32 %v1762_v40, %v779_v3  ;;  %v879_v14 = vmax.f32 %v815_v6, 0.0  ;;  %v621_v33 = vpop.f32.mrb[25].mxu1  ;;  %v1513_v39 = vpop.f32.mrb[26].mxu0 }
 0x110   :  { %1229 = vst.msk [vmem:[%s2409_s5 + $0xc4] sm:$0xf] %vm1179_vm4, %v1433_v59  ;;  %v911_v15 = vmax.f32 %v847_v7, 0.0  ;;  %v816_v16 = vadd.f32 %v1762_v40, %v745_v8  ;;  %v848_v17 = vadd.f32 %v1762_v40, %v777_v9  ;;  %v1406_v18 = vpack.c.bf16 %v881_v10, %v881_v10  ;;  %v1545_v41 = vpop.f32.mrb[26].mxu1  ;;  %v496_v46 = vpop.f32.mrb[27].mxu0 }
 0x111   :  { %674 = vst.msk [vmem:[%s2408_s4 + $0xa8] sm:$0xff] %vm652_vm3, %v480_v4  ;;  %706 = vst.msk [vmem:[%s2408_s4 + $0x1a8] sm:$0xff] %vm652_vm3, %v608_v5  ;;  %v1438_v19 = vpack.c.bf16 %v913_v11, %v913_v11  ;;  %v882_v20 = vmax.f32 %v818_v12, 0.0  ;;  %v914_v21 = vmax.f32 %v850_v13, 0.0  ;;  %v1404_v22 = vpack.c.bf16 %v879_v14, %v879_v14  ;;  %v624_v47 = vpop.f32.mrb[27].mxu1 }
 0x112   :  { %v1436_v23 = vpack.c.bf16 %v911_v15, %v911_v15  ;;  %v880_v24 = vmax.f32 %v816_v16, 0.0  ;;  %v912_v25 = vmax.f32 %v848_v17, 0.0  ;;  %1202 = vst.msk [vmem:[%s2409_s5 + $0x58] sm:$0xf] %vm1179_vm4, %v1406_v18  ;;  %v750_v30 = vmul.f32 %v1512_v26, %v1757_v38 }
 0x113   :  { %1234 = vst.msk [vmem:[%s2409_s5 + $0xd8] sm:$0xf] %vm1179_vm4, %v1438_v19  ;;  %v1407_v28 = vpack.c.bf16 %v882_v20, %v882_v20  ;;  %v1439_v29 = vpack.c.bf16 %v914_v21, %v914_v21  ;;  %v782_v31 = vmul.f32 %v1544_v27, %v1757_v38  ;;  %1200 = vst.msk [vmem:[%s2409_s5 + $0x50] sm:$0xf] %vm1179_vm4, %v1404_v22 }
 0x114   :  { %679 = vst.msk [vmem:[%s2408_s4 + $0xd0] sm:$0xff] %vm652_vm3, %v1512_v26  ;;  %711 = vst.msk [vmem:[%s2408_s4 + $0x1d0] sm:$0xff] %vm652_vm3, %v1544_v27  ;;  %v1405_v34 = vpack.c.bf16 %v880_v24, %v880_v24  ;;  %v1437_v35 = vpack.c.bf16 %v912_v25, %v912_v25  ;;  %v748_v36 = vmul.f32 %v1757_v38, %v493_v32 }
 0x115   :  { %1232 = vst.msk [vmem:[%s2409_s5 + $0xd0] sm:$0xf] %vm1179_vm4, %v1436_v23  ;;  %v780_v37 = vmul.f32 %v1757_v38, %v621_v33  ;;  %1203 = vst.msk [vmem:[%s2409_s5 + $0x5c] sm:$0xf] %vm1179_vm4, %v1407_v28  ;;  %v821_v42 = vadd.f32 %v1762_v40, %v750_v30  ;;  %v853_v43 = vadd.f32 %v1762_v40, %v782_v31  ;;  %v1516_v4 = vpop.f32.mrb[28].mxu0  ;;  %v1548_v5 = vpop.f32.mrb[28].mxu1 }
 0x116   :  { %677 = vst.msk [vmem:[%s2408_s4 + $0xc0] sm:$0xff] %vm652_vm3, %v493_v32  ;;  %709 = vst.msk [vmem:[%s2408_s4 + $0x1c0] sm:$0xff] %vm652_vm3, %v621_v33  ;;  %v751_v44 = vmul.f32 %v1513_v39, %v1757_v38  ;;  %v783_v45 = vmul.f32 %v1545_v41, %v1757_v38  ;;  %v819_v48 = vadd.f32 %v1762_v40, %v748_v36  ;;  %v509_v10 = vpop.f32.mrb[29].mxu0  ;;  %v637_v11 = vpop.f32.mrb[29].mxu1 }
 0x117   :  { %1235 = vst.msk [vmem:[%s2409_s5 + $0xdc] sm:$0xf] %vm1179_vm4, %v1439_v29  ;;  %1201 = vst.msk [vmem:[%s2409_s5 + $0x54] sm:$0xf] %vm1179_vm4, %v1405_v34  ;;  %v851_v49 = vadd.f32 %v1762_v40, %v780_v37  ;;  %v749_v50 = vmul.f32 %v1757_v38, %v496_v46  ;;  %v781_v51 = vmul.f32 %v1757_v38, %v624_v47  ;;  %v885_v52 = vmax.f32 %v821_v42, 0.0  ;;  %v1517_v16 = vpop.f32.mrb[30].mxu0 }
 0x118   :  { %680 = vst.msk [vmem:[%s2408_s4 + $0xd8] sm:$0xff] %vm652_vm3, %v1513_v39  ;;  %712 = vst.msk [vmem:[%s2408_s4 + $0x1d8] sm:$0xff] %vm652_vm3, %v1545_v41  ;;  %v917_v53 = vmax.f32 %v853_v43, 0.0  ;;  %v822_v54 = vadd.f32 %v1762_v40, %v751_v44  ;;  %v854_v55 = vadd.f32 %v1762_v40, %v783_v45  ;;  %v883_v56 = vmax.f32 %v819_v48, 0.0  ;;  %v1549_v17 = vpop.f32.mrb[30].mxu1  ;;  %v512_v22 = vpop.f32.mrb[31].mxu0 }
 0x119   :  { %1233 = vst.msk [vmem:[%s2409_s5 + $0xd4] sm:$0xf] %vm1179_vm4, %v1437_v35  ;;  %v915_v57 = vmax.f32 %v851_v49, 0.0  ;;  %v820_v58 = vadd.f32 %v1762_v40, %v749_v50  ;;  %v852_v59 = vadd.f32 %v1762_v40, %v781_v51  ;;  %v1410_v60 = vpack.c.bf16 %v885_v52, %v885_v52  ;;  %v640_v23 = vpop.f32.mrb[31].mxu1 }
 0x11a   :  { %678 = vst.msk [vmem:[%s2408_s4 + $0xc8] sm:$0xff] %vm652_vm3, %v496_v46  ;;  %710 = vst.msk [vmem:[%s2408_s4 + $0x1c8] sm:$0xff] %vm652_vm3, %v624_v47  ;;  %v1442_v61 = vpack.c.bf16 %v917_v53, %v917_v53  ;;  %v886_v62 = vmax.f32 %v822_v54, 0.0  ;;  %v918_v63 = vmax.f32 %v854_v55, 0.0  ;;  %v1408_v0 = vpack.c.bf16 %v883_v56, %v883_v56 }
 0x11b   :  { %v1440_v1 = vpack.c.bf16 %v915_v57, %v915_v57  ;;  %v884_v2 = vmax.f32 %v820_v58, 0.0  ;;  %v916_v3 = vmax.f32 %v852_v59, 0.0  ;;  %1206 = vst.msk [vmem:[%s2409_s5 + $0x68] sm:$0xf] %vm1179_vm4, %v1410_v60  ;;  %v754_v8 = vmul.f32 %v1516_v4, %v1757_v38 }
 0x11c   :  { %1238 = vst.msk [vmem:[%s2409_s5 + $0xe8] sm:$0xf] %vm1179_vm4, %v1442_v61  ;;  %v1411_v6 = vpack.c.bf16 %v886_v62, %v886_v62  ;;  %v1443_v7 = vpack.c.bf16 %v918_v63, %v918_v63  ;;  %v786_v9 = vmul.f32 %v1548_v5, %v1757_v38  ;;  %1204 = vst.msk [vmem:[%s2409_s5 + $0x60] sm:$0xf] %vm1179_vm4, %v1408_v0 }
 0x11d   :  { %683 = vst.msk [vmem:[%s2408_s4 + $0xf0] sm:$0xff] %vm652_vm3, %v1516_v4  ;;  %715 = vst.msk [vmem:[%s2408_s4 + $0x1f0] sm:$0xff] %vm652_vm3, %v1548_v5  ;;  %v1409_v12 = vpack.c.bf16 %v884_v2, %v884_v2  ;;  %v1441_v13 = vpack.c.bf16 %v916_v3, %v916_v3  ;;  %v752_v14 = vmul.f32 %v1757_v38, %v509_v10 }
 0x11e   :  { %1236 = vst.msk [vmem:[%s2409_s5 + $0xe0] sm:$0xf] %vm1179_vm4, %v1440_v1  ;;  %v784_v15 = vmul.f32 %v1757_v38, %v637_v11  ;;  %1207 = vst.msk [vmem:[%s2409_s5 + $0x6c] sm:$0xf] %vm1179_vm4, %v1411_v6  ;;  %v825_v18 = vadd.f32 %v1762_v40, %v754_v8  ;;  %v857_v19 = vadd.f32 %v1762_v40, %v786_v9 }
 0x11f   :  { %681 = vst.msk [vmem:[%s2408_s4 + $0xe0] sm:$0xff] %vm652_vm3, %v509_v10  ;;  %713 = vst.msk [vmem:[%s2408_s4 + $0x1e0] sm:$0xff] %vm652_vm3, %v637_v11  ;;  %v755_v20 = vmul.f32 %v1517_v16, %v1757_v38  ;;  %v787_v21 = vmul.f32 %v1549_v17, %v1757_v38  ;;  %v823_v24 = vadd.f32 %v1762_v40, %v752_v14 }
 0x120   :  { %1239 = vst.msk [vmem:[%s2409_s5 + $0xec] sm:$0xf] %vm1179_vm4, %v1443_v7  ;;  %1205 = vst.msk [vmem:[%s2409_s5 + $0x64] sm:$0xf] %vm1179_vm4, %v1409_v12  ;;  %v855_v25 = vadd.f32 %v1762_v40, %v784_v15  ;;  %v753_v26 = vmul.f32 %v1757_v38, %v512_v22  ;;  %v785_v27 = vmul.f32 %v1757_v38, %v640_v23  ;;  %v889_v28 = vmax.f32 %v825_v18, 0.0 }
 0x121   :  { %684 = vst.msk [vmem:[%s2408_s4 + $0xf8] sm:$0xff] %vm652_vm3, %v1517_v16  ;;  %716 = vst.msk [vmem:[%s2408_s4 + $0x1f8] sm:$0xff] %vm652_vm3, %v1549_v17  ;;  %v921_v29 = vmax.f32 %v857_v19, 0.0  ;;  %v826_v30 = vadd.f32 %v1762_v40, %v755_v20  ;;  %v858_v31 = vadd.f32 %v1762_v40, %v787_v21  ;;  %v887_v32 = vmax.f32 %v823_v24, 0.0 }
 0x122   :  { %1237 = vst.msk [vmem:[%s2409_s5 + $0xe4] sm:$0xf] %vm1179_vm4, %v1441_v13  ;;  %v919_v33 = vmax.f32 %v855_v25, 0.0  ;;  %v824_v34 = vadd.f32 %v1762_v40, %v753_v26  ;;  %v856_v35 = vadd.f32 %v1762_v40, %v785_v27  ;;  %v1414_v36 = vpack.c.bf16 %v889_v28, %v889_v28 }
 0x123   :  { %682 = vst.msk [vmem:[%s2408_s4 + $0xe8] sm:$0xff] %vm652_vm3, %v512_v22  ;;  %714 = vst.msk [vmem:[%s2408_s4 + $0x1e8] sm:$0xff] %vm652_vm3, %v640_v23  ;;  %v1446_v37 = vpack.c.bf16 %v921_v29, %v921_v29  ;;  %v890_v39 = vmax.f32 %v826_v30, 0.0  ;;  %v922_v41 = vmax.f32 %v858_v31, 0.0  ;;  %v1412_v42 = vpack.c.bf16 %v887_v32, %v887_v32 }
 0x124   :  { %v1444_v43 = vpack.c.bf16 %v919_v33, %v919_v33  ;;  %v888_v44 = vmax.f32 %v824_v34, 0.0  ;;  %v920_v38 = vmax.f32 %v856_v35, 0.0  ;;  %1210 = vst.msk [vmem:[%s2409_s5 + $0x78] sm:$0xf] %vm1179_vm4, %v1414_v36 }
 0x125   :  { %1242 = vst.msk [vmem:[%s2409_s5 + $0xf8] sm:$0xf] %vm1179_vm4, %v1446_v37  ;;  %v1415_v45 = vpack.c.bf16 %v890_v39, %v890_v39  ;;  %v1447_v40 = vpack.c.bf16 %v922_v41, %v922_v41  ;;  %1208 = vst.msk [vmem:[%s2409_s5 + $0x70] sm:$0xf] %vm1179_vm4, %v1412_v42 }
 0x126   :  { %1240 = vst.msk [vmem:[%s2409_s5 + $0xf0] sm:$0xf] %vm1179_vm4, %v1444_v43  ;;  %v1413_v46 = vpack.c.bf16 %v888_v44, %v888_v44  ;;  %v1445_v47 = vpack.c.bf16 %v920_v38, %v920_v38 }
 0x127   :  { %1211 = vst.msk [vmem:[%s2409_s5 + $0x7c] sm:$0xf] %vm1179_vm4, %v1415_v45  ;;  %1243 = vst.msk [vmem:[%s2409_s5 + $0xfc] sm:$0xf] %vm1179_vm4, %v1447_v40 }
 0x128   :  { %1209 = vst.msk [vmem:[%s2409_s5 + $0x74] sm:$0xf] %vm1179_vm4, %v1413_v46  ;;  %1241 = vst.msk [vmem:[%s2409_s5 + $0xf4] sm:$0xf] %vm1179_vm4, %v1445_v47 }

// kernel: networks_forward.11
= control target key start
LH: loop header
LB: loop body
LE: loop exit
PB: predicated region body
PF: predicated region fallthrough
CT: control target
= control target key end

     0   :  { %v1718_v0 = vmov 0   ;;  %vm442_vm0 = vcmask 130048   ;;  %vm1290_vm1 = vcmask 125952   ;;  %s2389_s1 = inlined_call_operand.vmem [shape: bf16[144,16], index: 1, kind: input, shape index: {}]   ;;  %s2390_s0 = inlined_call_operand.vmem [shape: bf16[512,144], index: 0, kind: input, shape index: {}]   ;;  %s2391_s2 = inlined_call_operand.vmem [shape: f32[1,16], index: 2, kind: input, shape index: {}]   ;;  %s2392_s3 = inlined_call_operand.vmem [shape: f32[1,16], index: 3, kind: input, shape index: {}]   ;;  %s2393_s4 = inlined_call_operand.vmem [shape: bf16[512,16], index: 4, kind: output, shape index: {}]  }
   0x1   :  { %539 = vmatprep.subr.bf16.mxu0 %v1718_v0  ;;  %1594 = vmatprep.subr.bf16.mxu1 %v1718_v0  ;;  %v1613_v1 = vld [vmem:[%s2389_s1] sm:$0xff]   ;;  %v1614_v2 = vld [vmem:[%s2389_s1 + $0x8] sm:$0xff]   ;;  %v1615_v3 = vld [vmem:[%s2389_s1 + $0x10] sm:$0xff]  }
   0x2   :  { %540 = vmatpush1.bf16.msra.mxu0 %v1613_v1  ;;  %1603 = vmatpush1.bf16.msra.mxu1 %v1613_v1  ;;  %v1616_v4 = vld [vmem:[%s2389_s1 + $0x18] sm:$0xff]   ;;  %v1624_v5 = vld [vmem:[%s2390_s0 + $0x4] ss:$8 sps:$4 sm:$0xff]   ;;  %v1619_v9 = vld [vmem:[%s2389_s1 + $0x30] sm:$0xff]  }
   0x3   :  { %541 = vmatprep.subr.bf16.mxu0 %v1718_v0  ;;  %1595 = vmatprep.subr.bf16.mxu1 %v1718_v0  ;;  %v1627_v6 = vld [vmem:[%s2390_s0 + $0x104] ss:$8 sps:$4 sm:$0xff]   ;;  %v1620_v10 = vld [vmem:[%s2389_s1 + $0x38] sm:$0xff]   ;;  %v1622_v12 = vld [vmem:[%s2390_s0] ss:$8 sps:$4 sm:$0xff]  }
   0x4   :  { %1432 = vmatprep.mubr.msk.bf16.mxu0 %vm442_vm0, %v1624_v5  ;;  %1448 = vmatprep.mubr.msk.bf16.mxu1 %vm442_vm0, %v1627_v6  ;;  %v1617_v7 = vld [vmem:[%s2389_s1 + $0x20] sm:$0xff]   ;;  %v1618_v8 = vld [vmem:[%s2389_s1 + $0x28] sm:$0xff]   ;;  %v1628_v14 = vld [vmem:[%s2390_s0 + $0x14] ss:$8 sps:$4 sm:$0xff]  }
   0x5   :  { %v1621_v11 = vld [vmem:[%s2389_s1 + $0x40] sm:$0xff]   ;;  %v1630_v15 = vld [vmem:[%s2390_s0 + $0x114] ss:$8 sps:$4 sm:$0xff]   ;;  %v1632_v16 = vld [vmem:[%s2390_s0 + $0x10] ss:$8 sps:$4 sm:$0xff]  }
   0x6   :  { %542 = vmatpush1.bf16.msra.mxu0 %v1614_v2  ;;  %1604 = vmatpush1.bf16.msra.mxu1 %v1614_v2  ;;  %v1625_v13 = vld [vmem:[%s2390_s0 + $0x100] ss:$8 sps:$4 sm:$0xff]   ;;  %v1633_v17 = vld [vmem:[%s2390_s0 + $0x110] ss:$8 sps:$4 sm:$0xff]   ;;  %v1634_v18 = vld [vmem:[%s2390_s0 + $0x24] ss:$8 sps:$4 sm:$0xff]  }
   0x7   :  { %543 = vmatprep.subr.bf16.mxu0 %v1718_v0  ;;  %1596 = vmatprep.subr.bf16.mxu1 %v1718_v0  ;;  %v1636_v19 = vld [vmem:[%s2390_s0 + $0x124] ss:$8 sps:$4 sm:$0xff]   ;;  %v1638_v20 = vld [vmem:[%s2390_s0 + $0x20] ss:$8 sps:$4 sm:$0xff]   ;;  %v1640_v22 = vld [vmem:[%s2390_s0 + $0x34] ss:$8 sps:$4 sm:$0xff]  }
   0x8   :  { %v1639_v21 = vld [vmem:[%s2390_s0 + $0x120] ss:$8 sps:$4 sm:$0xff]   ;;  %v1642_v23 = vld [vmem:[%s2390_s0 + $0x134] ss:$8 sps:$4 sm:$0xff]   ;;  %v1644_v24 = vld [vmem:[%s2390_s0 + $0x30] ss:$8 sps:$4 sm:$0xff]  }
   0x9   :  { %v1645_v25 = vld [vmem:[%s2390_s0 + $0x130] ss:$8 sps:$4 sm:$0xff]   ;;  %v1646_v26 = vld [vmem:[%s2390_s0 + $0x44] ss:$8 sps:$4 sm:$0xff]   ;;  %v1650_v28 = vld [vmem:[%s2390_s0 + $0x40] ss:$8 sps:$4 sm:$0xff]  }
   0xa   :  { %544 = vmatpush1.bf16.msra.mxu0 %v1615_v3  ;;  %1605 = vmatpush1.bf16.msra.mxu1 %v1615_v3  ;;  %v1648_v27 = vld [vmem:[%s2390_s0 + $0x144] ss:$8 sps:$4 sm:$0xff]   ;;  %v1651_v29 = vld [vmem:[%s2390_s0 + $0x140] ss:$8 sps:$4 sm:$0xff]   ;;  %v1652_v30 = vld [vmem:[%s2390_s0 + $0x54] ss:$8 sps:$4 sm:$0xff]  }
   0xb   :  { %545 = vmatprep.subr.bf16.mxu0 %v1718_v0  ;;  %1597 = vmatprep.subr.bf16.mxu1 %v1718_v0  ;;  %v1654_v31 = vld [vmem:[%s2390_s0 + $0x154] ss:$8 sps:$4 sm:$0xff]   ;;  %v1656_v32 = vld [vmem:[%s2390_s0 + $0x50] ss:$8 sps:$4 sm:$0xff]   ;;  %v1658_v34 = vld [vmem:[%s2390_s0 + $0x64] ss:$8 sps:$4 sm:$0xff]  }
   0xc   :  { %v1657_v33 = vld [vmem:[%s2390_s0 + $0x150] ss:$8 sps:$4 sm:$0xff]   ;;  %v1660_v35 = vld [vmem:[%s2390_s0 + $0x164] ss:$8 sps:$4 sm:$0xff]   ;;  %v1662_v36 = vld [vmem:[%s2390_s0 + $0x60] ss:$8 sps:$4 sm:$0xff]  }
   0xd   :  { %v1663_v37 = vld [vmem:[%s2390_s0 + $0x160] ss:$8 sps:$4 sm:$0xff]   ;;  %v1664_v38 = vld [vmem:[%s2390_s0 + $0x74] ss:$8 sps:$4 sm:$0xff]   ;;  %v1668_v40 = vld [vmem:[%s2390_s0 + $0x70] ss:$8 sps:$4 sm:$0xff]  }
   0xe   :  { %546 = vmatpush1.bf16.msra.mxu0 %v1616_v4  ;;  %1606 = vmatpush1.bf16.msra.mxu1 %v1616_v4  ;;  %v1666_v39 = vld [vmem:[%s2390_s0 + $0x174] ss:$8 sps:$4 sm:$0xff]   ;;  %v1669_v41 = vld [vmem:[%s2390_s0 + $0x170] ss:$8 sps:$4 sm:$0xff]   ;;  %v1670_v42 = vld [vmem:[%s2390_s0 + $0x84] ss:$8 sps:$4 sm:$0xff]  }
   0xf   :  { %547 = vmatprep.subr.bf16.mxu0 %v1718_v0  ;;  %1598 = vmatprep.subr.bf16.mxu1 %v1718_v0  ;;  %v1672_v43 = vld [vmem:[%s2390_s0 + $0x184] ss:$8 sps:$4 sm:$0xff]   ;;  %v1674_v44 = vld [vmem:[%s2390_s0 + $0x80] ss:$8 sps:$4 sm:$0xff]   ;;  %v1676_v46 = vld [vmem:[%s2390_s0 + $0x94] ss:$8 sps:$4 sm:$0xff]  }
  0x10   :  { %v1675_v45 = vld [vmem:[%s2390_s0 + $0x180] ss:$8 sps:$4 sm:$0xff]   ;;  %v1678_v47 = vld [vmem:[%s2390_s0 + $0x194] ss:$8 sps:$4 sm:$0xff]   ;;  %v1680_v48 = vld [vmem:[%s2390_s0 + $0x90] ss:$8 sps:$4 sm:$0xff]  }
  0x11   :  { %v1681_v49 = vld [vmem:[%s2390_s0 + $0x190] ss:$8 sps:$4 sm:$0xff]   ;;  %v1682_v50 = vld [vmem:[%s2390_s0 + $0xa4] ss:$8 sps:$4 sm:$0xff]   ;;  %v1686_v52 = vld [vmem:[%s2390_s0 + $0xa0] ss:$8 sps:$4 sm:$0xff]  }
  0x12   :  { %548 = vmatpush1.bf16.msra.mxu0 %v1617_v7  ;;  %1607 = vmatpush1.bf16.msra.mxu1 %v1617_v7  ;;  %v1684_v51 = vld [vmem:[%s2390_s0 + $0x1a4] ss:$8 sps:$4 sm:$0xff]   ;;  %v1687_v53 = vld [vmem:[%s2390_s0 + $0x1a0] ss:$8 sps:$4 sm:$0xff]   ;;  %v1688_v54 = vld [vmem:[%s2390_s0 + $0xb4] ss:$8 sps:$4 sm:$0xff]  }
  0x13   :  { %549 = vmatprep.subr.bf16.mxu0 %v1718_v0  ;;  %1599 = vmatprep.subr.bf16.mxu1 %v1718_v0  ;;  %v1690_v55 = vld [vmem:[%s2390_s0 + $0x1b4] ss:$8 sps:$4 sm:$0xff]   ;;  %v1692_v56 = vld [vmem:[%s2390_s0 + $0xb0] ss:$8 sps:$4 sm:$0xff]   ;;  %v1694_v58 = vld [vmem:[%s2390_s0 + $0xc4] ss:$8 sps:$4 sm:$0xff]  }
  0x14   :  { %v1693_v57 = vld [vmem:[%s2390_s0 + $0x1b0] ss:$8 sps:$4 sm:$0xff]   ;;  %v1696_v59 = vld [vmem:[%s2390_s0 + $0x1c4] ss:$8 sps:$4 sm:$0xff]   ;;  %v1698_v60 = vld [vmem:[%s2390_s0 + $0xc0] ss:$8 sps:$4 sm:$0xff]  }
  0x15   :  { %v1699_v61 = vld [vmem:[%s2390_s0 + $0x1c0] ss:$8 sps:$4 sm:$0xff]   ;;  %v1700_v62 = vld [vmem:[%s2390_s0 + $0xd4] ss:$8 sps:$4 sm:$0xff]   ;;  %v1705_v1 = vld [vmem:[%s2390_s0 + $0x1d0] ss:$8 sps:$4 sm:$0xff]  }
  0x16   :  { %550 = vmatpush1.bf16.msra.mxu0 %v1618_v8  ;;  %1608 = vmatpush1.bf16.msra.mxu1 %v1618_v8  ;;  %v1702_v63 = vld [vmem:[%s2390_s0 + $0x1d4] ss:$8 sps:$4 sm:$0xff]   ;;  %v1706_v2 = vld [vmem:[%s2390_s0 + $0xe4] ss:$8 sps:$4 sm:$0xff]   ;;  %v1710_v4 = vld [vmem:[%s2390_s0 + $0xe0] ss:$8 sps:$4 sm:$0xff]  }
  0x17   :  { %551 = vmatprep.subr.bf16.mxu0 %v1718_v0  ;;  %1600 = vmatprep.subr.bf16.mxu1 %v1718_v0  ;;  %v1708_v3 = vld [vmem:[%s2390_s0 + $0x1e4] ss:$8 sps:$4 sm:$0xff]   ;;  %v1711_v5 = vld [vmem:[%s2390_s0 + $0x1e0] ss:$8 sps:$4 sm:$0xff]   ;;  %v1712_v6 = vld [vmem:[%s2390_s0 + $0xf4] ss:$8 sps:$4 sm:$0xff]  }
  0x18   :  { %v1714_v7 = vld [vmem:[%s2390_s0 + $0x1f4] ss:$8 sps:$4 sm:$0xff]   ;;  %v1716_v8 = vld [vmem:[%s2390_s0 + $0xf0] ss:$8 sps:$4 sm:$0xff]  }
  0x1a   :  { %552 = vmatpush1.bf16.msra.mxu0 %v1619_v9  ;;  %1609 = vmatpush1.bf16.msra.mxu1 %v1619_v9  ;;  %v1717_v9 = vld [vmem:[%s2390_s0 + $0x1f0] ss:$8 sps:$4 sm:$0xff]  }
  0x1b   :  { %553 = vmatprep.subr.bf16.mxu0 %v1718_v0  ;;  %1601 = vmatprep.subr.bf16.mxu1 %v1718_v0 }
  0x1e   :  { %554 = vmatpush1.bf16.msra.mxu0 %v1620_v10  ;;  %1610 = vmatpush1.bf16.msra.mxu1 %v1620_v10  ;;  %v1998_v10 = vld [vmem:[%s2391_s2] ss:$0 sm:$0xff] }
  0x1f   :  { %555 = vmatprep.subr.bf16.mxu0 %v1718_v0  ;;  %1602 = vmatprep.subr.bf16.mxu1 %v1718_v0  ;;  %v1704_v0 = vld [vmem:[%s2390_s0 + $0xd0] ss:$8 sps:$4 sm:$0xff]  }
  0x22   :  { %556 = vmatpush1.bf16.msra.mxu0 %v1621_v11  ;;  %1611 = vmatpush1.bf16.msra.mxu1 %v1621_v11 }
  0x25   :  { %572 = vmatmul.mubr.bf16.vlgmr.msra.gmra.mrb[0].mxu0 %v1622_v12  ;;  %700 = vmatmul.mubr.bf16.vlgmr.msra.gmra.mrb[0].mxu1 %v1625_v13  ;;  %v2003_v12 = vld [vmem:[%s2392_s3] ss:$0 sm:$0xff] }
  0x26   :  { %1433 = vmatprep.mubr.msk.bf16.mxu0 %vm442_vm0, %v1628_v14  ;;  %1449 = vmatprep.mubr.msk.bf16.mxu1 %vm442_vm0, %v1630_v15 }
  0x2d   :  { %580 = vmatmul.mubr.bf16.gmra.mrb[4].mxu0 %v1632_v16  ;;  %708 = vmatmul.mubr.bf16.gmra.mrb[4].mxu1 %v1633_v17 }
  0x2e   :  { %1434 = vmatprep.mubr.msk.bf16.mxu0 %vm442_vm0, %v1634_v18  ;;  %1450 = vmatprep.mubr.msk.bf16.mxu1 %vm442_vm0, %v1636_v19 }
  0x35   :  { %588 = vmatmul.mubr.bf16.gmra.mrb[8].mxu0 %v1638_v20  ;;  %716 = vmatmul.mubr.bf16.gmra.mrb[8].mxu1 %v1639_v21 }
  0x36   :  { %1435 = vmatprep.mubr.msk.bf16.mxu0 %vm442_vm0, %v1640_v22  ;;  %1451 = vmatprep.mubr.msk.bf16.mxu1 %vm442_vm0, %v1642_v23 }
  0x3d   :  { %596 = vmatmul.mubr.bf16.gmra.mrb[12].mxu0 %v1644_v24  ;;  %724 = vmatmul.mubr.bf16.gmra.mrb[12].mxu1 %v1645_v25 }
  0x3e   :  { %1436 = vmatprep.mubr.msk.bf16.mxu0 %vm442_vm0, %v1646_v26  ;;  %1452 = vmatprep.mubr.msk.bf16.mxu1 %vm442_vm0, %v1648_v27 }
  0x45   :  { %604 = vmatmul.mubr.bf16.gmra.mrb[16].mxu0 %v1650_v28  ;;  %732 = vmatmul.mubr.bf16.gmra.mrb[16].mxu1 %v1651_v29 }
  0x46   :  { %1437 = vmatprep.mubr.msk.bf16.mxu0 %vm442_vm0, %v1652_v30  ;;  %1453 = vmatprep.mubr.msk.bf16.mxu1 %vm442_vm0, %v1654_v31 }
  0x4d   :  { %612 = vmatmul.mubr.bf16.gmra.mrb[20].mxu0 %v1656_v32  ;;  %740 = vmatmul.mubr.bf16.gmra.mrb[20].mxu1 %v1657_v33 }
  0x4e   :  { %1438 = vmatprep.mubr.msk.bf16.mxu0 %vm442_vm0, %v1658_v34  ;;  %1454 = vmatprep.mubr.msk.bf16.mxu1 %vm442_vm0, %v1660_v35 }
  0x55   :  { %620 = vmatmul.mubr.bf16.gmra.mrb[24].mxu0 %v1662_v36  ;;  %748 = vmatmul.mubr.bf16.gmra.mrb[24].mxu1 %v1663_v37 }
  0x56   :  { %1439 = vmatprep.mubr.msk.bf16.mxu0 %vm442_vm0, %v1664_v38  ;;  %1455 = vmatprep.mubr.msk.bf16.mxu1 %vm442_vm0, %v1666_v39 }
  0x5d   :  { %628 = vmatmul.mubr.bf16.gmra.mrb[28].mxu0 %v1668_v40  ;;  %756 = vmatmul.mubr.bf16.gmra.mrb[28].mxu1 %v1669_v41 }
  0x5e   :  { %1440 = vmatprep.mubr.msk.bf16.mxu0 %vm442_vm0, %v1670_v42  ;;  %1456 = vmatprep.mubr.msk.bf16.mxu1 %vm442_vm0, %v1672_v43 }
  0x65   :  { %636 = vmatmul.mubr.bf16.gmra.mrb[32].mxu0 %v1674_v44  ;;  %764 = vmatmul.mubr.bf16.gmra.mrb[32].mxu1 %v1675_v45 }
  0x66   :  { %1441 = vmatprep.mubr.msk.bf16.mxu0 %vm442_vm0, %v1676_v46  ;;  %1457 = vmatprep.mubr.msk.bf16.mxu1 %vm442_vm0, %v1678_v47 }
  0x6d   :  { %644 = vmatmul.mubr.bf16.gmra.mrb[36].mxu0 %v1680_v48  ;;  %772 = vmatmul.mubr.bf16.gmra.mrb[36].mxu1 %v1681_v49 }
  0x6e   :  { %1442 = vmatprep.mubr.msk.bf16.mxu0 %vm442_vm0, %v1682_v50  ;;  %1458 = vmatprep.mubr.msk.bf16.mxu1 %vm442_vm0, %v1684_v51 }
  0x75   :  { %652 = vmatmul.mubr.bf16.gmra.mrb[40].mxu0 %v1686_v52  ;;  %780 = vmatmul.mubr.bf16.gmra.mrb[40].mxu1 %v1687_v53 }
  0x76   :  { %1443 = vmatprep.mubr.msk.bf16.mxu0 %vm442_vm0, %v1688_v54  ;;  %1459 = vmatprep.mubr.msk.bf16.mxu1 %vm442_vm0, %v1690_v55 }
  0x7d   :  { %660 = vmatmul.mubr.bf16.gmra.mrb[44].mxu0 %v1692_v56  ;;  %788 = vmatmul.mubr.bf16.gmra.mrb[44].mxu1 %v1693_v57 }
  0x7e   :  { %1444 = vmatprep.mubr.msk.bf16.mxu0 %vm442_vm0, %v1694_v58  ;;  %1460 = vmatprep.mubr.msk.bf16.mxu1 %vm442_vm0, %v1696_v59 }
  0x85   :  { %668 = vmatmul.mubr.bf16.gmra.mrb[48].mxu0 %v1698_v60  ;;  %796 = vmatmul.mubr.bf16.gmra.mrb[48].mxu1 %v1699_v61 }
  0x86   :  { %1445 = vmatprep.mubr.msk.bf16.mxu0 %vm442_vm0, %v1700_v62  ;;  %1461 = vmatprep.mubr.msk.bf16.mxu1 %vm442_vm0, %v1702_v63 }
  0x8d   :  { %676 = vmatmul.mubr.bf16.gmra.mrb[52].mxu0 %v1704_v0  ;;  %804 = vmatmul.mubr.bf16.gmra.mrb[52].mxu1 %v1705_v1 }
  0x8e   :  { %1446 = vmatprep.mubr.msk.bf16.mxu0 %vm442_vm0, %v1706_v2  ;;  %1462 = vmatprep.mubr.msk.bf16.mxu1 %vm442_vm0, %v1708_v3 }
  0x95   :  { %684 = vmatmul.mubr.bf16.gmra.mrb[56].mxu0 %v1710_v4  ;;  %812 = vmatmul.mubr.bf16.gmra.mrb[56].mxu1 %v1711_v5 }
  0x96   :  { %1447 = vmatprep.mubr.msk.bf16.mxu0 %vm442_vm0, %v1712_v6  ;;  %1463 = vmatprep.mubr.msk.bf16.mxu1 %vm442_vm0, %v1714_v7 }
  0x9d   :  { %692 = vmatmul.mubr.bf16.gmra.mrb[60].mxu0 %v1716_v8  ;;  %820 = vmatmul.mubr.bf16.gmra.mrb[60].mxu1 %v1717_v9 }
  0xf8   :  { %v573_v11 = vpop.f32.mrb[0].mxu0  ;;  %v701_v13 = vpop.f32.mrb[0].mxu1 }
  0xf9   :  { %v835_v14 = vmul.f32 %v1998_v10, %v573_v11  ;;  %v867_v15 = vmul.f32 %v1998_v10, %v701_v13  ;;  %v575_v16 = vpop.f32.mrb[1].mxu0  ;;  %v703_v17 = vpop.f32.mrb[1].mxu1 }
  0xfa   :  { %v576_v18 = vpop.f32.mrb[2].mxu0  ;;  %v704_v19 = vpop.f32.mrb[2].mxu1 }
  0xfb   :  { %v906_v20 = vadd.f32 %v2003_v12, %v835_v14  ;;  %v938_v21 = vadd.f32 %v2003_v12, %v867_v15  ;;  %v836_v22 = vmul.f32 %v1998_v10, %v576_v18  ;;  %v868_v23 = vmul.f32 %v1998_v10, %v704_v19  ;;  %v578_v24 = vpop.f32.mrb[3].mxu0  ;;  %v706_v25 = vpop.f32.mrb[3].mxu1 }
  0xfd   :  { %v970_v26 = vmax.f32 %v906_v20, 0.0  ;;  %v1002_v27 = vmax.f32 %v938_v21, 0.0  ;;  %v907_v28 = vadd.f32 %v2003_v12, %v836_v22  ;;  %v939_v29 = vadd.f32 %v2003_v12, %v868_v23 }
  0xff   :  { %v1530_v30 = vpack.c.bf16 %v970_v26, %v970_v26  ;;  %v1562_v31 = vpack.c.bf16 %v1002_v27, %v1002_v27  ;;  %v971_v32 = vmax.f32 %v907_v28, 0.0  ;;  %v1003_v33 = vmax.f32 %v939_v29, 0.0 }
 0x100   :  { %v581_v34 = vpop.f32.mrb[4].mxu0  ;;  %v709_v35 = vpop.f32.mrb[4].mxu1 }
 0x101   :  { %1291 = vst.msk [vmem:[%s2393_s4] sm:$0xf] %vm1290_vm1, %v1530_v30  ;;  %1323 = vst.msk [vmem:[%s2393_s4 + $0x80] sm:$0xf] %vm1290_vm1, %v1562_v31  ;;  %v1531_v36 = vpack.c.bf16 %v971_v32, %v971_v32  ;;  %v1563_v37 = vpack.c.bf16 %v1003_v33, %v1003_v33  ;;  %v837_v38 = vmul.f32 %v1998_v10, %v581_v34  ;;  %v583_v40 = vpop.f32.mrb[5].mxu0  ;;  %v711_v41 = vpop.f32.mrb[5].mxu1 }
 0x102   :  { %v869_v39 = vmul.f32 %v1998_v10, %v709_v35  ;;  %v584_v42 = vpop.f32.mrb[6].mxu0  ;;  %v712_v43 = vpop.f32.mrb[6].mxu1 }
 0x103   :  { %1292 = vst.msk [vmem:[%s2393_s4 + $0x4] sm:$0xf] %vm1290_vm1, %v1531_v36  ;;  %1324 = vst.msk [vmem:[%s2393_s4 + $0x84] sm:$0xf] %vm1290_vm1, %v1563_v37  ;;  %v908_v44 = vadd.f32 %v2003_v12, %v837_v38  ;;  %v838_v46 = vmul.f32 %v1998_v10, %v584_v42  ;;  %v870_v47 = vmul.f32 %v1998_v10, %v712_v43  ;;  %v586_v48 = vpop.f32.mrb[7].mxu0  ;;  %v714_v49 = vpop.f32.mrb[7].mxu1 }
 0x104   :  { %v940_v45 = vadd.f32 %v2003_v12, %v869_v39 }
 0x105   :  { %v972_v50 = vmax.f32 %v908_v44, 0.0  ;;  %v909_v52 = vadd.f32 %v2003_v12, %v838_v46  ;;  %v941_v53 = vadd.f32 %v2003_v12, %v870_v47 }
 0x106   :  { %v1004_v51 = vmax.f32 %v940_v45, 0.0 }
 0x107   :  { %v1532_v54 = vpack.c.bf16 %v972_v50, %v972_v50  ;;  %v973_v56 = vmax.f32 %v909_v52, 0.0  ;;  %v1005_v57 = vmax.f32 %v941_v53, 0.0 }
 0x108   :  { %v1564_v55 = vpack.c.bf16 %v1004_v51, %v1004_v51  ;;  %v589_v58 = vpop.f32.mrb[8].mxu0  ;;  %v717_v59 = vpop.f32.mrb[8].mxu1 }
 0x109   :  { %1293 = vst.msk [vmem:[%s2393_s4 + $0x8] sm:$0xf] %vm1290_vm1, %v1532_v54  ;;  %v1533_v60 = vpack.c.bf16 %v973_v56, %v973_v56  ;;  %v1565_v61 = vpack.c.bf16 %v1005_v57, %v1005_v57  ;;  %v839_v62 = vmul.f32 %v1998_v10, %v589_v58  ;;  %v871_v63 = vmul.f32 %v1998_v10, %v717_v59  ;;  %v591_v0 = vpop.f32.mrb[9].mxu0  ;;  %v719_v1 = vpop.f32.mrb[9].mxu1 }
 0x10a   :  { %1325 = vst.msk [vmem:[%s2393_s4 + $0x88] sm:$0xf] %vm1290_vm1, %v1564_v55  ;;  %v592_v2 = vpop.f32.mrb[10].mxu0  ;;  %v720_v3 = vpop.f32.mrb[10].mxu1 }
 0x10b   :  { %1294 = vst.msk [vmem:[%s2393_s4 + $0xc] sm:$0xf] %vm1290_vm1, %v1533_v60  ;;  %1326 = vst.msk [vmem:[%s2393_s4 + $0x8c] sm:$0xf] %vm1290_vm1, %v1565_v61  ;;  %v910_v4 = vadd.f32 %v2003_v12, %v839_v62  ;;  %v942_v5 = vadd.f32 %v2003_v12, %v871_v63  ;;  %v840_v6 = vmul.f32 %v1998_v10, %v592_v2  ;;  %v594_v8 = vpop.f32.mrb[11].mxu0  ;;  %v722_v9 = vpop.f32.mrb[11].mxu1 }
 0x10c   :  { %v872_v7 = vmul.f32 %v1998_v10, %v720_v3 }
 0x10d   :  { %v974_v11 = vmax.f32 %v910_v4, 0.0  ;;  %v1006_v13 = vmax.f32 %v942_v5, 0.0  ;;  %v911_v14 = vadd.f32 %v2003_v12, %v840_v6 }
 0x10e   :  { %v943_v15 = vadd.f32 %v2003_v12, %v872_v7 }
 0x10f   :  { %v1534_v16 = vpack.c.bf16 %v974_v11, %v974_v11  ;;  %v1566_v17 = vpack.c.bf16 %v1006_v13, %v1006_v13  ;;  %v975_v18 = vmax.f32 %v911_v14, 0.0 }
 0x110   :  { %v1007_v19 = vmax.f32 %v943_v15, 0.0  ;;  %v597_v20 = vpop.f32.mrb[12].mxu0  ;;  %v725_v21 = vpop.f32.mrb[12].mxu1 }
 0x111   :  { %1295 = vst.msk [vmem:[%s2393_s4 + $0x10] sm:$0xf] %vm1290_vm1, %v1534_v16  ;;  %1327 = vst.msk [vmem:[%s2393_s4 + $0x90] sm:$0xf] %vm1290_vm1, %v1566_v17  ;;  %v1535_v22 = vpack.c.bf16 %v975_v18, %v975_v18  ;;  %v841_v24 = vmul.f32 %v1998_v10, %v597_v20  ;;  %v873_v25 = vmul.f32 %v1998_v10, %v725_v21  ;;  %v599_v26 = vpop.f32.mrb[13].mxu0  ;;  %v727_v27 = vpop.f32.mrb[13].mxu1 }
 0x112   :  { %v1567_v23 = vpack.c.bf16 %v1007_v19, %v1007_v19  ;;  %v600_v28 = vpop.f32.mrb[14].mxu0  ;;  %v728_v29 = vpop.f32.mrb[14].mxu1 }
 0x113   :  { %1296 = vst.msk [vmem:[%s2393_s4 + $0x14] sm:$0xf] %vm1290_vm1, %v1535_v22  ;;  %v912_v30 = vadd.f32 %v2003_v12, %v841_v24  ;;  %v944_v31 = vadd.f32 %v2003_v12, %v873_v25  ;;  %v842_v32 = vmul.f32 %v1998_v10, %v600_v28  ;;  %v874_v33 = vmul.f32 %v1998_v10, %v728_v29  ;;  %v602_v34 = vpop.f32.mrb[15].mxu0  ;;  %v730_v35 = vpop.f32.mrb[15].mxu1 }
 0x114   :  { %1328 = vst.msk [vmem:[%s2393_s4 + $0x94] sm:$0xf] %vm1290_vm1, %v1567_v23 }
 0x115   :  { %v976_v36 = vmax.f32 %v912_v30, 0.0  ;;  %v1008_v37 = vmax.f32 %v944_v31, 0.0  ;;  %v913_v38 = vadd.f32 %v2003_v12, %v842_v32  ;;  %v945_v39 = vadd.f32 %v2003_v12, %v874_v33 }
 0x117   :  { %v1536_v40 = vpack.c.bf16 %v976_v36, %v976_v36  ;;  %v1568_v41 = vpack.c.bf16 %v1008_v37, %v1008_v37  ;;  %v977_v42 = vmax.f32 %v913_v38, 0.0  ;;  %v1009_v43 = vmax.f32 %v945_v39, 0.0 }
 0x118   :  { %v605_v44 = vpop.f32.mrb[16].mxu0  ;;  %v733_v45 = vpop.f32.mrb[16].mxu1 }
 0x119   :  { %1297 = vst.msk [vmem:[%s2393_s4 + $0x18] sm:$0xf] %vm1290_vm1, %v1536_v40  ;;  %1329 = vst.msk [vmem:[%s2393_s4 + $0x98] sm:$0xf] %vm1290_vm1, %v1568_v41  ;;  %v1537_v46 = vpack.c.bf16 %v977_v42, %v977_v42  ;;  %v1569_v47 = vpack.c.bf16 %v1009_v43, %v1009_v43  ;;  %v843_v48 = vmul.f32 %v1998_v10, %v605_v44  ;;  %v607_v50 = vpop.f32.mrb[17].mxu0  ;;  %v735_v51 = vpop.f32.mrb[17].mxu1 }
 0x11a   :  { %v875_v49 = vmul.f32 %v1998_v10, %v733_v45  ;;  %v608_v52 = vpop.f32.mrb[18].mxu0  ;;  %v736_v53 = vpop.f32.mrb[18].mxu1 }
 0x11b   :  { %1298 = vst.msk [vmem:[%s2393_s4 + $0x1c] sm:$0xf] %vm1290_vm1, %v1537_v46  ;;  %1330 = vst.msk [vmem:[%s2393_s4 + $0x9c] sm:$0xf] %vm1290_vm1, %v1569_v47  ;;  %v914_v54 = vadd.f32 %v2003_v12, %v843_v48  ;;  %v844_v56 = vmul.f32 %v1998_v10, %v608_v52  ;;  %v876_v57 = vmul.f32 %v1998_v10, %v736_v53  ;;  %v610_v58 = vpop.f32.mrb[19].mxu0  ;;  %v738_v59 = vpop.f32.mrb[19].mxu1 }
 0x11c   :  { %v946_v55 = vadd.f32 %v2003_v12, %v875_v49 }
 0x11d   :  { %v978_v60 = vmax.f32 %v914_v54, 0.0  ;;  %v915_v62 = vadd.f32 %v2003_v12, %v844_v56  ;;  %v947_v63 = vadd.f32 %v2003_v12, %v876_v57 }
 0x11e   :  { %v1010_v61 = vmax.f32 %v946_v55, 0.0 }
 0x11f   :  { %v1538_v0 = vpack.c.bf16 %v978_v60, %v978_v60  ;;  %v979_v2 = vmax.f32 %v915_v62, 0.0  ;;  %v1011_v3 = vmax.f32 %v947_v63, 0.0 }
 0x120   :  { %v1570_v1 = vpack.c.bf16 %v1010_v61, %v1010_v61  ;;  %v613_v4 = vpop.f32.mrb[20].mxu0  ;;  %v741_v5 = vpop.f32.mrb[20].mxu1 }
 0x121   :  { %1299 = vst.msk [vmem:[%s2393_s4 + $0x20] sm:$0xf] %vm1290_vm1, %v1538_v0  ;;  %v1539_v6 = vpack.c.bf16 %v979_v2, %v979_v2  ;;  %v1571_v7 = vpack.c.bf16 %v1011_v3, %v1011_v3  ;;  %v845_v8 = vmul.f32 %v1998_v10, %v613_v4  ;;  %v877_v9 = vmul.f32 %v1998_v10, %v741_v5  ;;  %v615_v11 = vpop.f32.mrb[21].mxu0  ;;  %v743_v13 = vpop.f32.mrb[21].mxu1 }
 0x122   :  { %1331 = vst.msk [vmem:[%s2393_s4 + $0xa0] sm:$0xf] %vm1290_vm1, %v1570_v1  ;;  %v616_v14 = vpop.f32.mrb[22].mxu0  ;;  %v744_v15 = vpop.f32.mrb[22].mxu1 }
 0x123   :  { %1300 = vst.msk [vmem:[%s2393_s4 + $0x24] sm:$0xf] %vm1290_vm1, %v1539_v6  ;;  %1332 = vst.msk [vmem:[%s2393_s4 + $0xa4] sm:$0xf] %vm1290_vm1, %v1571_v7  ;;  %v916_v16 = vadd.f32 %v2003_v12, %v845_v8  ;;  %v948_v17 = vadd.f32 %v2003_v12, %v877_v9  ;;  %v846_v18 = vmul.f32 %v1998_v10, %v616_v14  ;;  %v618_v20 = vpop.f32.mrb[23].mxu0  ;;  %v746_v21 = vpop.f32.mrb[23].mxu1 }
 0x124   :  { %v878_v19 = vmul.f32 %v1998_v10, %v744_v15 }
 0x125   :  { %v980_v22 = vmax.f32 %v916_v16, 0.0  ;;  %v1012_v23 = vmax.f32 %v948_v17, 0.0  ;;  %v917_v24 = vadd.f32 %v2003_v12, %v846_v18 }
 0x126   :  { %v949_v25 = vadd.f32 %v2003_v12, %v878_v19 }
 0x127   :  { %v1540_v26 = vpack.c.bf16 %v980_v22, %v980_v22  ;;  %v1572_v27 = vpack.c.bf16 %v1012_v23, %v1012_v23  ;;  %v981_v28 = vmax.f32 %v917_v24, 0.0 }
 0x128   :  { %v1013_v29 = vmax.f32 %v949_v25, 0.0  ;;  %v621_v30 = vpop.f32.mrb[24].mxu0  ;;  %v749_v31 = vpop.f32.mrb[24].mxu1 }
 0x129   :  { %1301 = vst.msk [vmem:[%s2393_s4 + $0x28] sm:$0xf] %vm1290_vm1, %v1540_v26  ;;  %1333 = vst.msk [vmem:[%s2393_s4 + $0xa8] sm:$0xf] %vm1290_vm1, %v1572_v27  ;;  %v1541_v32 = vpack.c.bf16 %v981_v28, %v981_v28  ;;  %v847_v34 = vmul.f32 %v1998_v10, %v621_v30  ;;  %v879_v35 = vmul.f32 %v1998_v10, %v749_v31  ;;  %v623_v36 = vpop.f32.mrb[25].mxu0  ;;  %v751_v37 = vpop.f32.mrb[25].mxu1 }
 0x12a   :  { %v1573_v33 = vpack.c.bf16 %v1013_v29, %v1013_v29  ;;  %v624_v38 = vpop.f32.mrb[26].mxu0  ;;  %v752_v39 = vpop.f32.mrb[26].mxu1 }
 0x12b   :  { %1302 = vst.msk [vmem:[%s2393_s4 + $0x2c] sm:$0xf] %vm1290_vm1, %v1541_v32  ;;  %v918_v40 = vadd.f32 %v2003_v12, %v847_v34  ;;  %v950_v41 = vadd.f32 %v2003_v12, %v879_v35  ;;  %v848_v42 = vmul.f32 %v1998_v10, %v624_v38  ;;  %v880_v43 = vmul.f32 %v1998_v10, %v752_v39  ;;  %v626_v44 = vpop.f32.mrb[27].mxu0  ;;  %v754_v45 = vpop.f32.mrb[27].mxu1 }
 0x12c   :  { %1334 = vst.msk [vmem:[%s2393_s4 + $0xac] sm:$0xf] %vm1290_vm1, %v1573_v33 }
 0x12d   :  { %v982_v46 = vmax.f32 %v918_v40, 0.0  ;;  %v1014_v47 = vmax.f32 %v950_v41, 0.0  ;;  %v919_v48 = vadd.f32 %v2003_v12, %v848_v42  ;;  %v951_v49 = vadd.f32 %v2003_v12, %v880_v43 }
 0x12f   :  { %v1542_v50 = vpack.c.bf16 %v982_v46, %v982_v46  ;;  %v1574_v51 = vpack.c.bf16 %v1014_v47, %v1014_v47  ;;  %v983_v52 = vmax.f32 %v919_v48, 0.0  ;;  %v1015_v53 = vmax.f32 %v951_v49, 0.0 }
 0x130   :  { %v629_v54 = vpop.f32.mrb[28].mxu0  ;;  %v757_v55 = vpop.f32.mrb[28].mxu1 }
 0x131   :  { %1303 = vst.msk [vmem:[%s2393_s4 + $0x30] sm:$0xf] %vm1290_vm1, %v1542_v50  ;;  %1335 = vst.msk [vmem:[%s2393_s4 + $0xb0] sm:$0xf] %vm1290_vm1, %v1574_v51  ;;  %v1543_v56 = vpack.c.bf16 %v983_v52, %v983_v52  ;;  %v1575_v57 = vpack.c.bf16 %v1015_v53, %v1015_v53  ;;  %v849_v58 = vmul.f32 %v1998_v10, %v629_v54  ;;  %v631_v60 = vpop.f32.mrb[29].mxu0  ;;  %v759_v61 = vpop.f32.mrb[29].mxu1 }
 0x132   :  { %v881_v59 = vmul.f32 %v1998_v10, %v757_v55  ;;  %v632_v62 = vpop.f32.mrb[30].mxu0  ;;  %v760_v63 = vpop.f32.mrb[30].mxu1 }
 0x133   :  { %1304 = vst.msk [vmem:[%s2393_s4 + $0x34] sm:$0xf] %vm1290_vm1, %v1543_v56  ;;  %1336 = vst.msk [vmem:[%s2393_s4 + $0xb4] sm:$0xf] %vm1290_vm1, %v1575_v57  ;;  %v920_v0 = vadd.f32 %v2003_v12, %v849_v58  ;;  %v850_v2 = vmul.f32 %v1998_v10, %v632_v62  ;;  %v882_v3 = vmul.f32 %v1998_v10, %v760_v63  ;;  %v634_v4 = vpop.f32.mrb[31].mxu0  ;;  %v762_v5 = vpop.f32.mrb[31].mxu1 }
 0x134   :  { %v952_v1 = vadd.f32 %v2003_v12, %v881_v59 }
 0x135   :  { %v984_v6 = vmax.f32 %v920_v0, 0.0  ;;  %v921_v8 = vadd.f32 %v2003_v12, %v850_v2  ;;  %v953_v9 = vadd.f32 %v2003_v12, %v882_v3 }
 0x136   :  { %v1016_v7 = vmax.f32 %v952_v1, 0.0 }
 0x137   :  { %v1544_v11 = vpack.c.bf16 %v984_v6, %v984_v6  ;;  %v985_v14 = vmax.f32 %v921_v8, 0.0  ;;  %v1017_v15 = vmax.f32 %v953_v9, 0.0 }
 0x138   :  { %v1576_v13 = vpack.c.bf16 %v1016_v7, %v1016_v7  ;;  %v637_v16 = vpop.f32.mrb[32].mxu0  ;;  %v765_v17 = vpop.f32.mrb[32].mxu1 }
 0x139   :  { %1305 = vst.msk [vmem:[%s2393_s4 + $0x38] sm:$0xf] %vm1290_vm1, %v1544_v11  ;;  %v1545_v18 = vpack.c.bf16 %v985_v14, %v985_v14  ;;  %v1577_v19 = vpack.c.bf16 %v1017_v15, %v1017_v15  ;;  %v851_v20 = vmul.f32 %v1998_v10, %v637_v16  ;;  %v883_v21 = vmul.f32 %v1998_v10, %v765_v17  ;;  %v639_v22 = vpop.f32.mrb[33].mxu0  ;;  %v767_v23 = vpop.f32.mrb[33].mxu1 }
 0x13a   :  { %1337 = vst.msk [vmem:[%s2393_s4 + $0xb8] sm:$0xf] %vm1290_vm1, %v1576_v13  ;;  %v640_v24 = vpop.f32.mrb[34].mxu0  ;;  %v768_v25 = vpop.f32.mrb[34].mxu1 }
 0x13b   :  { %1306 = vst.msk [vmem:[%s2393_s4 + $0x3c] sm:$0xf] %vm1290_vm1, %v1545_v18  ;;  %1338 = vst.msk [vmem:[%s2393_s4 + $0xbc] sm:$0xf] %vm1290_vm1, %v1577_v19  ;;  %v922_v26 = vadd.f32 %v2003_v12, %v851_v20  ;;  %v954_v27 = vadd.f32 %v2003_v12, %v883_v21  ;;  %v852_v28 = vmul.f32 %v1998_v10, %v640_v24  ;;  %v642_v30 = vpop.f32.mrb[35].mxu0  ;;  %v770_v31 = vpop.f32.mrb[35].mxu1 }
 0x13c   :  { %v884_v29 = vmul.f32 %v1998_v10, %v768_v25 }
 0x13d   :  { %v986_v32 = vmax.f32 %v922_v26, 0.0  ;;  %v1018_v33 = vmax.f32 %v954_v27, 0.0  ;;  %v923_v34 = vadd.f32 %v2003_v12, %v852_v28 }
 0x13e   :  { %v955_v35 = vadd.f32 %v2003_v12, %v884_v29 }
 0x13f   :  { %v1546_v36 = vpack.c.bf16 %v986_v32, %v986_v32  ;;  %v1578_v37 = vpack.c.bf16 %v1018_v33, %v1018_v33  ;;  %v987_v38 = vmax.f32 %v923_v34, 0.0 }
 0x140   :  { %v1019_v39 = vmax.f32 %v955_v35, 0.0  ;;  %v645_v40 = vpop.f32.mrb[36].mxu0  ;;  %v773_v41 = vpop.f32.mrb[36].mxu1 }
 0x141   :  { %1307 = vst.msk [vmem:[%s2393_s4 + $0x40] sm:$0xf] %vm1290_vm1, %v1546_v36  ;;  %1339 = vst.msk [vmem:[%s2393_s4 + $0xc0] sm:$0xf] %vm1290_vm1, %v1578_v37  ;;  %v1547_v42 = vpack.c.bf16 %v987_v38, %v987_v38  ;;  %v853_v44 = vmul.f32 %v1998_v10, %v645_v40  ;;  %v885_v45 = vmul.f32 %v1998_v10, %v773_v41  ;;  %v647_v46 = vpop.f32.mrb[37].mxu0  ;;  %v775_v47 = vpop.f32.mrb[37].mxu1 }
 0x142   :  { %v1579_v43 = vpack.c.bf16 %v1019_v39, %v1019_v39  ;;  %v648_v48 = vpop.f32.mrb[38].mxu0  ;;  %v776_v49 = vpop.f32.mrb[38].mxu1 }
 0x143   :  { %1308 = vst.msk [vmem:[%s2393_s4 + $0x44] sm:$0xf] %vm1290_vm1, %v1547_v42  ;;  %v924_v50 = vadd.f32 %v2003_v12, %v853_v44  ;;  %v956_v51 = vadd.f32 %v2003_v12, %v885_v45  ;;  %v854_v52 = vmul.f32 %v1998_v10, %v648_v48  ;;  %v886_v53 = vmul.f32 %v1998_v10, %v776_v49  ;;  %v650_v54 = vpop.f32.mrb[39].mxu0  ;;  %v778_v55 = vpop.f32.mrb[39].mxu1 }
 0x144   :  { %1340 = vst.msk [vmem:[%s2393_s4 + $0xc4] sm:$0xf] %vm1290_vm1, %v1579_v43 }
 0x145   :  { %v988_v56 = vmax.f32 %v924_v50, 0.0  ;;  %v1020_v57 = vmax.f32 %v956_v51, 0.0  ;;  %v925_v58 = vadd.f32 %v2003_v12, %v854_v52  ;;  %v957_v59 = vadd.f32 %v2003_v12, %v886_v53 }
 0x147   :  { %v1548_v60 = vpack.c.bf16 %v988_v56, %v988_v56  ;;  %v1580_v61 = vpack.c.bf16 %v1020_v57, %v1020_v57  ;;  %v989_v62 = vmax.f32 %v925_v58, 0.0  ;;  %v1021_v63 = vmax.f32 %v957_v59, 0.0 }
 0x148   :  { %v653_v0 = vpop.f32.mrb[40].mxu0  ;;  %v781_v1 = vpop.f32.mrb[40].mxu1 }
 0x149   :  { %1309 = vst.msk [vmem:[%s2393_s4 + $0x48] sm:$0xf] %vm1290_vm1, %v1548_v60  ;;  %1341 = vst.msk [vmem:[%s2393_s4 + $0xc8] sm:$0xf] %vm1290_vm1, %v1580_v61  ;;  %v1549_v2 = vpack.c.bf16 %v989_v62, %v989_v62  ;;  %v1581_v3 = vpack.c.bf16 %v1021_v63, %v1021_v63  ;;  %v855_v4 = vmul.f32 %v1998_v10, %v653_v0  ;;  %v655_v6 = vpop.f32.mrb[41].mxu0  ;;  %v783_v7 = vpop.f32.mrb[41].mxu1 }
 0x14a   :  { %v887_v5 = vmul.f32 %v1998_v10, %v781_v1  ;;  %v656_v8 = vpop.f32.mrb[42].mxu0  ;;  %v784_v9 = vpop.f32.mrb[42].mxu1 }
 0x14b   :  { %1310 = vst.msk [vmem:[%s2393_s4 + $0x4c] sm:$0xf] %vm1290_vm1, %v1549_v2  ;;  %1342 = vst.msk [vmem:[%s2393_s4 + $0xcc] sm:$0xf] %vm1290_vm1, %v1581_v3  ;;  %v926_v11 = vadd.f32 %v2003_v12, %v855_v4  ;;  %v856_v14 = vmul.f32 %v1998_v10, %v656_v8  ;;  %v888_v15 = vmul.f32 %v1998_v10, %v784_v9  ;;  %v658_v16 = vpop.f32.mrb[43].mxu0  ;;  %v786_v17 = vpop.f32.mrb[43].mxu1 }
 0x14c   :  { %v958_v13 = vadd.f32 %v2003_v12, %v887_v5 }
 0x14d   :  { %v990_v18 = vmax.f32 %v926_v11, 0.0  ;;  %v927_v20 = vadd.f32 %v2003_v12, %v856_v14  ;;  %v959_v21 = vadd.f32 %v2003_v12, %v888_v15 }
 0x14e   :  { %v1022_v19 = vmax.f32 %v958_v13, 0.0 }
 0x14f   :  { %v1550_v22 = vpack.c.bf16 %v990_v18, %v990_v18  ;;  %v991_v24 = vmax.f32 %v927_v20, 0.0  ;;  %v1023_v25 = vmax.f32 %v959_v21, 0.0 }
 0x150   :  { %v1582_v23 = vpack.c.bf16 %v1022_v19, %v1022_v19  ;;  %v661_v26 = vpop.f32.mrb[44].mxu0  ;;  %v789_v27 = vpop.f32.mrb[44].mxu1 }
 0x151   :  { %1311 = vst.msk [vmem:[%s2393_s4 + $0x50] sm:$0xf] %vm1290_vm1, %v1550_v22  ;;  %v1551_v28 = vpack.c.bf16 %v991_v24, %v991_v24  ;;  %v1583_v29 = vpack.c.bf16 %v1023_v25, %v1023_v25  ;;  %v857_v30 = vmul.f32 %v1998_v10, %v661_v26  ;;  %v889_v31 = vmul.f32 %v1998_v10, %v789_v27  ;;  %v663_v32 = vpop.f32.mrb[45].mxu0  ;;  %v791_v33 = vpop.f32.mrb[45].mxu1 }
 0x152   :  { %1343 = vst.msk [vmem:[%s2393_s4 + $0xd0] sm:$0xf] %vm1290_vm1, %v1582_v23  ;;  %v664_v34 = vpop.f32.mrb[46].mxu0  ;;  %v792_v35 = vpop.f32.mrb[46].mxu1 }
 0x153   :  { %1312 = vst.msk [vmem:[%s2393_s4 + $0x54] sm:$0xf] %vm1290_vm1, %v1551_v28  ;;  %1344 = vst.msk [vmem:[%s2393_s4 + $0xd4] sm:$0xf] %vm1290_vm1, %v1583_v29  ;;  %v928_v36 = vadd.f32 %v2003_v12, %v857_v30  ;;  %v960_v37 = vadd.f32 %v2003_v12, %v889_v31  ;;  %v858_v38 = vmul.f32 %v1998_v10, %v664_v34  ;;  %v666_v40 = vpop.f32.mrb[47].mxu0  ;;  %v794_v41 = vpop.f32.mrb[47].mxu1 }
 0x154   :  { %v890_v39 = vmul.f32 %v1998_v10, %v792_v35 }
 0x155   :  { %v992_v42 = vmax.f32 %v928_v36, 0.0  ;;  %v1024_v43 = vmax.f32 %v960_v37, 0.0  ;;  %v929_v44 = vadd.f32 %v2003_v12, %v858_v38 }
 0x156   :  { %v961_v45 = vadd.f32 %v2003_v12, %v890_v39 }
 0x157   :  { %v1552_v46 = vpack.c.bf16 %v992_v42, %v992_v42  ;;  %v1584_v47 = vpack.c.bf16 %v1024_v43, %v1024_v43  ;;  %v993_v48 = vmax.f32 %v929_v44, 0.0 }
 0x158   :  { %v1025_v49 = vmax.f32 %v961_v45, 0.0  ;;  %v669_v50 = vpop.f32.mrb[48].mxu0  ;;  %v797_v51 = vpop.f32.mrb[48].mxu1 }
 0x159   :  { %1313 = vst.msk [vmem:[%s2393_s4 + $0x58] sm:$0xf] %vm1290_vm1, %v1552_v46  ;;  %1345 = vst.msk [vmem:[%s2393_s4 + $0xd8] sm:$0xf] %vm1290_vm1, %v1584_v47  ;;  %v1553_v52 = vpack.c.bf16 %v993_v48, %v993_v48  ;;  %v859_v54 = vmul.f32 %v1998_v10, %v669_v50  ;;  %v891_v55 = vmul.f32 %v1998_v10, %v797_v51  ;;  %v671_v56 = vpop.f32.mrb[49].mxu0  ;;  %v799_v57 = vpop.f32.mrb[49].mxu1 }
 0x15a   :  { %v1585_v53 = vpack.c.bf16 %v1025_v49, %v1025_v49  ;;  %v672_v58 = vpop.f32.mrb[50].mxu0  ;;  %v800_v59 = vpop.f32.mrb[50].mxu1 }
 0x15b   :  { %1314 = vst.msk [vmem:[%s2393_s4 + $0x5c] sm:$0xf] %vm1290_vm1, %v1553_v52  ;;  %v930_v60 = vadd.f32 %v2003_v12, %v859_v54  ;;  %v962_v61 = vadd.f32 %v2003_v12, %v891_v55  ;;  %v860_v62 = vmul.f32 %v1998_v10, %v672_v58  ;;  %v892_v63 = vmul.f32 %v1998_v10, %v800_v59  ;;  %v674_v0 = vpop.f32.mrb[51].mxu0  ;;  %v802_v1 = vpop.f32.mrb[51].mxu1 }
 0x15c   :  { %1346 = vst.msk [vmem:[%s2393_s4 + $0xdc] sm:$0xf] %vm1290_vm1, %v1585_v53 }
 0x15d   :  { %v994_v2 = vmax.f32 %v930_v60, 0.0  ;;  %v1026_v3 = vmax.f32 %v962_v61, 0.0  ;;  %v931_v4 = vadd.f32 %v2003_v12, %v860_v62  ;;  %v963_v5 = vadd.f32 %v2003_v12, %v892_v63 }
 0x15f   :  { %v1554_v6 = vpack.c.bf16 %v994_v2, %v994_v2  ;;  %v1586_v7 = vpack.c.bf16 %v1026_v3, %v1026_v3  ;;  %v995_v8 = vmax.f32 %v931_v4, 0.0  ;;  %v1027_v9 = vmax.f32 %v963_v5, 0.0 }
 0x160   :  { %v677_v11 = vpop.f32.mrb[52].mxu0  ;;  %v805_v13 = vpop.f32.mrb[52].mxu1 }
 0x161   :  { %1315 = vst.msk [vmem:[%s2393_s4 + $0x60] sm:$0xf] %vm1290_vm1, %v1554_v6  ;;  %1347 = vst.msk [vmem:[%s2393_s4 + $0xe0] sm:$0xf] %vm1290_vm1, %v1586_v7  ;;  %v1555_v14 = vpack.c.bf16 %v995_v8, %v995_v8  ;;  %v1587_v15 = vpack.c.bf16 %v1027_v9, %v1027_v9  ;;  %v861_v16 = vmul.f32 %v1998_v10, %v677_v11  ;;  %v679_v18 = vpop.f32.mrb[53].mxu0  ;;  %v807_v19 = vpop.f32.mrb[53].mxu1 }
 0x162   :  { %v893_v17 = vmul.f32 %v1998_v10, %v805_v13  ;;  %v680_v20 = vpop.f32.mrb[54].mxu0  ;;  %v808_v21 = vpop.f32.mrb[54].mxu1 }
 0x163   :  { %1316 = vst.msk [vmem:[%s2393_s4 + $0x64] sm:$0xf] %vm1290_vm1, %v1555_v14  ;;  %1348 = vst.msk [vmem:[%s2393_s4 + $0xe4] sm:$0xf] %vm1290_vm1, %v1587_v15  ;;  %v932_v22 = vadd.f32 %v2003_v12, %v861_v16  ;;  %v862_v24 = vmul.f32 %v1998_v10, %v680_v20  ;;  %v894_v25 = vmul.f32 %v1998_v10, %v808_v21  ;;  %v682_v26 = vpop.f32.mrb[55].mxu0  ;;  %v810_v27 = vpop.f32.mrb[55].mxu1 }
 0x164   :  { %v964_v23 = vadd.f32 %v2003_v12, %v893_v17 }
 0x165   :  { %v996_v28 = vmax.f32 %v932_v22, 0.0  ;;  %v933_v30 = vadd.f32 %v2003_v12, %v862_v24  ;;  %v965_v31 = vadd.f32 %v2003_v12, %v894_v25 }
 0x166   :  { %v1028_v29 = vmax.f32 %v964_v23, 0.0 }
 0x167   :  { %v1556_v32 = vpack.c.bf16 %v996_v28, %v996_v28  ;;  %v997_v34 = vmax.f32 %v933_v30, 0.0  ;;  %v1029_v35 = vmax.f32 %v965_v31, 0.0 }
 0x168   :  { %v1588_v33 = vpack.c.bf16 %v1028_v29, %v1028_v29  ;;  %v685_v36 = vpop.f32.mrb[56].mxu0  ;;  %v813_v37 = vpop.f32.mrb[56].mxu1 }
 0x169   :  { %1317 = vst.msk [vmem:[%s2393_s4 + $0x68] sm:$0xf] %vm1290_vm1, %v1556_v32  ;;  %v1557_v38 = vpack.c.bf16 %v997_v34, %v997_v34  ;;  %v1589_v39 = vpack.c.bf16 %v1029_v35, %v1029_v35  ;;  %v863_v40 = vmul.f32 %v1998_v10, %v685_v36  ;;  %v895_v41 = vmul.f32 %v1998_v10, %v813_v37  ;;  %v687_v42 = vpop.f32.mrb[57].mxu0  ;;  %v815_v43 = vpop.f32.mrb[57].mxu1 }
 0x16a   :  { %1349 = vst.msk [vmem:[%s2393_s4 + $0xe8] sm:$0xf] %vm1290_vm1, %v1588_v33  ;;  %v688_v44 = vpop.f32.mrb[58].mxu0  ;;  %v816_v45 = vpop.f32.mrb[58].mxu1 }
 0x16b   :  { %1318 = vst.msk [vmem:[%s2393_s4 + $0x6c] sm:$0xf] %vm1290_vm1, %v1557_v38  ;;  %1350 = vst.msk [vmem:[%s2393_s4 + $0xec] sm:$0xf] %vm1290_vm1, %v1589_v39  ;;  %v934_v46 = vadd.f32 %v2003_v12, %v863_v40  ;;  %v966_v47 = vadd.f32 %v2003_v12, %v895_v41  ;;  %v864_v48 = vmul.f32 %v1998_v10, %v688_v44  ;;  %v690_v50 = vpop.f32.mrb[59].mxu0  ;;  %v818_v51 = vpop.f32.mrb[59].mxu1 }
 0x16c   :  { %v896_v49 = vmul.f32 %v1998_v10, %v816_v45 }
 0x16d   :  { %v998_v52 = vmax.f32 %v934_v46, 0.0  ;;  %v1030_v53 = vmax.f32 %v966_v47, 0.0  ;;  %v935_v54 = vadd.f32 %v2003_v12, %v864_v48 }
 0x16e   :  { %v967_v55 = vadd.f32 %v2003_v12, %v896_v49 }
 0x16f   :  { %v1558_v56 = vpack.c.bf16 %v998_v52, %v998_v52  ;;  %v1590_v57 = vpack.c.bf16 %v1030_v53, %v1030_v53  ;;  %v999_v58 = vmax.f32 %v935_v54, 0.0 }
 0x170   :  { %v1031_v59 = vmax.f32 %v967_v55, 0.0  ;;  %v693_v60 = vpop.f32.mrb[60].mxu0  ;;  %v821_v61 = vpop.f32.mrb[60].mxu1 }
 0x171   :  { %1319 = vst.msk [vmem:[%s2393_s4 + $0x70] sm:$0xf] %vm1290_vm1, %v1558_v56  ;;  %1351 = vst.msk [vmem:[%s2393_s4 + $0xf0] sm:$0xf] %vm1290_vm1, %v1590_v57  ;;  %v1559_v62 = vpack.c.bf16 %v999_v58, %v999_v58  ;;  %v865_v0 = vmul.f32 %v1998_v10, %v693_v60  ;;  %v897_v1 = vmul.f32 %v1998_v10, %v821_v61  ;;  %v695_v2 = vpop.f32.mrb[61].mxu0  ;;  %v823_v3 = vpop.f32.mrb[61].mxu1 }
 0x172   :  { %v1591_v63 = vpack.c.bf16 %v1031_v59, %v1031_v59  ;;  %v696_v4 = vpop.f32.mrb[62].mxu0  ;;  %v824_v5 = vpop.f32.mrb[62].mxu1 }
 0x173   :  { %1320 = vst.msk [vmem:[%s2393_s4 + $0x74] sm:$0xf] %vm1290_vm1, %v1559_v62  ;;  %v936_v6 = vadd.f32 %v2003_v12, %v865_v0  ;;  %v968_v7 = vadd.f32 %v2003_v12, %v897_v1  ;;  %v866_v8 = vmul.f32 %v1998_v10, %v696_v4  ;;  %v898_v9 = vmul.f32 %v1998_v10, %v824_v5  ;;  %v698_v11 = vpop.f32.mrb[63].mxu0  ;;  %v826_v13 = vpop.f32.mrb[63].mxu1 }
 0x174   :  { %1352 = vst.msk [vmem:[%s2393_s4 + $0xf4] sm:$0xf] %vm1290_vm1, %v1591_v63 }
 0x175   :  { %v1000_v14 = vmax.f32 %v936_v6, 0.0  ;;  %v1032_v15 = vmax.f32 %v968_v7, 0.0  ;;  %v937_v16 = vadd.f32 %v2003_v12, %v866_v8  ;;  %v969_v17 = vadd.f32 %v2003_v12, %v898_v9 }
 0x177   :  { %v1560_v18 = vpack.c.bf16 %v1000_v14, %v1000_v14  ;;  %v1592_v19 = vpack.c.bf16 %v1032_v15, %v1032_v15  ;;  %v1001_v20 = vmax.f32 %v937_v16, 0.0  ;;  %v1033_v21 = vmax.f32 %v969_v17, 0.0 }
 0x179   :  { %1321 = vst.msk [vmem:[%s2393_s4 + $0x78] sm:$0xf] %vm1290_vm1, %v1560_v18  ;;  %1353 = vst.msk [vmem:[%s2393_s4 + $0xf8] sm:$0xf] %vm1290_vm1, %v1592_v19  ;;  %v1561_v10 = vpack.c.bf16 %v1001_v20, %v1001_v20  ;;  %v1593_v22 = vpack.c.bf16 %v1033_v21, %v1033_v21 }
 0x17b   :  { %1322 = vst.msk [vmem:[%s2393_s4 + $0x7c] sm:$0xf] %vm1290_vm1, %v1561_v10  ;;  %1354 = vst.msk [vmem:[%s2393_s4 + $0xfc] sm:$0xf] %vm1290_vm1, %v1593_v22 }

// kernel: networks_forward.12
= control target key start
LH: loop header
LB: loop body
LE: loop exit
PB: predicated region body
PF: predicated region fallthrough
CT: control target
= control target key end

     0   :  { %v1787_v0 = vmov 0   ;;  %vm509_vm0 = vcmask 130048   ;;  %vm1357_vm1 = vcmask 125952   ;;  %s2645_s1 = inlined_call_operand.vmem [shape: bf16[144,16], index: 1, kind: input, shape index: {}]   ;;  %s2646_s0 = inlined_call_operand.vmem [shape: bf16[512,144], index: 0, kind: input, shape index: {}]   ;;  %s2647_s2 = inlined_call_operand.vmem [shape: f32[512,16], index: 2, kind: input, shape index: {}]   ;;  %s2648_s3 = inlined_call_operand.vmem [shape: f32[1,16], index: 3, kind: input, shape index: {}]   ;;  %s2649_s4 = inlined_call_operand.vmem [shape: f32[1,16], index: 4, kind: input, shape index: {}]   ;;  %s2650_s5 = inlined_call_operand.vmem [shape: bf16[512,16], index: 5, kind: output, shape index: {}]  }
   0x1   :  { %606 = vmatprep.subr.bf16.mxu0 %v1787_v0  ;;  %1661 = vmatprep.subr.bf16.mxu1 %v1787_v0  ;;  %v1680_v1 = vld [vmem:[%s2645_s1] sm:$0xff]   ;;  %v1681_v2 = vld [vmem:[%s2645_s1 + $0x8] sm:$0xff]   ;;  %v1682_v3 = vld [vmem:[%s2645_s1 + $0x10] sm:$0xff]  }
   0x2   :  { %607 = vmatpush1.bf16.msra.mxu0 %v1680_v1  ;;  %1670 = vmatpush1.bf16.msra.mxu1 %v1680_v1  ;;  %v1683_v4 = vld [vmem:[%s2645_s1 + $0x18] sm:$0xff]   ;;  %v1691_v5 = vld [vmem:[%s2646_s0 + $0x4] ss:$8 sps:$4 sm:$0xff]   ;;  %v1686_v9 = vld [vmem:[%s2645_s1 + $0x30] sm:$0xff]  }
   0x3   :  { %608 = vmatprep.subr.bf16.mxu0 %v1787_v0  ;;  %1662 = vmatprep.subr.bf16.mxu1 %v1787_v0  ;;  %v1694_v6 = vld [vmem:[%s2646_s0 + $0x104] ss:$8 sps:$4 sm:$0xff]   ;;  %v1687_v10 = vld [vmem:[%s2645_s1 + $0x38] sm:$0xff]   ;;  %v1689_v12 = vld [vmem:[%s2646_s0] ss:$8 sps:$4 sm:$0xff]  }
   0x4   :  { %1499 = vmatprep.mubr.msk.bf16.mxu0 %vm509_vm0, %v1691_v5  ;;  %1515 = vmatprep.mubr.msk.bf16.mxu1 %vm509_vm0, %v1694_v6  ;;  %v1684_v7 = vld [vmem:[%s2645_s1 + $0x20] sm:$0xff]   ;;  %v1685_v8 = vld [vmem:[%s2645_s1 + $0x28] sm:$0xff]   ;;  %v1695_v14 = vld [vmem:[%s2646_s0 + $0x14] ss:$8 sps:$4 sm:$0xff]  }
   0x5   :  { %v1688_v11 = vld [vmem:[%s2645_s1 + $0x40] sm:$0xff]   ;;  %v1697_v15 = vld [vmem:[%s2646_s0 + $0x114] ss:$8 sps:$4 sm:$0xff]   ;;  %v1699_v16 = vld [vmem:[%s2646_s0 + $0x10] ss:$8 sps:$4 sm:$0xff]  }
   0x6   :  { %609 = vmatpush1.bf16.msra.mxu0 %v1681_v2  ;;  %1671 = vmatpush1.bf16.msra.mxu1 %v1681_v2  ;;  %v1692_v13 = vld [vmem:[%s2646_s0 + $0x100] ss:$8 sps:$4 sm:$0xff]   ;;  %v1700_v17 = vld [vmem:[%s2646_s0 + $0x110] ss:$8 sps:$4 sm:$0xff]   ;;  %v1701_v18 = vld [vmem:[%s2646_s0 + $0x24] ss:$8 sps:$4 sm:$0xff]  }
   0x7   :  { %610 = vmatprep.subr.bf16.mxu0 %v1787_v0  ;;  %1663 = vmatprep.subr.bf16.mxu1 %v1787_v0  ;;  %v1703_v19 = vld [vmem:[%s2646_s0 + $0x124] ss:$8 sps:$4 sm:$0xff]   ;;  %v1705_v20 = vld [vmem:[%s2646_s0 + $0x20] ss:$8 sps:$4 sm:$0xff]   ;;  %v1707_v22 = vld [vmem:[%s2646_s0 + $0x34] ss:$8 sps:$4 sm:$0xff]  }
   0x8   :  { %v1706_v21 = vld [vmem:[%s2646_s0 + $0x120] ss:$8 sps:$4 sm:$0xff]   ;;  %v1709_v23 = vld [vmem:[%s2646_s0 + $0x134] ss:$8 sps:$4 sm:$0xff]   ;;  %v1711_v24 = vld [vmem:[%s2646_s0 + $0x30] ss:$8 sps:$4 sm:$0xff]  }
   0x9   :  { %v1712_v25 = vld [vmem:[%s2646_s0 + $0x130] ss:$8 sps:$4 sm:$0xff]   ;;  %v1713_v26 = vld [vmem:[%s2646_s0 + $0x44] ss:$8 sps:$4 sm:$0xff]   ;;  %v1717_v28 = vld [vmem:[%s2646_s0 + $0x40] ss:$8 sps:$4 sm:$0xff]  }
   0xa   :  { %611 = vmatpush1.bf16.msra.mxu0 %v1682_v3  ;;  %1672 = vmatpush1.bf16.msra.mxu1 %v1682_v3  ;;  %v1715_v27 = vld [vmem:[%s2646_s0 + $0x144] ss:$8 sps:$4 sm:$0xff]   ;;  %v1718_v29 = vld [vmem:[%s2646_s0 + $0x140] ss:$8 sps:$4 sm:$0xff]   ;;  %v1719_v30 = vld [vmem:[%s2646_s0 + $0x54] ss:$8 sps:$4 sm:$0xff]  }
   0xb   :  { %612 = vmatprep.subr.bf16.mxu0 %v1787_v0  ;;  %1664 = vmatprep.subr.bf16.mxu1 %v1787_v0  ;;  %v1721_v31 = vld [vmem:[%s2646_s0 + $0x154] ss:$8 sps:$4 sm:$0xff]   ;;  %v1723_v32 = vld [vmem:[%s2646_s0 + $0x50] ss:$8 sps:$4 sm:$0xff]   ;;  %v1725_v34 = vld [vmem:[%s2646_s0 + $0x64] ss:$8 sps:$4 sm:$0xff]  }
   0xc   :  { %v1724_v33 = vld [vmem:[%s2646_s0 + $0x150] ss:$8 sps:$4 sm:$0xff]   ;;  %v1727_v35 = vld [vmem:[%s2646_s0 + $0x164] ss:$8 sps:$4 sm:$0xff]   ;;  %v1729_v36 = vld [vmem:[%s2646_s0 + $0x60] ss:$8 sps:$4 sm:$0xff]  }
   0xd   :  { %v1730_v37 = vld [vmem:[%s2646_s0 + $0x160] ss:$8 sps:$4 sm:$0xff]   ;;  %v1731_v38 = vld [vmem:[%s2646_s0 + $0x74] ss:$8 sps:$4 sm:$0xff]   ;;  %v1735_v40 = vld [vmem:[%s2646_s0 + $0x70] ss:$8 sps:$4 sm:$0xff]  }
   0xe   :  { %613 = vmatpush1.bf16.msra.mxu0 %v1683_v4  ;;  %1673 = vmatpush1.bf16.msra.mxu1 %v1683_v4  ;;  %v1733_v39 = vld [vmem:[%s2646_s0 + $0x174] ss:$8 sps:$4 sm:$0xff]   ;;  %v1736_v41 = vld [vmem:[%s2646_s0 + $0x170] ss:$8 sps:$4 sm:$0xff]   ;;  %v1737_v42 = vld [vmem:[%s2646_s0 + $0x84] ss:$8 sps:$4 sm:$0xff]  }
   0xf   :  { %614 = vmatprep.subr.bf16.mxu0 %v1787_v0  ;;  %1665 = vmatprep.subr.bf16.mxu1 %v1787_v0  ;;  %v1739_v43 = vld [vmem:[%s2646_s0 + $0x184] ss:$8 sps:$4 sm:$0xff]   ;;  %v1741_v44 = vld [vmem:[%s2646_s0 + $0x80] ss:$8 sps:$4 sm:$0xff]   ;;  %v1743_v46 = vld [vmem:[%s2646_s0 + $0x94] ss:$8 sps:$4 sm:$0xff]  }
  0x10   :  { %v1742_v45 = vld [vmem:[%s2646_s0 + $0x180] ss:$8 sps:$4 sm:$0xff]   ;;  %v1745_v47 = vld [vmem:[%s2646_s0 + $0x194] ss:$8 sps:$4 sm:$0xff]   ;;  %v1747_v48 = vld [vmem:[%s2646_s0 + $0x90] ss:$8 sps:$4 sm:$0xff]  }
  0x11   :  { %v1748_v49 = vld [vmem:[%s2646_s0 + $0x190] ss:$8 sps:$4 sm:$0xff]   ;;  %v1749_v50 = vld [vmem:[%s2646_s0 + $0xa4] ss:$8 sps:$4 sm:$0xff]   ;;  %v1753_v52 = vld [vmem:[%s2646_s0 + $0xa0] ss:$8 sps:$4 sm:$0xff]  }
  0x12   :  { %615 = vmatpush1.bf16.msra.mxu0 %v1684_v7  ;;  %1674 = vmatpush1.bf16.msra.mxu1 %v1684_v7  ;;  %v1751_v51 = vld [vmem:[%s2646_s0 + $0x1a4] ss:$8 sps:$4 sm:$0xff]   ;;  %v1754_v53 = vld [vmem:[%s2646_s0 + $0x1a0] ss:$8 sps:$4 sm:$0xff]   ;;  %v1755_v54 = vld [vmem:[%s2646_s0 + $0xb4] ss:$8 sps:$4 sm:$0xff]  }
  0x13   :  { %616 = vmatprep.subr.bf16.mxu0 %v1787_v0  ;;  %1666 = vmatprep.subr.bf16.mxu1 %v1787_v0  ;;  %v1757_v55 = vld [vmem:[%s2646_s0 + $0x1b4] ss:$8 sps:$4 sm:$0xff]   ;;  %v1759_v56 = vld [vmem:[%s2646_s0 + $0xb0] ss:$8 sps:$4 sm:$0xff]   ;;  %v1761_v58 = vld [vmem:[%s2646_s0 + $0xc4] ss:$8 sps:$4 sm:$0xff]  }
  0x14   :  { %v1760_v57 = vld [vmem:[%s2646_s0 + $0x1b0] ss:$8 sps:$4 sm:$0xff]   ;;  %v1763_v59 = vld [vmem:[%s2646_s0 + $0x1c4] ss:$8 sps:$4 sm:$0xff]   ;;  %v1765_v60 = vld [vmem:[%s2646_s0 + $0xc0] ss:$8 sps:$4 sm:$0xff]  }
  0x15   :  { %v1766_v61 = vld [vmem:[%s2646_s0 + $0x1c0] ss:$8 sps:$4 sm:$0xff]   ;;  %v1767_v62 = vld [vmem:[%s2646_s0 + $0xd4] ss:$8 sps:$4 sm:$0xff]   ;;  %v1772_v1 = vld [vmem:[%s2646_s0 + $0x1d0] ss:$8 sps:$4 sm:$0xff]  }
  0x16   :  { %617 = vmatpush1.bf16.msra.mxu0 %v1685_v8  ;;  %1675 = vmatpush1.bf16.msra.mxu1 %v1685_v8  ;;  %v1769_v63 = vld [vmem:[%s2646_s0 + $0x1d4] ss:$8 sps:$4 sm:$0xff]   ;;  %v1773_v2 = vld [vmem:[%s2646_s0 + $0xe4] ss:$8 sps:$4 sm:$0xff]   ;;  %v1777_v4 = vld [vmem:[%s2646_s0 + $0xe0] ss:$8 sps:$4 sm:$0xff]  }
  0x17   :  { %618 = vmatprep.subr.bf16.mxu0 %v1787_v0  ;;  %1667 = vmatprep.subr.bf16.mxu1 %v1787_v0  ;;  %v1775_v3 = vld [vmem:[%s2646_s0 + $0x1e4] ss:$8 sps:$4 sm:$0xff]   ;;  %v1778_v5 = vld [vmem:[%s2646_s0 + $0x1e0] ss:$8 sps:$4 sm:$0xff]   ;;  %v1779_v6 = vld [vmem:[%s2646_s0 + $0xf4] ss:$8 sps:$4 sm:$0xff]  }
  0x18   :  { %v1781_v7 = vld [vmem:[%s2646_s0 + $0x1f4] ss:$8 sps:$4 sm:$0xff]   ;;  %v1783_v8 = vld [vmem:[%s2646_s0 + $0xf0] ss:$8 sps:$4 sm:$0xff]  }
  0x1a   :  { %619 = vmatpush1.bf16.msra.mxu0 %v1686_v9  ;;  %1676 = vmatpush1.bf16.msra.mxu1 %v1686_v9  ;;  %v1784_v9 = vld [vmem:[%s2646_s0 + $0x1f0] ss:$8 sps:$4 sm:$0xff]  }
  0x1b   :  { %620 = vmatprep.subr.bf16.mxu0 %v1787_v0  ;;  %1668 = vmatprep.subr.bf16.mxu1 %v1787_v0 }
  0x1e   :  { %621 = vmatpush1.bf16.msra.mxu0 %v1687_v10  ;;  %1677 = vmatpush1.bf16.msra.mxu1 %v1687_v10  ;;  %v103_v10 = vld [vmem:[%s2647_s2] sm:$0xff] }
  0x1f   :  { %622 = vmatprep.subr.bf16.mxu0 %v1787_v0  ;;  %1669 = vmatprep.subr.bf16.mxu1 %v1787_v0  ;;  %v1771_v0 = vld [vmem:[%s2646_s0 + $0xd0] ss:$8 sps:$4 sm:$0xff]  }
  0x22   :  { %623 = vmatpush1.bf16.msra.mxu0 %v1688_v11  ;;  %1678 = vmatpush1.bf16.msra.mxu1 %v1688_v11  ;;  %v135_v11 = vld [vmem:[%s2647_s2 + $0x100] sm:$0xff] }
  0x25   :  { %639 = vmatmul.mubr.bf16.vlgmr.msra.gmra.mrb[0].mxu0 %v1689_v12  ;;  %767 = vmatmul.mubr.bf16.vlgmr.msra.gmra.mrb[0].mxu1 %v1692_v13  ;;  %v2078_v13 = vld [vmem:[%s2648_s3] ss:$0 sm:$0xff] }
  0x26   :  { %1500 = vmatprep.mubr.msk.bf16.mxu0 %vm509_vm0, %v1695_v14  ;;  %1516 = vmatprep.mubr.msk.bf16.mxu1 %vm509_vm0, %v1697_v15  ;;  %v104_v15 = vld [vmem:[%s2647_s2 + $0x8] sm:$0xff] }
  0x2d   :  { %647 = vmatmul.mubr.bf16.gmra.mrb[4].mxu0 %v1699_v16  ;;  %775 = vmatmul.mubr.bf16.gmra.mrb[4].mxu1 %v1700_v17  ;;  %v136_v16 = vld [vmem:[%s2647_s2 + $0x108] sm:$0xff] }
  0x2e   :  { %1501 = vmatprep.mubr.msk.bf16.mxu0 %vm509_vm0, %v1701_v18  ;;  %1517 = vmatprep.mubr.msk.bf16.mxu1 %vm509_vm0, %v1703_v19 }
  0x35   :  { %655 = vmatmul.mubr.bf16.gmra.mrb[8].mxu0 %v1705_v20  ;;  %783 = vmatmul.mubr.bf16.gmra.mrb[8].mxu1 %v1706_v21  ;;  %v2089_v21 = vld [vmem:[%s2649_s4] ss:$0 sm:$0xff] }
  0x36   :  { %1502 = vmatprep.mubr.msk.bf16.mxu0 %vm509_vm0, %v1707_v22  ;;  %1518 = vmatprep.mubr.msk.bf16.mxu1 %vm509_vm0, %v1709_v23 }
  0x3d   :  { %663 = vmatmul.mubr.bf16.gmra.mrb[12].mxu0 %v1711_v24  ;;  %791 = vmatmul.mubr.bf16.gmra.mrb[12].mxu1 %v1712_v25 }
  0x3e   :  { %1503 = vmatprep.mubr.msk.bf16.mxu0 %vm509_vm0, %v1713_v26  ;;  %1519 = vmatprep.mubr.msk.bf16.mxu1 %vm509_vm0, %v1715_v27 }
  0x45   :  { %671 = vmatmul.mubr.bf16.gmra.mrb[16].mxu0 %v1717_v28  ;;  %799 = vmatmul.mubr.bf16.gmra.mrb[16].mxu1 %v1718_v29 }
  0x46   :  { %1504 = vmatprep.mubr.msk.bf16.mxu0 %vm509_vm0, %v1719_v30  ;;  %1520 = vmatprep.mubr.msk.bf16.mxu1 %vm509_vm0, %v1721_v31 }
  0x4d   :  { %679 = vmatmul.mubr.bf16.gmra.mrb[20].mxu0 %v1723_v32  ;;  %807 = vmatmul.mubr.bf16.gmra.mrb[20].mxu1 %v1724_v33 }
  0x4e   :  { %1505 = vmatprep.mubr.msk.bf16.mxu0 %vm509_vm0, %v1725_v34  ;;  %1521 = vmatprep.mubr.msk.bf16.mxu1 %vm509_vm0, %v1727_v35 }
  0x55   :  { %687 = vmatmul.mubr.bf16.gmra.mrb[24].mxu0 %v1729_v36  ;;  %815 = vmatmul.mubr.bf16.gmra.mrb[24].mxu1 %v1730_v37 }
  0x56   :  { %1506 = vmatprep.mubr.msk.bf16.mxu0 %vm509_vm0, %v1731_v38  ;;  %1522 = vmatprep.mubr.msk.bf16.mxu1 %vm509_vm0, %v1733_v39  ;;  %v105_v38 = vld [vmem:[%s2647_s2 + $0x10] sm:$0xff] }
  0x57   :  { %v137_v39 = vld [vmem:[%s2647_s2 + $0x110] sm:$0xff] }
  0x5d   :  { %695 = vmatmul.mubr.bf16.gmra.mrb[28].mxu0 %v1735_v40  ;;  %823 = vmatmul.mubr.bf16.gmra.mrb[28].mxu1 %v1736_v41 }
  0x5e   :  { %1507 = vmatprep.mubr.msk.bf16.mxu0 %vm509_vm0, %v1737_v42  ;;  %1523 = vmatprep.mubr.msk.bf16.mxu1 %vm509_vm0, %v1739_v43  ;;  %v106_v42 = vld [vmem:[%s2647_s2 + $0x18] sm:$0xff] }
  0x5f   :  { %v138_v43 = vld [vmem:[%s2647_s2 + $0x118] sm:$0xff] }
  0x65   :  { %703 = vmatmul.mubr.bf16.gmra.mrb[32].mxu0 %v1741_v44  ;;  %831 = vmatmul.mubr.bf16.gmra.mrb[32].mxu1 %v1742_v45 }
  0x66   :  { %1508 = vmatprep.mubr.msk.bf16.mxu0 %vm509_vm0, %v1743_v46  ;;  %1524 = vmatprep.mubr.msk.bf16.mxu1 %vm509_vm0, %v1745_v47 }
  0x6d   :  { %711 = vmatmul.mubr.bf16.gmra.mrb[36].mxu0 %v1747_v48  ;;  %839 = vmatmul.mubr.bf16.gmra.mrb[36].mxu1 %v1748_v49 }
  0x6e   :  { %1509 = vmatprep.mubr.msk.bf16.mxu0 %vm509_vm0, %v1749_v50  ;;  %1525 = vmatprep.mubr.msk.bf16.mxu1 %vm509_vm0, %v1751_v51 }
  0x75   :  { %719 = vmatmul.mubr.bf16.gmra.mrb[40].mxu0 %v1753_v52  ;;  %847 = vmatmul.mubr.bf16.gmra.mrb[40].mxu1 %v1754_v53 }
  0x76   :  { %1510 = vmatprep.mubr.msk.bf16.mxu0 %vm509_vm0, %v1755_v54  ;;  %1526 = vmatprep.mubr.msk.bf16.mxu1 %vm509_vm0, %v1757_v55 }
  0x7d   :  { %727 = vmatmul.mubr.bf16.gmra.mrb[44].mxu0 %v1759_v56  ;;  %855 = vmatmul.mubr.bf16.gmra.mrb[44].mxu1 %v1760_v57 }
  0x7e   :  { %1511 = vmatprep.mubr.msk.bf16.mxu0 %vm509_vm0, %v1761_v58  ;;  %1527 = vmatprep.mubr.msk.bf16.mxu1 %vm509_vm0, %v1763_v59 }
  0x85   :  { %735 = vmatmul.mubr.bf16.gmra.mrb[48].mxu0 %v1765_v60  ;;  %863 = vmatmul.mubr.bf16.gmra.mrb[48].mxu1 %v1766_v61 }
  0x86   :  { %1512 = vmatprep.mubr.msk.bf16.mxu0 %vm509_vm0, %v1767_v62  ;;  %1528 = vmatprep.mubr.msk.bf16.mxu1 %vm509_vm0, %v1769_v63 }
  0x8d   :  { %743 = vmatmul.mubr.bf16.gmra.mrb[52].mxu0 %v1771_v0  ;;  %871 = vmatmul.mubr.bf16.gmra.mrb[52].mxu1 %v1772_v1 }
  0x8e   :  { %1513 = vmatprep.mubr.msk.bf16.mxu0 %vm509_vm0, %v1773_v2  ;;  %1529 = vmatprep.mubr.msk.bf16.mxu1 %vm509_vm0, %v1775_v3  ;;  %v107_v2 = vld [vmem:[%s2647_s2 + $0x20] sm:$0xff] }
  0x8f   :  { %v139_v3 = vld [vmem:[%s2647_s2 + $0x120] sm:$0xff] }
  0x95   :  { %751 = vmatmul.mubr.bf16.gmra.mrb[56].mxu0 %v1777_v4  ;;  %879 = vmatmul.mubr.bf16.gmra.mrb[56].mxu1 %v1778_v5 }
  0x96   :  { %1514 = vmatprep.mubr.msk.bf16.mxu0 %vm509_vm0, %v1779_v6  ;;  %1530 = vmatprep.mubr.msk.bf16.mxu1 %vm509_vm0, %v1781_v7 }
  0x9d   :  { %759 = vmatmul.mubr.bf16.gmra.mrb[60].mxu0 %v1783_v8  ;;  %887 = vmatmul.mubr.bf16.gmra.mrb[60].mxu1 %v1784_v9 }
  0xf8   :  { %v640_v12 = vpop.f32.mrb[0].mxu0  ;;  %v768_v14 = vpop.f32.mrb[0].mxu1 }
  0xf9   :  { %v641_v17 = vadd.f32 %v640_v12, %v103_v10  ;;  %v769_v18 = vadd.f32 %v768_v14, %v135_v11  ;;  %v642_v19 = vpop.f32.mrb[1].mxu0  ;;  %v770_v20 = vpop.f32.mrb[1].mxu1 }
  0xfa   :  { %v643_v22 = vpop.f32.mrb[2].mxu0  ;;  %v771_v23 = vpop.f32.mrb[2].mxu1 }
  0xfb   :  { %v902_v24 = vmul.f32 %v2078_v13, %v641_v17  ;;  %v934_v25 = vmul.f32 %v2078_v13, %v769_v18  ;;  %v644_v26 = vadd.f32 %v643_v22, %v104_v15  ;;  %v772_v27 = vadd.f32 %v771_v23, %v136_v16  ;;  %v645_v28 = vpop.f32.mrb[3].mxu0  ;;  %v773_v29 = vpop.f32.mrb[3].mxu1  ;;  %v108_v17 = vld [vmem:[%s2647_s2 + $0x28] sm:$0xff] }
  0xfc   :  { %v140_v18 = vld [vmem:[%s2647_s2 + $0x128] sm:$0xff] }
  0xfd   :  { %v973_v30 = vadd.f32 %v2089_v21, %v902_v24  ;;  %v1005_v31 = vadd.f32 %v2089_v21, %v934_v25  ;;  %v903_v32 = vmul.f32 %v2078_v13, %v644_v26  ;;  %v935_v33 = vmul.f32 %v2078_v13, %v772_v27 }
  0xff   :  { %v1037_v34 = vmax.f32 %v973_v30, 0.0  ;;  %v1069_v35 = vmax.f32 %v1005_v31, 0.0  ;;  %v974_v36 = vadd.f32 %v2089_v21, %v903_v32  ;;  %v1006_v37 = vadd.f32 %v2089_v21, %v935_v33 }
 0x100   :  { %v648_v40 = vpop.f32.mrb[4].mxu0  ;;  %v776_v41 = vpop.f32.mrb[4].mxu1 }
 0x101   :  { %v1597_v44 = vpack.c.bf16 %v1037_v34, %v1037_v34  ;;  %v1629_v45 = vpack.c.bf16 %v1069_v35, %v1069_v35  ;;  %v1038_v46 = vmax.f32 %v974_v36, 0.0  ;;  %v1070_v47 = vmax.f32 %v1006_v37, 0.0  ;;  %v650_v48 = vpop.f32.mrb[5].mxu0  ;;  %v778_v49 = vpop.f32.mrb[5].mxu1  ;;  %v109_v36 = vld [vmem:[%s2647_s2 + $0x30] sm:$0xff] }
 0x102   :  { %v649_v50 = vadd.f32 %v648_v40, %v105_v38  ;;  %v777_v51 = vadd.f32 %v776_v41, %v137_v39  ;;  %v651_v52 = vpop.f32.mrb[6].mxu0  ;;  %v779_v53 = vpop.f32.mrb[6].mxu1  ;;  %v141_v37 = vld [vmem:[%s2647_s2 + $0x130] sm:$0xff] }
 0x103   :  { %1358 = vst.msk [vmem:[%s2650_s5] sm:$0xf] %vm1357_vm1, %v1597_v44  ;;  %1390 = vst.msk [vmem:[%s2650_s5 + $0x80] sm:$0xf] %vm1357_vm1, %v1629_v45  ;;  %v1598_v54 = vpack.c.bf16 %v1038_v46, %v1038_v46  ;;  %v1630_v55 = vpack.c.bf16 %v1070_v47, %v1070_v47  ;;  %v652_v56 = vadd.f32 %v651_v52, %v106_v42  ;;  %v653_v58 = vpop.f32.mrb[7].mxu0  ;;  %v781_v59 = vpop.f32.mrb[7].mxu1 }
 0x104   :  { %v780_v57 = vadd.f32 %v779_v53, %v138_v43  ;;  %v904_v60 = vmul.f32 %v2078_v13, %v649_v50  ;;  %v936_v61 = vmul.f32 %v2078_v13, %v777_v51  ;;  %v110_v44 = vld [vmem:[%s2647_s2 + $0x38] sm:$0xff] }
 0x105   :  { %1359 = vst.msk [vmem:[%s2650_s5 + $0x4] sm:$0xf] %vm1357_vm1, %v1598_v54  ;;  %1391 = vst.msk [vmem:[%s2650_s5 + $0x84] sm:$0xf] %vm1357_vm1, %v1630_v55  ;;  %v905_v62 = vmul.f32 %v2078_v13, %v652_v56  ;;  %v142_v45 = vld [vmem:[%s2647_s2 + $0x138] sm:$0xff] }
 0x106   :  { %v937_v63 = vmul.f32 %v2078_v13, %v780_v57  ;;  %v975_v0 = vadd.f32 %v2089_v21, %v904_v60  ;;  %v1007_v1 = vadd.f32 %v2089_v21, %v936_v61 }
 0x107   :  { %v976_v4 = vadd.f32 %v2089_v21, %v905_v62 }
 0x108   :  { %v1008_v5 = vadd.f32 %v2089_v21, %v937_v63  ;;  %v1039_v6 = vmax.f32 %v975_v0, 0.0  ;;  %v1071_v7 = vmax.f32 %v1007_v1, 0.0  ;;  %v656_v8 = vpop.f32.mrb[8].mxu0  ;;  %v784_v9 = vpop.f32.mrb[8].mxu1 }
 0x109   :  { %v1040_v10 = vmax.f32 %v976_v4, 0.0  ;;  %v657_v12 = vadd.f32 %v656_v8, %v107_v2  ;;  %v785_v14 = vadd.f32 %v784_v9, %v139_v3  ;;  %v658_v15 = vpop.f32.mrb[9].mxu0  ;;  %v786_v16 = vpop.f32.mrb[9].mxu1  ;;  %v111_v8 = vld [vmem:[%s2647_s2 + $0x40] sm:$0xff] }
 0x10a   :  { %v1072_v11 = vmax.f32 %v1008_v5, 0.0  ;;  %v1599_v19 = vpack.c.bf16 %v1039_v6, %v1039_v6  ;;  %v1631_v20 = vpack.c.bf16 %v1071_v7, %v1071_v7  ;;  %v659_v22 = vpop.f32.mrb[10].mxu0  ;;  %v787_v23 = vpop.f32.mrb[10].mxu1  ;;  %v143_v9 = vld [vmem:[%s2647_s2 + $0x140] sm:$0xff] }
 0x10b   :  { %v1600_v24 = vpack.c.bf16 %v1040_v10, %v1040_v10  ;;  %v906_v26 = vmul.f32 %v2078_v13, %v657_v12  ;;  %v938_v27 = vmul.f32 %v2078_v13, %v785_v14  ;;  %v661_v28 = vpop.f32.mrb[11].mxu0  ;;  %v789_v29 = vpop.f32.mrb[11].mxu1  ;;  %v660_v30 = vadd.f32 %v659_v22, %v108_v17  ;;  %v112_v12 = vld [vmem:[%s2647_s2 + $0x48] sm:$0xff] }
 0x10c   :  { %v1632_v25 = vpack.c.bf16 %v1072_v11, %v1072_v11  ;;  %1360 = vst.msk [vmem:[%s2650_s5 + $0x8] sm:$0xf] %vm1357_vm1, %v1599_v19  ;;  %1392 = vst.msk [vmem:[%s2650_s5 + $0x88] sm:$0xf] %vm1357_vm1, %v1631_v20  ;;  %v788_v31 = vadd.f32 %v787_v23, %v140_v18  ;;  %v144_v14 = vld [vmem:[%s2647_s2 + $0x148] sm:$0xff] }
 0x10d   :  { %1361 = vst.msk [vmem:[%s2650_s5 + $0xc] sm:$0xf] %vm1357_vm1, %v1600_v24  ;;  %v977_v32 = vadd.f32 %v2089_v21, %v906_v26  ;;  %v1009_v33 = vadd.f32 %v2089_v21, %v938_v27  ;;  %v907_v34 = vmul.f32 %v2078_v13, %v660_v30 }
 0x10e   :  { %1393 = vst.msk [vmem:[%s2650_s5 + $0x8c] sm:$0xf] %vm1357_vm1, %v1632_v25  ;;  %v939_v35 = vmul.f32 %v2078_v13, %v788_v31 }
 0x10f   :  { %v1041_v38 = vmax.f32 %v977_v32, 0.0  ;;  %v1073_v39 = vmax.f32 %v1009_v33, 0.0  ;;  %v978_v40 = vadd.f32 %v2089_v21, %v907_v34 }
 0x110   :  { %v1010_v41 = vadd.f32 %v2089_v21, %v939_v35  ;;  %v664_v42 = vpop.f32.mrb[12].mxu0  ;;  %v792_v43 = vpop.f32.mrb[12].mxu1 }
 0x111   :  { %v1601_v46 = vpack.c.bf16 %v1041_v38, %v1041_v38  ;;  %v1633_v47 = vpack.c.bf16 %v1073_v39, %v1073_v39  ;;  %v665_v48 = vadd.f32 %v664_v42, %v109_v36  ;;  %v793_v49 = vadd.f32 %v792_v43, %v141_v37  ;;  %v666_v50 = vpop.f32.mrb[13].mxu0  ;;  %v794_v51 = vpop.f32.mrb[13].mxu1  ;;  %v113_v38 = vld [vmem:[%s2647_s2 + $0x50] sm:$0xff] }
 0x112   :  { %v1042_v52 = vmax.f32 %v978_v40, 0.0  ;;  %v1074_v53 = vmax.f32 %v1010_v41, 0.0  ;;  %v667_v54 = vpop.f32.mrb[14].mxu0  ;;  %v795_v55 = vpop.f32.mrb[14].mxu1  ;;  %v145_v39 = vld [vmem:[%s2647_s2 + $0x150] sm:$0xff] }
 0x113   :  { %1362 = vst.msk [vmem:[%s2650_s5 + $0x10] sm:$0xf] %vm1357_vm1, %v1601_v46  ;;  %1394 = vst.msk [vmem:[%s2650_s5 + $0x90] sm:$0xf] %vm1357_vm1, %v1633_v47  ;;  %v908_v56 = vmul.f32 %v2078_v13, %v665_v48  ;;  %v940_v57 = vmul.f32 %v2078_v13, %v793_v49  ;;  %v668_v58 = vadd.f32 %v667_v54, %v110_v44  ;;  %v669_v60 = vpop.f32.mrb[15].mxu0  ;;  %v797_v61 = vpop.f32.mrb[15].mxu1 }
 0x114   :  { %v796_v59 = vadd.f32 %v795_v55, %v142_v45  ;;  %v1602_v62 = vpack.c.bf16 %v1042_v52, %v1042_v52  ;;  %v1634_v63 = vpack.c.bf16 %v1074_v53, %v1074_v53  ;;  %v114_v52 = vld [vmem:[%s2647_s2 + $0x58] sm:$0xff] }
 0x115   :  { %v979_v0 = vadd.f32 %v2089_v21, %v908_v56  ;;  %v1011_v1 = vadd.f32 %v2089_v21, %v940_v57  ;;  %v909_v2 = vmul.f32 %v2078_v13, %v668_v58  ;;  %v146_v53 = vld [vmem:[%s2647_s2 + $0x158] sm:$0xff] }
 0x116   :  { %v941_v3 = vmul.f32 %v2078_v13, %v796_v59  ;;  %1363 = vst.msk [vmem:[%s2650_s5 + $0x14] sm:$0xf] %vm1357_vm1, %v1602_v62  ;;  %1395 = vst.msk [vmem:[%s2650_s5 + $0x94] sm:$0xf] %vm1357_vm1, %v1634_v63 }
 0x117   :  { %v1043_v4 = vmax.f32 %v979_v0, 0.0  ;;  %v1075_v5 = vmax.f32 %v1011_v1, 0.0  ;;  %v980_v6 = vadd.f32 %v2089_v21, %v909_v2 }
 0x118   :  { %v1012_v7 = vadd.f32 %v2089_v21, %v941_v3  ;;  %v672_v10 = vpop.f32.mrb[16].mxu0  ;;  %v800_v11 = vpop.f32.mrb[16].mxu1 }
 0x119   :  { %v1603_v15 = vpack.c.bf16 %v1043_v4, %v1043_v4  ;;  %v1635_v16 = vpack.c.bf16 %v1075_v5, %v1075_v5  ;;  %v1044_v17 = vmax.f32 %v980_v6, 0.0  ;;  %v674_v19 = vpop.f32.mrb[17].mxu0  ;;  %v802_v20 = vpop.f32.mrb[17].mxu1  ;;  %v673_v22 = vadd.f32 %v672_v10, %v111_v8  ;;  %v115_v6 = vld [vmem:[%s2647_s2 + $0x60] sm:$0xff] }
 0x11a   :  { %v1076_v18 = vmax.f32 %v1012_v7, 0.0  ;;  %v801_v23 = vadd.f32 %v800_v11, %v143_v9  ;;  %v675_v24 = vpop.f32.mrb[18].mxu0  ;;  %v803_v25 = vpop.f32.mrb[18].mxu1  ;;  %v147_v7 = vld [vmem:[%s2647_s2 + $0x160] sm:$0xff] }
 0x11b   :  { %1364 = vst.msk [vmem:[%s2650_s5 + $0x18] sm:$0xf] %vm1357_vm1, %v1603_v15  ;;  %1396 = vst.msk [vmem:[%s2650_s5 + $0x98] sm:$0xf] %vm1357_vm1, %v1635_v16  ;;  %v1604_v26 = vpack.c.bf16 %v1044_v17, %v1044_v17  ;;  %v676_v28 = vadd.f32 %v675_v24, %v112_v12  ;;  %v804_v29 = vadd.f32 %v803_v25, %v144_v14  ;;  %v677_v30 = vpop.f32.mrb[19].mxu0  ;;  %v805_v31 = vpop.f32.mrb[19].mxu1 }
 0x11c   :  { %v1636_v27 = vpack.c.bf16 %v1076_v18, %v1076_v18  ;;  %v910_v32 = vmul.f32 %v2078_v13, %v673_v22  ;;  %v942_v33 = vmul.f32 %v2078_v13, %v801_v23  ;;  %v116_v15 = vld [vmem:[%s2647_s2 + $0x68] sm:$0xff] }
 0x11d   :  { %1365 = vst.msk [vmem:[%s2650_s5 + $0x1c] sm:$0xf] %vm1357_vm1, %v1604_v26  ;;  %v911_v34 = vmul.f32 %v2078_v13, %v676_v28  ;;  %v943_v35 = vmul.f32 %v2078_v13, %v804_v29  ;;  %v148_v16 = vld [vmem:[%s2647_s2 + $0x168] sm:$0xff] }
 0x11e   :  { %1397 = vst.msk [vmem:[%s2650_s5 + $0x9c] sm:$0xf] %vm1357_vm1, %v1636_v27  ;;  %v981_v36 = vadd.f32 %v2089_v21, %v910_v32  ;;  %v1013_v37 = vadd.f32 %v2089_v21, %v942_v33 }
 0x11f   :  { %v982_v40 = vadd.f32 %v2089_v21, %v911_v34  ;;  %v1014_v41 = vadd.f32 %v2089_v21, %v943_v35 }
 0x120   :  { %v1045_v42 = vmax.f32 %v981_v36, 0.0  ;;  %v1077_v43 = vmax.f32 %v1013_v37, 0.0  ;;  %v680_v44 = vpop.f32.mrb[20].mxu0  ;;  %v808_v45 = vpop.f32.mrb[20].mxu1 }
 0x121   :  { %v1046_v46 = vmax.f32 %v982_v40, 0.0  ;;  %v1078_v47 = vmax.f32 %v1014_v41, 0.0  ;;  %v681_v48 = vadd.f32 %v680_v44, %v113_v38  ;;  %v809_v49 = vadd.f32 %v808_v45, %v145_v39  ;;  %v682_v50 = vpop.f32.mrb[21].mxu0  ;;  %v810_v51 = vpop.f32.mrb[21].mxu1  ;;  %v117_v44 = vld [vmem:[%s2647_s2 + $0x70] sm:$0xff] }
 0x122   :  { %v1605_v54 = vpack.c.bf16 %v1045_v42, %v1045_v42  ;;  %v1637_v55 = vpack.c.bf16 %v1077_v43, %v1077_v43  ;;  %v683_v56 = vpop.f32.mrb[22].mxu0  ;;  %v811_v57 = vpop.f32.mrb[22].mxu1  ;;  %v149_v45 = vld [vmem:[%s2647_s2 + $0x170] sm:$0xff] }
 0x123   :  { %v1606_v58 = vpack.c.bf16 %v1046_v46, %v1046_v46  ;;  %v1638_v59 = vpack.c.bf16 %v1078_v47, %v1078_v47  ;;  %v912_v60 = vmul.f32 %v2078_v13, %v681_v48  ;;  %v944_v61 = vmul.f32 %v2078_v13, %v809_v49  ;;  %v685_v62 = vpop.f32.mrb[23].mxu0  ;;  %v813_v63 = vpop.f32.mrb[23].mxu1  ;;  %v118_v48 = vld [vmem:[%s2647_s2 + $0x78] sm:$0xff] }
 0x124   :  { %1366 = vst.msk [vmem:[%s2650_s5 + $0x20] sm:$0xf] %vm1357_vm1, %v1605_v54  ;;  %1398 = vst.msk [vmem:[%s2650_s5 + $0xa0] sm:$0xf] %vm1357_vm1, %v1637_v55  ;;  %v684_v0 = vadd.f32 %v683_v56, %v114_v52  ;;  %v812_v1 = vadd.f32 %v811_v57, %v146_v53  ;;  %v150_v49 = vld [vmem:[%s2647_s2 + $0x178] sm:$0xff] }
 0x125   :  { %1367 = vst.msk [vmem:[%s2650_s5 + $0x24] sm:$0xf] %vm1357_vm1, %v1606_v58  ;;  %1399 = vst.msk [vmem:[%s2650_s5 + $0xa4] sm:$0xf] %vm1357_vm1, %v1638_v59  ;;  %v983_v2 = vadd.f32 %v2089_v21, %v912_v60  ;;  %v1015_v3 = vadd.f32 %v2089_v21, %v944_v61 }
 0x126   :  { %v913_v4 = vmul.f32 %v2078_v13, %v684_v0  ;;  %v945_v5 = vmul.f32 %v2078_v13, %v812_v1 }
 0x127   :  { %v1047_v8 = vmax.f32 %v983_v2, 0.0  ;;  %v1079_v9 = vmax.f32 %v1015_v3, 0.0 }
 0x128   :  { %v984_v10 = vadd.f32 %v2089_v21, %v913_v4  ;;  %v1016_v11 = vadd.f32 %v2089_v21, %v945_v5  ;;  %v688_v12 = vpop.f32.mrb[24].mxu0  ;;  %v816_v14 = vpop.f32.mrb[24].mxu1 }
 0x129   :  { %v1607_v17 = vpack.c.bf16 %v1047_v8, %v1047_v8  ;;  %v1639_v18 = vpack.c.bf16 %v1079_v9, %v1079_v9  ;;  %v689_v19 = vadd.f32 %v688_v12, %v115_v6  ;;  %v817_v20 = vadd.f32 %v816_v14, %v147_v7  ;;  %v690_v22 = vpop.f32.mrb[25].mxu0  ;;  %v818_v23 = vpop.f32.mrb[25].mxu1  ;;  %v119_v8 = vld [vmem:[%s2647_s2 + $0x80] sm:$0xff] }
 0x12a   :  { %v1048_v24 = vmax.f32 %v984_v10, 0.0  ;;  %v1080_v25 = vmax.f32 %v1016_v11, 0.0  ;;  %v691_v26 = vpop.f32.mrb[26].mxu0  ;;  %v819_v27 = vpop.f32.mrb[26].mxu1  ;;  %v151_v9 = vld [vmem:[%s2647_s2 + $0x180] sm:$0xff] }
 0x12b   :  { %1368 = vst.msk [vmem:[%s2650_s5 + $0x28] sm:$0xf] %vm1357_vm1, %v1607_v17  ;;  %1400 = vst.msk [vmem:[%s2650_s5 + $0xa8] sm:$0xf] %vm1357_vm1, %v1639_v18  ;;  %v914_v28 = vmul.f32 %v2078_v13, %v689_v19  ;;  %v946_v29 = vmul.f32 %v2078_v13, %v817_v20  ;;  %v692_v30 = vadd.f32 %v691_v26, %v116_v15  ;;  %v693_v32 = vpop.f32.mrb[27].mxu0  ;;  %v821_v33 = vpop.f32.mrb[27].mxu1 }
 0x12c   :  { %v820_v31 = vadd.f32 %v819_v27, %v148_v16  ;;  %v1608_v34 = vpack.c.bf16 %v1048_v24, %v1048_v24  ;;  %v1640_v35 = vpack.c.bf16 %v1080_v25, %v1080_v25  ;;  %v120_v24 = vld [vmem:[%s2647_s2 + $0x88] sm:$0xff] }
 0x12d   :  { %v985_v36 = vadd.f32 %v2089_v21, %v914_v28  ;;  %v1017_v37 = vadd.f32 %v2089_v21, %v946_v29  ;;  %v915_v38 = vmul.f32 %v2078_v13, %v692_v30  ;;  %v152_v25 = vld [vmem:[%s2647_s2 + $0x188] sm:$0xff] }
 0x12e   :  { %v947_v39 = vmul.f32 %v2078_v13, %v820_v31  ;;  %1369 = vst.msk [vmem:[%s2650_s5 + $0x2c] sm:$0xf] %vm1357_vm1, %v1608_v34  ;;  %1401 = vst.msk [vmem:[%s2650_s5 + $0xac] sm:$0xf] %vm1357_vm1, %v1640_v35 }
 0x12f   :  { %v1049_v40 = vmax.f32 %v985_v36, 0.0  ;;  %v1081_v41 = vmax.f32 %v1017_v37, 0.0  ;;  %v986_v42 = vadd.f32 %v2089_v21, %v915_v38 }
 0x130   :  { %v1018_v43 = vadd.f32 %v2089_v21, %v947_v39  ;;  %v696_v46 = vpop.f32.mrb[28].mxu0  ;;  %v824_v47 = vpop.f32.mrb[28].mxu1 }
 0x131   :  { %v1609_v50 = vpack.c.bf16 %v1049_v40, %v1049_v40  ;;  %v1641_v51 = vpack.c.bf16 %v1081_v41, %v1081_v41  ;;  %v1050_v52 = vmax.f32 %v986_v42, 0.0  ;;  %v698_v54 = vpop.f32.mrb[29].mxu0  ;;  %v826_v55 = vpop.f32.mrb[29].mxu1  ;;  %v697_v56 = vadd.f32 %v696_v46, %v117_v44  ;;  %v121_v42 = vld [vmem:[%s2647_s2 + $0x90] sm:$0xff] }
 0x132   :  { %v1082_v53 = vmax.f32 %v1018_v43, 0.0  ;;  %v825_v57 = vadd.f32 %v824_v47, %v149_v45  ;;  %v699_v58 = vpop.f32.mrb[30].mxu0  ;;  %v827_v59 = vpop.f32.mrb[30].mxu1  ;;  %v153_v43 = vld [vmem:[%s2647_s2 + $0x190] sm:$0xff] }
 0x133   :  { %1370 = vst.msk [vmem:[%s2650_s5 + $0x30] sm:$0xf] %vm1357_vm1, %v1609_v50  ;;  %1402 = vst.msk [vmem:[%s2650_s5 + $0xb0] sm:$0xf] %vm1357_vm1, %v1641_v51  ;;  %v1610_v60 = vpack.c.bf16 %v1050_v52, %v1050_v52  ;;  %v700_v62 = vadd.f32 %v699_v58, %v118_v48  ;;  %v828_v63 = vadd.f32 %v827_v59, %v150_v49  ;;  %v701_v0 = vpop.f32.mrb[31].mxu0  ;;  %v829_v1 = vpop.f32.mrb[31].mxu1 }
 0x134   :  { %v1642_v61 = vpack.c.bf16 %v1082_v53, %v1082_v53  ;;  %v916_v2 = vmul.f32 %v2078_v13, %v697_v56  ;;  %v948_v3 = vmul.f32 %v2078_v13, %v825_v57  ;;  %v122_v50 = vld [vmem:[%s2647_s2 + $0x98] sm:$0xff] }
 0x135   :  { %1371 = vst.msk [vmem:[%s2650_s5 + $0x34] sm:$0xf] %vm1357_vm1, %v1610_v60  ;;  %v917_v4 = vmul.f32 %v2078_v13, %v700_v62  ;;  %v949_v5 = vmul.f32 %v2078_v13, %v828_v63  ;;  %v154_v51 = vld [vmem:[%s2647_s2 + $0x198] sm:$0xff] }
 0x136   :  { %1403 = vst.msk [vmem:[%s2650_s5 + $0xb4] sm:$0xf] %vm1357_vm1, %v1642_v61  ;;  %v987_v6 = vadd.f32 %v2089_v21, %v916_v2  ;;  %v1019_v7 = vadd.f32 %v2089_v21, %v948_v3 }
 0x137   :  { %v988_v10 = vadd.f32 %v2089_v21, %v917_v4  ;;  %v1020_v11 = vadd.f32 %v2089_v21, %v949_v5 }
 0x138   :  { %v1051_v12 = vmax.f32 %v987_v6, 0.0  ;;  %v1083_v14 = vmax.f32 %v1019_v7, 0.0  ;;  %v704_v15 = vpop.f32.mrb[32].mxu0  ;;  %v832_v16 = vpop.f32.mrb[32].mxu1 }
 0x139   :  { %v1052_v17 = vmax.f32 %v988_v10, 0.0  ;;  %v1084_v18 = vmax.f32 %v1020_v11, 0.0  ;;  %v705_v19 = vadd.f32 %v704_v15, %v119_v8  ;;  %v833_v20 = vadd.f32 %v832_v16, %v151_v9  ;;  %v706_v22 = vpop.f32.mrb[33].mxu0  ;;  %v834_v23 = vpop.f32.mrb[33].mxu1  ;;  %v123_v15 = vld [vmem:[%s2647_s2 + $0xa0] sm:$0xff] }
 0x13a   :  { %v1611_v26 = vpack.c.bf16 %v1051_v12, %v1051_v12  ;;  %v1643_v27 = vpack.c.bf16 %v1083_v14, %v1083_v14  ;;  %v707_v28 = vpop.f32.mrb[34].mxu0  ;;  %v835_v29 = vpop.f32.mrb[34].mxu1  ;;  %v155_v16 = vld [vmem:[%s2647_s2 + $0x1a0] sm:$0xff] }
 0x13b   :  { %v1612_v30 = vpack.c.bf16 %v1052_v17, %v1052_v17  ;;  %v1644_v31 = vpack.c.bf16 %v1084_v18, %v1084_v18  ;;  %v918_v32 = vmul.f32 %v2078_v13, %v705_v19  ;;  %v950_v33 = vmul.f32 %v2078_v13, %v833_v20  ;;  %v709_v34 = vpop.f32.mrb[35].mxu0  ;;  %v837_v35 = vpop.f32.mrb[35].mxu1  ;;  %v124_v19 = vld [vmem:[%s2647_s2 + $0xa8] sm:$0xff] }
 0x13c   :  { %1372 = vst.msk [vmem:[%s2650_s5 + $0x38] sm:$0xf] %vm1357_vm1, %v1611_v26  ;;  %1404 = vst.msk [vmem:[%s2650_s5 + $0xb8] sm:$0xf] %vm1357_vm1, %v1643_v27  ;;  %v708_v36 = vadd.f32 %v707_v28, %v120_v24  ;;  %v836_v37 = vadd.f32 %v835_v29, %v152_v25  ;;  %v156_v20 = vld [vmem:[%s2647_s2 + $0x1a8] sm:$0xff] }
 0x13d   :  { %1373 = vst.msk [vmem:[%s2650_s5 + $0x3c] sm:$0xf] %vm1357_vm1, %v1612_v30  ;;  %1405 = vst.msk [vmem:[%s2650_s5 + $0xbc] sm:$0xf] %vm1357_vm1, %v1644_v31  ;;  %v989_v38 = vadd.f32 %v2089_v21, %v918_v32  ;;  %v1021_v39 = vadd.f32 %v2089_v21, %v950_v33 }
 0x13e   :  { %v919_v40 = vmul.f32 %v2078_v13, %v708_v36  ;;  %v951_v41 = vmul.f32 %v2078_v13, %v836_v37 }
 0x13f   :  { %v1053_v44 = vmax.f32 %v989_v38, 0.0  ;;  %v1085_v45 = vmax.f32 %v1021_v39, 0.0 }
 0x140   :  { %v990_v46 = vadd.f32 %v2089_v21, %v919_v40  ;;  %v1022_v47 = vadd.f32 %v2089_v21, %v951_v41  ;;  %v712_v48 = vpop.f32.mrb[36].mxu0  ;;  %v840_v49 = vpop.f32.mrb[36].mxu1 }
 0x141   :  { %v1613_v52 = vpack.c.bf16 %v1053_v44, %v1053_v44  ;;  %v1645_v53 = vpack.c.bf16 %v1085_v45, %v1085_v45  ;;  %v713_v54 = vadd.f32 %v712_v48, %v121_v42  ;;  %v841_v55 = vadd.f32 %v840_v49, %v153_v43  ;;  %v714_v56 = vpop.f32.mrb[37].mxu0  ;;  %v842_v57 = vpop.f32.mrb[37].mxu1  ;;  %v125_v44 = vld [vmem:[%s2647_s2 + $0xb0] sm:$0xff] }
 0x142   :  { %v1054_v58 = vmax.f32 %v990_v46, 0.0  ;;  %v1086_v59 = vmax.f32 %v1022_v47, 0.0  ;;  %v715_v60 = vpop.f32.mrb[38].mxu0  ;;  %v843_v61 = vpop.f32.mrb[38].mxu1  ;;  %v157_v45 = vld [vmem:[%s2647_s2 + $0x1b0] sm:$0xff] }
 0x143   :  { %1374 = vst.msk [vmem:[%s2650_s5 + $0x40] sm:$0xf] %vm1357_vm1, %v1613_v52  ;;  %1406 = vst.msk [vmem:[%s2650_s5 + $0xc0] sm:$0xf] %vm1357_vm1, %v1645_v53  ;;  %v920_v62 = vmul.f32 %v2078_v13, %v713_v54  ;;  %v952_v63 = vmul.f32 %v2078_v13, %v841_v55  ;;  %v716_v0 = vadd.f32 %v715_v60, %v122_v50  ;;  %v717_v2 = vpop.f32.mrb[39].mxu0  ;;  %v845_v3 = vpop.f32.mrb[39].mxu1 }
 0x144   :  { %v844_v1 = vadd.f32 %v843_v61, %v154_v51  ;;  %v1614_v4 = vpack.c.bf16 %v1054_v58, %v1054_v58  ;;  %v1646_v5 = vpack.c.bf16 %v1086_v59, %v1086_v59  ;;  %v126_v58 = vld [vmem:[%s2647_s2 + $0xb8] sm:$0xff] }
 0x145   :  { %v991_v6 = vadd.f32 %v2089_v21, %v920_v62  ;;  %v1023_v7 = vadd.f32 %v2089_v21, %v952_v63  ;;  %v921_v8 = vmul.f32 %v2078_v13, %v716_v0  ;;  %v158_v59 = vld [vmem:[%s2647_s2 + $0x1b8] sm:$0xff] }
 0x146   :  { %v953_v9 = vmul.f32 %v2078_v13, %v844_v1  ;;  %1375 = vst.msk [vmem:[%s2650_s5 + $0x44] sm:$0xf] %vm1357_vm1, %v1614_v4  ;;  %1407 = vst.msk [vmem:[%s2650_s5 + $0xc4] sm:$0xf] %vm1357_vm1, %v1646_v5 }
 0x147   :  { %v1055_v10 = vmax.f32 %v991_v6, 0.0  ;;  %v1087_v11 = vmax.f32 %v1023_v7, 0.0  ;;  %v992_v12 = vadd.f32 %v2089_v21, %v921_v8 }
 0x148   :  { %v1024_v14 = vadd.f32 %v2089_v21, %v953_v9  ;;  %v720_v17 = vpop.f32.mrb[40].mxu0  ;;  %v848_v18 = vpop.f32.mrb[40].mxu1 }
 0x149   :  { %v1615_v22 = vpack.c.bf16 %v1055_v10, %v1055_v10  ;;  %v1647_v23 = vpack.c.bf16 %v1087_v11, %v1087_v11  ;;  %v1056_v24 = vmax.f32 %v992_v12, 0.0  ;;  %v722_v26 = vpop.f32.mrb[41].mxu0  ;;  %v850_v27 = vpop.f32.mrb[41].mxu1  ;;  %v721_v28 = vadd.f32 %v720_v17, %v123_v15  ;;  %v127_v12 = vld [vmem:[%s2647_s2 + $0xc0] sm:$0xff] }
 0x14a   :  { %v1088_v25 = vmax.f32 %v1024_v14, 0.0  ;;  %v849_v29 = vadd.f32 %v848_v18, %v155_v16  ;;  %v723_v30 = vpop.f32.mrb[42].mxu0  ;;  %v851_v31 = vpop.f32.mrb[42].mxu1  ;;  %v159_v14 = vld [vmem:[%s2647_s2 + $0x1c0] sm:$0xff] }
 0x14b   :  { %1376 = vst.msk [vmem:[%s2650_s5 + $0x48] sm:$0xf] %vm1357_vm1, %v1615_v22  ;;  %1408 = vst.msk [vmem:[%s2650_s5 + $0xc8] sm:$0xf] %vm1357_vm1, %v1647_v23  ;;  %v1616_v32 = vpack.c.bf16 %v1056_v24, %v1056_v24  ;;  %v724_v34 = vadd.f32 %v723_v30, %v124_v19  ;;  %v852_v35 = vadd.f32 %v851_v31, %v156_v20  ;;  %v725_v36 = vpop.f32.mrb[43].mxu0  ;;  %v853_v37 = vpop.f32.mrb[43].mxu1 }
 0x14c   :  { %v1648_v33 = vpack.c.bf16 %v1088_v25, %v1088_v25  ;;  %v922_v38 = vmul.f32 %v2078_v13, %v721_v28  ;;  %v954_v39 = vmul.f32 %v2078_v13, %v849_v29  ;;  %v128_v22 = vld [vmem:[%s2647_s2 + $0xc8] sm:$0xff] }
 0x14d   :  { %1377 = vst.msk [vmem:[%s2650_s5 + $0x4c] sm:$0xf] %vm1357_vm1, %v1616_v32  ;;  %v923_v40 = vmul.f32 %v2078_v13, %v724_v34  ;;  %v955_v41 = vmul.f32 %v2078_v13, %v852_v35  ;;  %v160_v23 = vld [vmem:[%s2647_s2 + $0x1c8] sm:$0xff] }
 0x14e   :  { %1409 = vst.msk [vmem:[%s2650_s5 + $0xcc] sm:$0xf] %vm1357_vm1, %v1648_v33  ;;  %v993_v42 = vadd.f32 %v2089_v21, %v922_v38  ;;  %v1025_v43 = vadd.f32 %v2089_v21, %v954_v39 }
 0x14f   :  { %v994_v46 = vadd.f32 %v2089_v21, %v923_v40  ;;  %v1026_v47 = vadd.f32 %v2089_v21, %v955_v41 }
 0x150   :  { %v1057_v48 = vmax.f32 %v993_v42, 0.0  ;;  %v1089_v49 = vmax.f32 %v1025_v43, 0.0  ;;  %v728_v50 = vpop.f32.mrb[44].mxu0  ;;  %v856_v51 = vpop.f32.mrb[44].mxu1 }
 0x151   :  { %v1058_v52 = vmax.f32 %v994_v46, 0.0  ;;  %v1090_v53 = vmax.f32 %v1026_v47, 0.0  ;;  %v729_v54 = vadd.f32 %v728_v50, %v125_v44  ;;  %v857_v55 = vadd.f32 %v856_v51, %v157_v45  ;;  %v730_v56 = vpop.f32.mrb[45].mxu0  ;;  %v858_v57 = vpop.f32.mrb[45].mxu1  ;;  %v129_v50 = vld [vmem:[%s2647_s2 + $0xd0] sm:$0xff] }
 0x152   :  { %v1617_v60 = vpack.c.bf16 %v1057_v48, %v1057_v48  ;;  %v1649_v61 = vpack.c.bf16 %v1089_v49, %v1089_v49  ;;  %v731_v62 = vpop.f32.mrb[46].mxu0  ;;  %v859_v63 = vpop.f32.mrb[46].mxu1  ;;  %v161_v51 = vld [vmem:[%s2647_s2 + $0x1d0] sm:$0xff] }
 0x153   :  { %v1618_v0 = vpack.c.bf16 %v1058_v52, %v1058_v52  ;;  %v1650_v1 = vpack.c.bf16 %v1090_v53, %v1090_v53  ;;  %v924_v2 = vmul.f32 %v2078_v13, %v729_v54  ;;  %v956_v3 = vmul.f32 %v2078_v13, %v857_v55  ;;  %v733_v4 = vpop.f32.mrb[47].mxu0  ;;  %v861_v5 = vpop.f32.mrb[47].mxu1  ;;  %v130_v54 = vld [vmem:[%s2647_s2 + $0xd8] sm:$0xff] }
 0x154   :  { %1378 = vst.msk [vmem:[%s2650_s5 + $0x50] sm:$0xf] %vm1357_vm1, %v1617_v60  ;;  %1410 = vst.msk [vmem:[%s2650_s5 + $0xd0] sm:$0xf] %vm1357_vm1, %v1649_v61  ;;  %v732_v6 = vadd.f32 %v731_v62, %v126_v58  ;;  %v860_v7 = vadd.f32 %v859_v63, %v158_v59  ;;  %v162_v55 = vld [vmem:[%s2647_s2 + $0x1d8] sm:$0xff] }
 0x155   :  { %1379 = vst.msk [vmem:[%s2650_s5 + $0x54] sm:$0xf] %vm1357_vm1, %v1618_v0  ;;  %1411 = vst.msk [vmem:[%s2650_s5 + $0xd4] sm:$0xf] %vm1357_vm1, %v1650_v1  ;;  %v995_v8 = vadd.f32 %v2089_v21, %v924_v2  ;;  %v1027_v9 = vadd.f32 %v2089_v21, %v956_v3 }
 0x156   :  { %v925_v10 = vmul.f32 %v2078_v13, %v732_v6  ;;  %v957_v11 = vmul.f32 %v2078_v13, %v860_v7 }
 0x157   :  { %v1059_v15 = vmax.f32 %v995_v8, 0.0  ;;  %v1091_v16 = vmax.f32 %v1027_v9, 0.0 }
 0x158   :  { %v996_v17 = vadd.f32 %v2089_v21, %v925_v10  ;;  %v1028_v18 = vadd.f32 %v2089_v21, %v957_v11  ;;  %v736_v19 = vpop.f32.mrb[48].mxu0  ;;  %v864_v20 = vpop.f32.mrb[48].mxu1 }
 0x159   :  { %v1619_v24 = vpack.c.bf16 %v1059_v15, %v1059_v15  ;;  %v1651_v25 = vpack.c.bf16 %v1091_v16, %v1091_v16  ;;  %v737_v26 = vadd.f32 %v736_v19, %v127_v12  ;;  %v865_v27 = vadd.f32 %v864_v20, %v159_v14  ;;  %v738_v28 = vpop.f32.mrb[49].mxu0  ;;  %v866_v29 = vpop.f32.mrb[49].mxu1  ;;  %v131_v15 = vld [vmem:[%s2647_s2 + $0xe0] sm:$0xff] }
 0x15a   :  { %v1060_v30 = vmax.f32 %v996_v17, 0.0  ;;  %v1092_v31 = vmax.f32 %v1028_v18, 0.0  ;;  %v739_v32 = vpop.f32.mrb[50].mxu0  ;;  %v867_v33 = vpop.f32.mrb[50].mxu1  ;;  %v163_v16 = vld [vmem:[%s2647_s2 + $0x1e0] sm:$0xff]  ;;  %v132_v29 = vld [vmem:[%s2647_s2 + $0xe8] sm:$0xff] }
 0x15b   :  { %1380 = vst.msk [vmem:[%s2650_s5 + $0x58] sm:$0xf] %vm1357_vm1, %v1619_v24  ;;  %1412 = vst.msk [vmem:[%s2650_s5 + $0xd8] sm:$0xf] %vm1357_vm1, %v1651_v25  ;;  %v926_v34 = vmul.f32 %v2078_v13, %v737_v26  ;;  %v958_v35 = vmul.f32 %v2078_v13, %v865_v27  ;;  %v740_v36 = vadd.f32 %v739_v32, %v128_v22  ;;  %v741_v38 = vpop.f32.mrb[51].mxu0  ;;  %v869_v39 = vpop.f32.mrb[51].mxu1 }
 0x15c   :  { %v868_v37 = vadd.f32 %v867_v33, %v160_v23  ;;  %v1620_v40 = vpack.c.bf16 %v1060_v30, %v1060_v30  ;;  %v1652_v41 = vpack.c.bf16 %v1092_v31, %v1092_v31  ;;  %v164_v30 = vld [vmem:[%s2647_s2 + $0x1e8] sm:$0xff] }
 0x15d   :  { %v997_v42 = vadd.f32 %v2089_v21, %v926_v34  ;;  %v1029_v43 = vadd.f32 %v2089_v21, %v958_v35  ;;  %v927_v44 = vmul.f32 %v2078_v13, %v740_v36  ;;  %v1785_v36 = vld [vmem:[%s2648_s3] ss:$0 sm:$0xff] }
 0x15e   :  { %v959_v45 = vmul.f32 %v2078_v13, %v868_v37  ;;  %1381 = vst.msk [vmem:[%s2650_s5 + $0x5c] sm:$0xf] %vm1357_vm1, %v1620_v40  ;;  %1413 = vst.msk [vmem:[%s2650_s5 + $0xdc] sm:$0xf] %vm1357_vm1, %v1652_v41 }
 0x15f   :  { %v1061_v46 = vmax.f32 %v997_v42, 0.0  ;;  %v1093_v47 = vmax.f32 %v1029_v43, 0.0  ;;  %v998_v48 = vadd.f32 %v2089_v21, %v927_v44  ;;  %v1786_v43 = vld [vmem:[%s2649_s4] ss:$0 sm:$0xff] }
 0x160   :  { %v1030_v49 = vadd.f32 %v2089_v21, %v959_v45  ;;  %v744_v52 = vpop.f32.mrb[52].mxu0  ;;  %v872_v53 = vpop.f32.mrb[52].mxu1 }
 0x161   :  { %v1621_v56 = vpack.c.bf16 %v1061_v46, %v1061_v46  ;;  %v1653_v57 = vpack.c.bf16 %v1093_v47, %v1093_v47  ;;  %v1062_v58 = vmax.f32 %v998_v48, 0.0  ;;  %v746_v60 = vpop.f32.mrb[53].mxu0  ;;  %v874_v61 = vpop.f32.mrb[53].mxu1  ;;  %v745_v62 = vadd.f32 %v744_v52, %v129_v50  ;;  %v133_v48 = vld [vmem:[%s2647_s2 + $0xf0] sm:$0xff] }
 0x162   :  { %v1094_v59 = vmax.f32 %v1030_v49, 0.0  ;;  %v873_v63 = vadd.f32 %v872_v53, %v161_v51  ;;  %v747_v0 = vpop.f32.mrb[54].mxu0  ;;  %v875_v1 = vpop.f32.mrb[54].mxu1  ;;  %v165_v49 = vld [vmem:[%s2647_s2 + $0x1f0] sm:$0xff] }
 0x163   :  { %1382 = vst.msk [vmem:[%s2650_s5 + $0x60] sm:$0xf] %vm1357_vm1, %v1621_v56  ;;  %1414 = vst.msk [vmem:[%s2650_s5 + $0xe0] sm:$0xf] %vm1357_vm1, %v1653_v57  ;;  %v1622_v2 = vpack.c.bf16 %v1062_v58, %v1062_v58  ;;  %v748_v4 = vadd.f32 %v747_v0, %v130_v54  ;;  %v876_v5 = vadd.f32 %v875_v1, %v162_v55  ;;  %v749_v6 = vpop.f32.mrb[55].mxu0  ;;  %v877_v7 = vpop.f32.mrb[55].mxu1 }
 0x164   :  { %v1654_v3 = vpack.c.bf16 %v1094_v59, %v1094_v59  ;;  %v928_v8 = vmul.f32 %v2078_v13, %v745_v62  ;;  %v960_v9 = vmul.f32 %v2078_v13, %v873_v63  ;;  %v134_v56 = vld [vmem:[%s2647_s2 + $0xf8] sm:$0xff] }
 0x165   :  { %1383 = vst.msk [vmem:[%s2650_s5 + $0x64] sm:$0xf] %vm1357_vm1, %v1622_v2  ;;  %v929_v10 = vmul.f32 %v2078_v13, %v748_v4  ;;  %v961_v11 = vmul.f32 %v2078_v13, %v876_v5  ;;  %v166_v57 = vld [vmem:[%s2647_s2 + $0x1f8] sm:$0xff] }
 0x166   :  { %1415 = vst.msk [vmem:[%s2650_s5 + $0xe4] sm:$0xf] %vm1357_vm1, %v1654_v3  ;;  %v999_v12 = vadd.f32 %v2089_v21, %v928_v8  ;;  %v1031_v14 = vadd.f32 %v2089_v21, %v960_v9 }
 0x167   :  { %v1000_v17 = vadd.f32 %v2089_v21, %v929_v10  ;;  %v1032_v18 = vadd.f32 %v2089_v21, %v961_v11 }
 0x168   :  { %v1063_v19 = vmax.f32 %v999_v12, 0.0  ;;  %v1095_v20 = vmax.f32 %v1031_v14, 0.0  ;;  %v752_v22 = vpop.f32.mrb[56].mxu0  ;;  %v880_v13 = vpop.f32.mrb[56].mxu1 }
 0x169   :  { %v1064_v23 = vmax.f32 %v1000_v17, 0.0  ;;  %v1096_v24 = vmax.f32 %v1032_v18, 0.0  ;;  %v753_v25 = vadd.f32 %v752_v22, %v131_v15  ;;  %v881_v26 = vadd.f32 %v880_v13, %v163_v16  ;;  %v754_v27 = vpop.f32.mrb[57].mxu0  ;;  %v882_v28 = vpop.f32.mrb[57].mxu1 }
 0x16a   :  { %v1623_v31 = vpack.c.bf16 %v1063_v19, %v1063_v19  ;;  %v1655_v21 = vpack.c.bf16 %v1095_v20, %v1095_v20  ;;  %v755_v32 = vpop.f32.mrb[58].mxu0  ;;  %v883_v33 = vpop.f32.mrb[58].mxu1 }
 0x16b   :  { %v1624_v34 = vpack.c.bf16 %v1064_v23, %v1064_v23  ;;  %v1656_v35 = vpack.c.bf16 %v1096_v24, %v1096_v24  ;;  %v930_v37 = vmul.f32 %v1785_v36, %v753_v25  ;;  %v962_v38 = vmul.f32 %v1785_v36, %v881_v26  ;;  %v757_v39 = vpop.f32.mrb[59].mxu0  ;;  %v885_v40 = vpop.f32.mrb[59].mxu1 }
 0x16c   :  { %1384 = vst.msk [vmem:[%s2650_s5 + $0x68] sm:$0xf] %vm1357_vm1, %v1623_v31  ;;  %1416 = vst.msk [vmem:[%s2650_s5 + $0xe8] sm:$0xf] %vm1357_vm1, %v1655_v21  ;;  %v756_v41 = vadd.f32 %v755_v32, %v132_v29  ;;  %v884_v42 = vadd.f32 %v883_v33, %v164_v30 }
 0x16d   :  { %1385 = vst.msk [vmem:[%s2650_s5 + $0x6c] sm:$0xf] %vm1357_vm1, %v1624_v34  ;;  %1417 = vst.msk [vmem:[%s2650_s5 + $0xec] sm:$0xf] %vm1357_vm1, %v1656_v35  ;;  %v1001_v44 = vadd.f32 %v1786_v43, %v930_v37  ;;  %v1033_v45 = vadd.f32 %v1786_v43, %v962_v38 }
 0x16e   :  { %v931_v46 = vmul.f32 %v1785_v36, %v756_v41  ;;  %v963_v47 = vmul.f32 %v1785_v36, %v884_v42 }
 0x16f   :  { %v1065_v50 = vmax.f32 %v1001_v44, 0.0  ;;  %v1097_v51 = vmax.f32 %v1033_v45, 0.0 }
 0x170   :  { %v1002_v52 = vadd.f32 %v1786_v43, %v931_v46  ;;  %v1034_v53 = vadd.f32 %v1786_v43, %v963_v47  ;;  %v760_v54 = vpop.f32.mrb[60].mxu0  ;;  %v888_v55 = vpop.f32.mrb[60].mxu1 }
 0x171   :  { %v1625_v58 = vpack.c.bf16 %v1065_v50, %v1065_v50  ;;  %v1657_v59 = vpack.c.bf16 %v1097_v51, %v1097_v51  ;;  %v761_v60 = vadd.f32 %v760_v54, %v133_v48  ;;  %v889_v61 = vadd.f32 %v888_v55, %v165_v49  ;;  %v762_v62 = vpop.f32.mrb[61].mxu0  ;;  %v890_v63 = vpop.f32.mrb[61].mxu1 }
 0x172   :  { %v1066_v0 = vmax.f32 %v1002_v52, 0.0  ;;  %v1098_v1 = vmax.f32 %v1034_v53, 0.0  ;;  %v763_v2 = vpop.f32.mrb[62].mxu0  ;;  %v891_v3 = vpop.f32.mrb[62].mxu1 }
 0x173   :  { %1386 = vst.msk [vmem:[%s2650_s5 + $0x70] sm:$0xf] %vm1357_vm1, %v1625_v58  ;;  %1418 = vst.msk [vmem:[%s2650_s5 + $0xf0] sm:$0xf] %vm1357_vm1, %v1657_v59  ;;  %v932_v4 = vmul.f32 %v1785_v36, %v761_v60  ;;  %v964_v5 = vmul.f32 %v1785_v36, %v889_v61  ;;  %v764_v6 = vadd.f32 %v763_v2, %v134_v56  ;;  %v765_v8 = vpop.f32.mrb[63].mxu0  ;;  %v893_v9 = vpop.f32.mrb[63].mxu1 }
 0x174   :  { %v892_v7 = vadd.f32 %v891_v3, %v166_v57  ;;  %v1626_v10 = vpack.c.bf16 %v1066_v0, %v1066_v0  ;;  %v1658_v11 = vpack.c.bf16 %v1098_v1, %v1098_v1 }
 0x175   :  { %v1003_v12 = vadd.f32 %v1786_v43, %v932_v4  ;;  %v1035_v14 = vadd.f32 %v1786_v43, %v964_v5  ;;  %v933_v15 = vmul.f32 %v1785_v36, %v764_v6 }
 0x176   :  { %v965_v16 = vmul.f32 %v1785_v36, %v892_v7  ;;  %1387 = vst.msk [vmem:[%s2650_s5 + $0x74] sm:$0xf] %vm1357_vm1, %v1626_v10  ;;  %1419 = vst.msk [vmem:[%s2650_s5 + $0xf4] sm:$0xf] %vm1357_vm1, %v1658_v11 }
 0x177   :  { %v1067_v17 = vmax.f32 %v1003_v12, 0.0  ;;  %v1099_v18 = vmax.f32 %v1035_v14, 0.0  ;;  %v1004_v19 = vadd.f32 %v1786_v43, %v933_v15 }
 0x178   :  { %v1036_v20 = vadd.f32 %v1786_v43, %v965_v16 }
 0x179   :  { %v1627_v22 = vpack.c.bf16 %v1067_v17, %v1067_v17  ;;  %v1659_v13 = vpack.c.bf16 %v1099_v18, %v1099_v18  ;;  %v1068_v23 = vmax.f32 %v1004_v19, 0.0 }
 0x17a   :  { %v1100_v24 = vmax.f32 %v1036_v20, 0.0 }
 0x17b   :  { %1388 = vst.msk [vmem:[%s2650_s5 + $0x78] sm:$0xf] %vm1357_vm1, %v1627_v22  ;;  %1420 = vst.msk [vmem:[%s2650_s5 + $0xf8] sm:$0xf] %vm1357_vm1, %v1659_v13  ;;  %v1628_v25 = vpack.c.bf16 %v1068_v23, %v1068_v23 }
 0x17c   :  { %v1660_v26 = vpack.c.bf16 %v1100_v24, %v1100_v24 }
 0x17d   :  { %1389 = vst.msk [vmem:[%s2650_s5 + $0x7c] sm:$0xf] %vm1357_vm1, %v1628_v25 }
 0x17e   :  { %1421 = vst.msk [vmem:[%s2650_s5 + $0xfc] sm:$0xf] %vm1357_vm1, %v1660_v26 }

// kernel: networks_forward.13
= control target key start
LH: loop header
LB: loop body
LE: loop exit
PB: predicated region body
PF: predicated region fallthrough
CT: control target
= control target key end

     0   :  { %v566_v0 = vmov 0   ;;  %vm178_vm0 = vcmask 130048   ;;  %vm426_vm1 = vcmask 257024   ;;  %s781_s1 = inlined_call_operand.vmem [shape: bf16[144,32], index: 1, kind: input, shape index: {}]   ;;  %s782_s0 = inlined_call_operand.vmem [shape: bf16[128,144], index: 0, kind: input, shape index: {}]   ;;  %s783_s2 = inlined_call_operand.vmem [shape: f32[1,32], index: 2, kind: input, shape index: {}]   ;;  %s784_s3 = inlined_call_operand.vmem [shape: f32[1,32], index: 3, kind: input, shape index: {}]   ;;  %s785_s4 = inlined_call_operand.vmem [shape: bf16[128,32], index: 4, kind: output, shape index: {}]  }
   0x1   :  { %203 = vmatprep.subr.bf16.mxu0 %v566_v0  ;;  %514 = vmatprep.subr.bf16.mxu1 %v566_v0  ;;  %v533_v1 = vld [vmem:[%s781_s1] sm:$0xff]   ;;  %v534_v2 = vld [vmem:[%s781_s1 + $0x8] sm:$0xff]   ;;  %v535_v3 = vld [vmem:[%s781_s1 + $0x10] sm:$0xff]  }
   0x2   :  { %204 = vmatpush1.bf16.msra.mxu0 %v533_v1  ;;  %523 = vmatpush1.bf16.msra.mxu1 %v533_v1  ;;  %v536_v4 = vld [vmem:[%s781_s1 + $0x18] sm:$0xff]   ;;  %v544_v5 = vld [vmem:[%s782_s0 + $0x4] ss:$8 sps:$4 sm:$0xff]   ;;  %v539_v9 = vld [vmem:[%s781_s1 + $0x30] sm:$0xff]  }
   0x3   :  { %205 = vmatprep.subr.bf16.mxu0 %v566_v0  ;;  %515 = vmatprep.subr.bf16.mxu1 %v566_v0  ;;  %v547_v6 = vld [vmem:[%s782_s0 + $0x44] ss:$8 sps:$4 sm:$0xff]   ;;  %v540_v10 = vld [vmem:[%s781_s1 + $0x38] sm:$0xff]   ;;  %v542_v12 = vld [vmem:[%s782_s0] ss:$8 sps:$4 sm:$0xff]  }
   0x4   :  { %472 = vmatprep.mubr.msk.bf16.mxu0 %vm178_vm0, %v544_v5  ;;  %476 = vmatprep.mubr.msk.bf16.mxu1 %vm178_vm0, %v547_v6  ;;  %v537_v7 = vld [vmem:[%s781_s1 + $0x20] sm:$0xff]   ;;  %v538_v8 = vld [vmem:[%s781_s1 + $0x28] sm:$0xff]   ;;  %v548_v14 = vld [vmem:[%s782_s0 + $0x14] ss:$8 sps:$4 sm:$0xff]  }
   0x5   :  { %v541_v11 = vld [vmem:[%s781_s1 + $0x40] sm:$0xff]   ;;  %v550_v15 = vld [vmem:[%s782_s0 + $0x54] ss:$8 sps:$4 sm:$0xff]   ;;  %v552_v16 = vld [vmem:[%s782_s0 + $0x10] ss:$8 sps:$4 sm:$0xff]  }
   0x6   :  { %206 = vmatpush1.bf16.msra.mxu0 %v534_v2  ;;  %524 = vmatpush1.bf16.msra.mxu1 %v534_v2  ;;  %v545_v13 = vld [vmem:[%s782_s0 + $0x40] ss:$8 sps:$4 sm:$0xff]   ;;  %v553_v17 = vld [vmem:[%s782_s0 + $0x50] ss:$8 sps:$4 sm:$0xff]   ;;  %v554_v18 = vld [vmem:[%s782_s0 + $0x24] ss:$8 sps:$4 sm:$0xff]  }
   0x7   :  { %207 = vmatprep.subr.bf16.mxu0 %v566_v0  ;;  %516 = vmatprep.subr.bf16.mxu1 %v566_v0  ;;  %v556_v19 = vld [vmem:[%s782_s0 + $0x64] ss:$8 sps:$4 sm:$0xff]   ;;  %v558_v20 = vld [vmem:[%s782_s0 + $0x20] ss:$8 sps:$4 sm:$0xff]   ;;  %v560_v22 = vld [vmem:[%s782_s0 + $0x34] ss:$8 sps:$4 sm:$0xff]  }
   0x8   :  { %v559_v21 = vld [vmem:[%s782_s0 + $0x60] ss:$8 sps:$4 sm:$0xff]   ;;  %v562_v23 = vld [vmem:[%s782_s0 + $0x74] ss:$8 sps:$4 sm:$0xff]   ;;  %v564_v24 = vld [vmem:[%s782_s0 + $0x30] ss:$8 sps:$4 sm:$0xff]  }
   0x9   :  { %v565_v25 = vld [vmem:[%s782_s0 + $0x70] ss:$8 sps:$4 sm:$0xff]   ;;  %v678_v26 = vld [vmem:[%s783_s2] ss:$0 sm:$0xff] }
   0xa   :  { %208 = vmatpush1.bf16.msra.mxu0 %v535_v3  ;;  %525 = vmatpush1.bf16.msra.mxu1 %v535_v3  ;;  %v683_v28 = vld [vmem:[%s784_s3] ss:$0 sm:$0xff] }
   0xb   :  { %209 = vmatprep.subr.bf16.mxu0 %v566_v0  ;;  %517 = vmatprep.subr.bf16.mxu1 %v566_v0 }
   0xe   :  { %210 = vmatpush1.bf16.msra.mxu0 %v536_v4  ;;  %526 = vmatpush1.bf16.msra.mxu1 %v536_v4 }
   0xf   :  { %211 = vmatprep.subr.bf16.mxu0 %v566_v0  ;;  %518 = vmatprep.subr.bf16.mxu1 %v566_v0 }
  0x12   :  { %212 = vmatpush1.bf16.msra.mxu0 %v537_v7  ;;  %527 = vmatpush1.bf16.msra.mxu1 %v537_v7 }
  0x13   :  { %213 = vmatprep.subr.bf16.mxu0 %v566_v0  ;;  %519 = vmatprep.subr.bf16.mxu1 %v566_v0 }
  0x16   :  { %214 = vmatpush1.bf16.msra.mxu0 %v538_v8  ;;  %528 = vmatpush1.bf16.msra.mxu1 %v538_v8 }
  0x17   :  { %215 = vmatprep.subr.bf16.mxu0 %v566_v0  ;;  %520 = vmatprep.subr.bf16.mxu1 %v566_v0 }
  0x1a   :  { %216 = vmatpush1.bf16.msra.mxu0 %v539_v9  ;;  %529 = vmatpush1.bf16.msra.mxu1 %v539_v9 }
  0x1b   :  { %217 = vmatprep.subr.bf16.mxu0 %v566_v0  ;;  %521 = vmatprep.subr.bf16.mxu1 %v566_v0 }
  0x1e   :  { %218 = vmatpush1.bf16.msra.mxu0 %v540_v10  ;;  %530 = vmatpush1.bf16.msra.mxu1 %v540_v10 }
  0x1f   :  { %219 = vmatprep.subr.bf16.mxu0 %v566_v0  ;;  %522 = vmatprep.subr.bf16.mxu1 %v566_v0 }
  0x22   :  { %220 = vmatpush1.bf16.msra.mxu0 %v541_v11  ;;  %531 = vmatpush1.bf16.msra.mxu1 %v541_v11 }
  0x25   :  { %236 = vmatmul.mubr.bf16.vlgmr.msra.gmra.mrb[0].mxu0 %v542_v12  ;;  %268 = vmatmul.mubr.bf16.vlgmr.msra.gmra.mrb[0].mxu1 %v545_v13 }
  0x26   :  { %473 = vmatprep.mubr.msk.bf16.mxu0 %vm178_vm0, %v548_v14  ;;  %477 = vmatprep.mubr.msk.bf16.mxu1 %vm178_vm0, %v550_v15 }
  0x2d   :  { %244 = vmatmul.mubr.bf16.gmra.mrb[4].mxu0 %v552_v16  ;;  %276 = vmatmul.mubr.bf16.gmra.mrb[4].mxu1 %v553_v17 }
  0x2e   :  { %474 = vmatprep.mubr.msk.bf16.mxu0 %vm178_vm0, %v554_v18  ;;  %478 = vmatprep.mubr.msk.bf16.mxu1 %vm178_vm0, %v556_v19 }
  0x35   :  { %252 = vmatmul.mubr.bf16.gmra.mrb[8].mxu0 %v558_v20  ;;  %284 = vmatmul.mubr.bf16.gmra.mrb[8].mxu1 %v559_v21 }
  0x36   :  { %475 = vmatprep.mubr.msk.bf16.mxu0 %vm178_vm0, %v560_v22  ;;  %479 = vmatprep.mubr.msk.bf16.mxu1 %vm178_vm0, %v562_v23 }
  0x3d   :  { %260 = vmatmul.mubr.bf16.gmra.mrb[12].mxu0 %v564_v24  ;;  %292 = vmatmul.mubr.bf16.gmra.mrb[12].mxu1 %v565_v25 }
  0xf8   :  { %v237_v27 = vpop.f32.mrb[0].mxu0  ;;  %v269_v29 = vpop.f32.mrb[0].mxu1 }
  0xf9   :  { %v307_v30 = vmul.f32 %v678_v26, %v237_v27  ;;  %v315_v31 = vmul.f32 %v678_v26, %v269_v29  ;;  %v239_v32 = vpop.f32.mrb[1].mxu0  ;;  %v271_v33 = vpop.f32.mrb[1].mxu1 }
  0xfa   :  { %v240_v34 = vpop.f32.mrb[2].mxu0  ;;  %v272_v35 = vpop.f32.mrb[2].mxu1 }
  0xfb   :  { %v330_v36 = vadd.f32 %v683_v28, %v307_v30  ;;  %v338_v37 = vadd.f32 %v683_v28, %v315_v31  ;;  %v308_v38 = vmul.f32 %v678_v26, %v240_v34  ;;  %v316_v39 = vmul.f32 %v678_v26, %v272_v35  ;;  %v242_v40 = vpop.f32.mrb[3].mxu0  ;;  %v274_v41 = vpop.f32.mrb[3].mxu1 }
  0xfd   :  { %v346_v42 = vmax.f32 %v330_v36, 0.0  ;;  %v354_v43 = vmax.f32 %v338_v37, 0.0  ;;  %v331_v44 = vadd.f32 %v683_v28, %v308_v38  ;;  %v339_v45 = vadd.f32 %v683_v28, %v316_v39 }
  0xff   :  { %v498_v46 = vpack.c.bf16 %v346_v42, %v346_v42  ;;  %v506_v47 = vpack.c.bf16 %v354_v43, %v354_v43  ;;  %v347_v48 = vmax.f32 %v331_v44, 0.0  ;;  %v355_v49 = vmax.f32 %v339_v45, 0.0 }
 0x100   :  { %v245_v50 = vpop.f32.mrb[4].mxu0  ;;  %v277_v51 = vpop.f32.mrb[4].mxu1 }
 0x101   :  { %427 = vst.msk [vmem:[%s785_s4] sm:$0xf] %vm426_vm1, %v498_v46  ;;  %435 = vst.msk [vmem:[%s785_s4 + $0x20] sm:$0xf] %vm426_vm1, %v506_v47  ;;  %v499_v52 = vpack.c.bf16 %v347_v48, %v347_v48  ;;  %v507_v53 = vpack.c.bf16 %v355_v49, %v355_v49  ;;  %v309_v54 = vmul.f32 %v678_v26, %v245_v50  ;;  %v247_v56 = vpop.f32.mrb[5].mxu0  ;;  %v279_v57 = vpop.f32.mrb[5].mxu1 }
 0x102   :  { %v317_v55 = vmul.f32 %v678_v26, %v277_v51  ;;  %v248_v58 = vpop.f32.mrb[6].mxu0  ;;  %v280_v59 = vpop.f32.mrb[6].mxu1 }
 0x103   :  { %428 = vst.msk [vmem:[%s785_s4 + $0x4] sm:$0xf] %vm426_vm1, %v499_v52  ;;  %436 = vst.msk [vmem:[%s785_s4 + $0x24] sm:$0xf] %vm426_vm1, %v507_v53  ;;  %v332_v60 = vadd.f32 %v683_v28, %v309_v54  ;;  %v310_v62 = vmul.f32 %v678_v26, %v248_v58  ;;  %v318_v63 = vmul.f32 %v678_v26, %v280_v59  ;;  %v250_v0 = vpop.f32.mrb[7].mxu0  ;;  %v282_v1 = vpop.f32.mrb[7].mxu1 }
 0x104   :  { %v340_v61 = vadd.f32 %v683_v28, %v317_v55 }
 0x105   :  { %v348_v2 = vmax.f32 %v332_v60, 0.0  ;;  %v333_v4 = vadd.f32 %v683_v28, %v310_v62  ;;  %v341_v5 = vadd.f32 %v683_v28, %v318_v63 }
 0x106   :  { %v356_v3 = vmax.f32 %v340_v61, 0.0 }
 0x107   :  { %v500_v6 = vpack.c.bf16 %v348_v2, %v348_v2  ;;  %v349_v8 = vmax.f32 %v333_v4, 0.0  ;;  %v357_v9 = vmax.f32 %v341_v5, 0.0 }
 0x108   :  { %v508_v7 = vpack.c.bf16 %v356_v3, %v356_v3  ;;  %v253_v10 = vpop.f32.mrb[8].mxu0  ;;  %v285_v11 = vpop.f32.mrb[8].mxu1 }
 0x109   :  { %429 = vst.msk [vmem:[%s785_s4 + $0x8] sm:$0xf] %vm426_vm1, %v500_v6  ;;  %v501_v12 = vpack.c.bf16 %v349_v8, %v349_v8  ;;  %v509_v13 = vpack.c.bf16 %v357_v9, %v357_v9  ;;  %v311_v14 = vmul.f32 %v678_v26, %v253_v10  ;;  %v319_v15 = vmul.f32 %v678_v26, %v285_v11  ;;  %v255_v16 = vpop.f32.mrb[9].mxu0  ;;  %v287_v17 = vpop.f32.mrb[9].mxu1 }
 0x10a   :  { %437 = vst.msk [vmem:[%s785_s4 + $0x28] sm:$0xf] %vm426_vm1, %v508_v7  ;;  %v256_v18 = vpop.f32.mrb[10].mxu0  ;;  %v288_v19 = vpop.f32.mrb[10].mxu1 }
 0x10b   :  { %430 = vst.msk [vmem:[%s785_s4 + $0xc] sm:$0xf] %vm426_vm1, %v501_v12  ;;  %438 = vst.msk [vmem:[%s785_s4 + $0x2c] sm:$0xf] %vm426_vm1, %v509_v13  ;;  %v334_v20 = vadd.f32 %v683_v28, %v311_v14  ;;  %v342_v21 = vadd.f32 %v683_v28, %v319_v15  ;;  %v312_v22 = vmul.f32 %v678_v26, %v256_v18  ;;  %v258_v24 = vpop.f32.mrb[11].mxu0  ;;  %v290_v25 = vpop.f32.mrb[11].mxu1 }
 0x10c   :  { %v320_v23 = vmul.f32 %v678_v26, %v288_v19 }
 0x10d   :  { %v350_v27 = vmax.f32 %v334_v20, 0.0  ;;  %v358_v29 = vmax.f32 %v342_v21, 0.0  ;;  %v335_v30 = vadd.f32 %v683_v28, %v312_v22 }
 0x10e   :  { %v343_v31 = vadd.f32 %v683_v28, %v320_v23 }
 0x10f   :  { %v502_v32 = vpack.c.bf16 %v350_v27, %v350_v27  ;;  %v510_v33 = vpack.c.bf16 %v358_v29, %v358_v29  ;;  %v351_v34 = vmax.f32 %v335_v30, 0.0 }
 0x110   :  { %v359_v35 = vmax.f32 %v343_v31, 0.0  ;;  %v261_v36 = vpop.f32.mrb[12].mxu0  ;;  %v293_v37 = vpop.f32.mrb[12].mxu1 }
 0x111   :  { %431 = vst.msk [vmem:[%s785_s4 + $0x10] sm:$0xf] %vm426_vm1, %v502_v32  ;;  %439 = vst.msk [vmem:[%s785_s4 + $0x30] sm:$0xf] %vm426_vm1, %v510_v33  ;;  %v503_v38 = vpack.c.bf16 %v351_v34, %v351_v34  ;;  %v313_v40 = vmul.f32 %v678_v26, %v261_v36  ;;  %v321_v41 = vmul.f32 %v678_v26, %v293_v37  ;;  %v263_v42 = vpop.f32.mrb[13].mxu0  ;;  %v295_v43 = vpop.f32.mrb[13].mxu1 }
 0x112   :  { %v511_v39 = vpack.c.bf16 %v359_v35, %v359_v35  ;;  %v264_v44 = vpop.f32.mrb[14].mxu0  ;;  %v296_v45 = vpop.f32.mrb[14].mxu1 }
 0x113   :  { %432 = vst.msk [vmem:[%s785_s4 + $0x14] sm:$0xf] %vm426_vm1, %v503_v38  ;;  %v336_v46 = vadd.f32 %v683_v28, %v313_v40  ;;  %v344_v47 = vadd.f32 %v683_v28, %v321_v41  ;;  %v314_v48 = vmul.f32 %v678_v26, %v264_v44  ;;  %v322_v49 = vmul.f32 %v678_v26, %v296_v45  ;;  %v266_v50 = vpop.f32.mrb[15].mxu0  ;;  %v298_v51 = vpop.f32.mrb[15].mxu1 }
 0x114   :  { %440 = vst.msk [vmem:[%s785_s4 + $0x34] sm:$0xf] %vm426_vm1, %v511_v39 }
 0x115   :  { %v352_v52 = vmax.f32 %v336_v46, 0.0  ;;  %v360_v53 = vmax.f32 %v344_v47, 0.0  ;;  %v337_v54 = vadd.f32 %v683_v28, %v314_v48  ;;  %v345_v55 = vadd.f32 %v683_v28, %v322_v49 }
 0x117   :  { %v504_v56 = vpack.c.bf16 %v352_v52, %v352_v52  ;;  %v512_v57 = vpack.c.bf16 %v360_v53, %v360_v53  ;;  %v353_v58 = vmax.f32 %v337_v54, 0.0  ;;  %v361_v59 = vmax.f32 %v345_v55, 0.0 }
 0x119   :  { %433 = vst.msk [vmem:[%s785_s4 + $0x18] sm:$0xf] %vm426_vm1, %v504_v56  ;;  %441 = vst.msk [vmem:[%s785_s4 + $0x38] sm:$0xf] %vm426_vm1, %v512_v57  ;;  %v505_v26 = vpack.c.bf16 %v353_v58, %v353_v58  ;;  %v513_v60 = vpack.c.bf16 %v361_v59, %v361_v59 }
 0x11b   :  { %434 = vst.msk [vmem:[%s785_s4 + $0x1c] sm:$0xf] %vm426_vm1, %v505_v26  ;;  %442 = vst.msk [vmem:[%s785_s4 + $0x3c] sm:$0xf] %vm426_vm1, %v513_v60 }

// kernel: networks_forward.14
= control target key start
LH: loop header
LB: loop body
LE: loop exit
PB: predicated region body
PF: predicated region fallthrough
CT: control target
= control target key end

     0   :  { %vm82_vm0 = vcmask 130048   ;;  %vm250_vm1 = vcmask 261120   ;;  %s458_s1 = inlined_call_operand.vmem [shape: bf16[16,32], index: 1, kind: input, shape index: {}]   ;;  %s459_s0 = inlined_call_operand.vmem [shape: bf16[128,16], index: 0, kind: input, shape index: {}]   ;;  %s460_s2 = inlined_call_operand.vmem [shape: f32[1,32], index: 2, kind: input, shape index: {}]   ;;  %s461_s3 = inlined_call_operand.vmem [shape: f32[1,32], index: 3, kind: input, shape index: {}]   ;;  %s462_s4 = inlined_call_operand.vmem [shape: f32[128,32], index: 4, kind: output, shape index: {}]  }
   0x1   :  { %v319_v0 = vld [vmem:[%s458_s1] sm:$0xff]   ;;  %v322_v3 = vld [vmem:[%s459_s0 + $0x8] sm:$0xff]   ;;  %v324_v5 = vld [vmem:[%s459_s0 + $0x10] sm:$0xff]  }
   0x2   :  { %v320_v1 = vld [vmem:[%s459_s0] sm:$0xff]   ;;  %299 = vmatprep.subr.bf16.mxu0 %v319_v0  ;;  %317 = vmatprep.subr.bf16.mxu1 %v319_v0  ;;  %v323_v4 = vld [vmem:[%s459_s0 + $0x28] sm:$0xff]   ;;  %v325_v6 = vld [vmem:[%s459_s0 + $0x30] sm:$0xff]  }
   0x3   :  { %v321_v2 = vld [vmem:[%s459_s0 + $0x20] sm:$0xff]   ;;  %300 = vmatpush3.bf16.msra.mxu0 %v319_v0  ;;  %318 = vmatpush3.bf16.msra.mxu1 %v319_v0  ;;  %v326_v7 = vld [vmem:[%s459_s0 + $0x18] sm:$0xff]  }
   0x4   :  { %301 = vmatprep.mubr.msk.bf16.mxu0 %vm82_vm0, %v320_v1  ;;  %309 = vmatprep.mubr.msk.bf16.mxu1 %vm82_vm0, %v321_v2  ;;  %v327_v8 = vld [vmem:[%s459_s0 + $0x38] sm:$0xff]   ;;  %v288_v9 = vld [vmem:[%s460_s2] ss:$0 sm:$0xff] }
   0x5   :  { %v289_v11 = vld [vmem:[%s461_s3] ss:$0 sm:$0xff] }
   0x6   :  { %302 = vmatmul.mubr.msk.bf16.vlgmr.msra.gmra.mrb[0].mxu0 %vm82_vm0, %v322_v3  ;;  %310 = vmatmul.mubr.msk.bf16.vlgmr.msra.gmra.mrb[0].mxu1 %vm82_vm0, %v323_v4 }
   0x7   :  { %305 = vmatprep.mubr.msk.bf16.mxu0 %vm82_vm0, %v324_v5  ;;  %313 = vmatprep.mubr.msk.bf16.mxu1 %vm82_vm0, %v325_v6 }
   0xe   :  { %306 = vmatmul.mubr.msk.bf16.gmra.mrb[4].mxu0 %vm82_vm0, %v326_v7  ;;  %314 = vmatmul.mubr.msk.bf16.gmra.mrb[4].mxu1 %vm82_vm0, %v327_v8 }
  0xd9   :  { %v303_v10 = vpop.f32.mrb[0].mxu0  ;;  %v311_v12 = vpop.f32.mrb[0].mxu1 }
  0xda   :  { %v213_v13 = vmul.f32 %v303_v10, %v288_v9  ;;  %v221_v14 = vmul.f32 %v311_v12, %v288_v9  ;;  %v141_v15 = vpop.f32.mrb[1].mxu0  ;;  %v173_v16 = vpop.f32.mrb[1].mxu1 }
  0xdb   :  { %v211_v17 = vmul.f32 %v288_v9, %v141_v15  ;;  %v219_v18 = vmul.f32 %v288_v9, %v173_v16  ;;  %v304_v19 = vpop.f32.mrb[2].mxu0  ;;  %v312_v20 = vpop.f32.mrb[2].mxu1 }
  0xdc   :  { %v236_v21 = vadd.f32 %v289_v11, %v213_v13  ;;  %v244_v22 = vadd.f32 %v289_v11, %v221_v14  ;;  %v214_v23 = vmul.f32 %v304_v19, %v288_v9  ;;  %v222_v24 = vmul.f32 %v312_v20, %v288_v9  ;;  %v144_v25 = vpop.f32.mrb[3].mxu0  ;;  %v176_v26 = vpop.f32.mrb[3].mxu1 }
  0xdd   :  { %v234_v27 = vadd.f32 %v289_v11, %v211_v17  ;;  %v242_v28 = vadd.f32 %v289_v11, %v219_v18  ;;  %v212_v29 = vmul.f32 %v288_v9, %v144_v25  ;;  %v220_v30 = vmul.f32 %v288_v9, %v176_v26 }
  0xde   :  { %253 = vst.msk [vmem:[%s462_s4 + $0x10] sm:$0xff] %vm250_vm1, %v236_v21  ;;  %261 = vst.msk [vmem:[%s462_s4 + $0x50] sm:$0xff] %vm250_vm1, %v244_v22  ;;  %v237_v31 = vadd.f32 %v289_v11, %v214_v23  ;;  %v245_v32 = vadd.f32 %v289_v11, %v222_v24 }
  0xdf   :  { %251 = vst.msk [vmem:[%s462_s4] sm:$0xff] %vm250_vm1, %v234_v27  ;;  %259 = vst.msk [vmem:[%s462_s4 + $0x40] sm:$0xff] %vm250_vm1, %v242_v28  ;;  %v235_v33 = vadd.f32 %v289_v11, %v212_v29  ;;  %v243_v34 = vadd.f32 %v289_v11, %v220_v30 }
  0xe0   :  { %254 = vst.msk [vmem:[%s462_s4 + $0x18] sm:$0xff] %vm250_vm1, %v237_v31  ;;  %262 = vst.msk [vmem:[%s462_s4 + $0x58] sm:$0xff] %vm250_vm1, %v245_v32 }
  0xe1   :  { %252 = vst.msk [vmem:[%s462_s4 + $0x8] sm:$0xff] %vm250_vm1, %v235_v33  ;;  %260 = vst.msk [vmem:[%s462_s4 + $0x48] sm:$0xff] %vm250_vm1, %v243_v34  ;;  %v307_v35 = vpop.f32.mrb[4].mxu0  ;;  %v315_v36 = vpop.f32.mrb[4].mxu1 }
  0xe2   :  { %v217_v37 = vmul.f32 %v307_v35, %v288_v9  ;;  %v225_v38 = vmul.f32 %v315_v36, %v288_v9  ;;  %v157_v39 = vpop.f32.mrb[5].mxu0  ;;  %v189_v40 = vpop.f32.mrb[5].mxu1 }
  0xe3   :  { %v215_v41 = vmul.f32 %v288_v9, %v157_v39  ;;  %v223_v42 = vmul.f32 %v288_v9, %v189_v40  ;;  %v308_v43 = vpop.f32.mrb[6].mxu0  ;;  %v316_v44 = vpop.f32.mrb[6].mxu1 }
  0xe4   :  { %v240_v45 = vadd.f32 %v289_v11, %v217_v37  ;;  %v248_v46 = vadd.f32 %v289_v11, %v225_v38  ;;  %v218_v47 = vmul.f32 %v308_v43, %v288_v9  ;;  %v226_v48 = vmul.f32 %v316_v44, %v288_v9  ;;  %v160_v49 = vpop.f32.mrb[7].mxu0  ;;  %v192_v50 = vpop.f32.mrb[7].mxu1 }
  0xe5   :  { %v238_v51 = vadd.f32 %v289_v11, %v215_v41  ;;  %v246_v52 = vadd.f32 %v289_v11, %v223_v42  ;;  %v216_v53 = vmul.f32 %v288_v9, %v160_v49  ;;  %v224_v54 = vmul.f32 %v288_v9, %v192_v50 }
  0xe6   :  { %257 = vst.msk [vmem:[%s462_s4 + $0x30] sm:$0xff] %vm250_vm1, %v240_v45  ;;  %265 = vst.msk [vmem:[%s462_s4 + $0x70] sm:$0xff] %vm250_vm1, %v248_v46  ;;  %v241_v55 = vadd.f32 %v289_v11, %v218_v47  ;;  %v249_v56 = vadd.f32 %v289_v11, %v226_v48 }
  0xe7   :  { %255 = vst.msk [vmem:[%s462_s4 + $0x20] sm:$0xff] %vm250_vm1, %v238_v51  ;;  %263 = vst.msk [vmem:[%s462_s4 + $0x60] sm:$0xff] %vm250_vm1, %v246_v52  ;;  %v239_v57 = vadd.f32 %v289_v11, %v216_v53  ;;  %v247_v58 = vadd.f32 %v289_v11, %v224_v54 }
  0xe8   :  { %258 = vst.msk [vmem:[%s462_s4 + $0x38] sm:$0xff] %vm250_vm1, %v241_v55  ;;  %266 = vst.msk [vmem:[%s462_s4 + $0x78] sm:$0xff] %vm250_vm1, %v249_v56 }
  0xe9   :  { %256 = vst.msk [vmem:[%s462_s4 + $0x28] sm:$0xff] %vm250_vm1, %v239_v57  ;;  %264 = vst.msk [vmem:[%s462_s4 + $0x68] sm:$0xff] %vm250_vm1, %v247_v58 }

// kernel: networks_forward.15
= control target key start
LH: loop header
LB: loop body
LE: loop exit
PB: predicated region body
PF: predicated region fallthrough
CT: control target
= control target key end

     0   :  { %vm333_vm0 = vcmask 261120   ;;  %vm678_vm1 = vcmask 257024   ;;  %s1279_s1 = inlined_call_operand.vmem [shape: bf16[288,32], index: 1, kind: input, shape index: {}]   ;;  %s1280_s0 = inlined_call_operand.vmem [shape: bf16[128,288], index: 0, kind: input, shape index: {}]   ;;  %s1281_s2 = inlined_call_operand.vmem [shape: f32[128,32], index: 2, kind: input, shape index: {}]   ;;  %s1282_s3 = inlined_call_operand.vmem [shape: f32[1,32], index: 3, kind: input, shape index: {}]   ;;  %s1283_s4 = inlined_call_operand.vmem [shape: f32[1,32], index: 4, kind: input, shape index: {}]   ;;  %s1284_s5 = inlined_call_operand.vmem [shape: bf16[128,32], index: 5, kind: output, shape index: {}]  }
   0x1   :  { %v893_v0 = vld [vmem:[%s1279_s1 + $0x40] sm:$0xff]   ;;  %v895_v2 = vld [vmem:[%s1279_s1 + $0x48] sm:$0xff]   ;;  %v897_v4 = vld [vmem:[%s1279_s1 + $0x50] sm:$0xff]  }
   0x2   :  { %v894_v1 = vld [vmem:[%s1279_s1] sm:$0xff]   ;;  %783 = vmatprep.subr.bf16.mxu0 %v893_v0  ;;  %877 = vmatprep.subr.bf16.mxu1 %v893_v0  ;;  %v896_v3 = vld [vmem:[%s1279_s1 + $0x8] sm:$0xff]   ;;  %v898_v5 = vld [vmem:[%s1279_s1 + $0x10] sm:$0xff]  }
   0x3   :  { %784 = vmatpush3.bf16.msra.mxu0 %v894_v1  ;;  %885 = vmatpush3.bf16.msra.mxu1 %v894_v1  ;;  %v899_v6 = vld [vmem:[%s1279_s1 + $0x58] sm:$0xff]   ;;  %v901_v8 = vld [vmem:[%s1279_s1 + $0x60] sm:$0xff]   ;;  %v903_v10 = vld [vmem:[%s1279_s1 + $0x68] sm:$0xff]  }
   0x4   :  { %785 = vmatprep.subr.bf16.mxu0 %v895_v2  ;;  %878 = vmatprep.subr.bf16.mxu1 %v895_v2  ;;  %v900_v7 = vld [vmem:[%s1279_s1 + $0x18] sm:$0xff]   ;;  %v902_v9 = vld [vmem:[%s1279_s1 + $0x20] sm:$0xff]   ;;  %v904_v13 = vld [vmem:[%s1279_s1 + $0x28] sm:$0xff]  }
   0x5   :  { %v911_v11 = vld [vmem:[%s1280_s0 + $0x4] ss:$12 sps:$4 sm:$0xff]   ;;  %v914_v12 = vld [vmem:[%s1280_s0 + $0x94] ss:$12 sps:$4 sm:$0xff]   ;;  %v907_v16 = vld [vmem:[%s1279_s1 + $0x78] sm:$0xff]  }
   0x6   :  { %v905_v14 = vld [vmem:[%s1279_s1 + $0x70] sm:$0xff]   ;;  %390 = vmatprep.mubr.bf16.mxu0 %v911_v11  ;;  %438 = vmatprep.mubr.bf16.mxu1 %v914_v12  ;;  %v908_v17 = vld [vmem:[%s1279_s1 + $0x38] sm:$0xff]   ;;  %v909_v18 = vld [vmem:[%s1280_s0] ss:$12 sps:$4 sm:$0xff]  }
   0x7   :  { %786 = vmatpush3.bf16.msra.mxu0 %v896_v3  ;;  %886 = vmatpush3.bf16.msra.mxu1 %v896_v3  ;;  %v906_v15 = vld [vmem:[%s1279_s1 + $0x30] sm:$0xff]   ;;  %v915_v19 = vld [vmem:[%s1279_s1 + $0x80] sm:$0xff]   ;;  %v916_v21 = vld [vmem:[%s1280_s0 + $0x1c] ss:$12 sps:$4 sm:$0xff]  }
   0x8   :  { %787 = vmatprep.subr.bf16.mxu0 %v897_v4  ;;  %879 = vmatprep.subr.bf16.mxu1 %v897_v4  ;;  %v912_v20 = vld [vmem:[%s1280_s0 + $0x90] ss:$12 sps:$4 sm:$0xff]   ;;  %v918_v22 = vld [vmem:[%s1280_s0 + $0xac] ss:$12 sps:$4 sm:$0xff]   ;;  %v921_v25 = vld [vmem:[%s1280_s0 + $0xa8] ss:$12 sps:$4 sm:$0xff]  }
   0x9   :  { %v922_v23 = vld [vmem:[%s1279_s1 + $0x88] sm:$0xff]   ;;  %v920_v24 = vld [vmem:[%s1280_s0 + $0x18] ss:$12 sps:$4 sm:$0xff]   ;;  %v923_v26 = vld [vmem:[%s1280_s0 + $0x34] ss:$12 sps:$4 sm:$0xff]  }
   0xa   :  { %v925_v27 = vld [vmem:[%s1280_s0 + $0x8] ss:$12 sps:$4 sm:$0xff]   ;;  %v926_v28 = vld [vmem:[%s1280_s0 + $0x30] ss:$12 sps:$4 sm:$0xff]   ;;  %v927_v29 = vld [vmem:[%s1280_s0 + $0x20] ss:$12 sps:$4 sm:$0xff]  }
   0xb   :  { %788 = vmatpush3.bf16.msra.mxu0 %v898_v5  ;;  %887 = vmatpush3.bf16.msra.mxu1 %v898_v5  ;;  %v928_v30 = vld [vmem:[%s1280_s0 + $0x4c] ss:$12 sps:$4 sm:$0xff]   ;;  %v931_v32 = vld [vmem:[%s1280_s0 + $0x48] ss:$12 sps:$4 sm:$0xff]   ;;  %v932_v33 = vld [vmem:[%s1280_s0 + $0x50] ss:$12 sps:$4 sm:$0xff]  }
   0xc   :  { %789 = vmatprep.subr.bf16.mxu0 %v899_v6  ;;  %880 = vmatprep.subr.bf16.mxu1 %v899_v6  ;;  %v930_v31 = vld [vmem:[%s1280_s0 + $0x38] ss:$12 sps:$4 sm:$0xff]   ;;  %v935_v35 = vld [vmem:[%s1280_s0 + $0x68] ss:$12 sps:$4 sm:$0xff]   ;;  %v936_v36 = vld [vmem:[%s1280_s0 + $0x60] ss:$12 sps:$4 sm:$0xff]  }
   0xd   :  { %v933_v34 = vld [vmem:[%s1280_s0 + $0x64] ss:$12 sps:$4 sm:$0xff]   ;;  %v937_v37 = vld [vmem:[%s1280_s0 + $0x80] ss:$12 sps:$4 sm:$0xff]   ;;  %v938_v38 = vld [vmem:[%s1280_s0 + $0x7c] ss:$12 sps:$4 sm:$0xff]  }
   0xe   :  { %v940_v39 = vld [vmem:[%s1280_s0 + $0x98] ss:$12 sps:$4 sm:$0xff]   ;;  %v942_v41 = vld [vmem:[%s1280_s0 + $0xb0] ss:$12 sps:$4 sm:$0xff]   ;;  %v90_v6 = vld [vmem:[%s1281_s2 + $0x8] sm:$0xff] }
   0xf   :  { %790 = vmatpush3.bf16.msra.mxu0 %v900_v7  ;;  %888 = vmatpush3.bf16.msra.mxu1 %v900_v7  ;;  %v941_v40 = vld [vmem:[%s1280_s0 + $0x78] ss:$12 sps:$4 sm:$0xff]   ;;  %v91_v2 = vld [vmem:[%s1281_s2 + $0x10] sm:$0xff] }
  0x10   :  { %791 = vmatprep.subr.bf16.mxu0 %v901_v8  ;;  %881 = vmatprep.subr.bf16.mxu1 %v901_v8  ;;  %v89_v3 = vld [vmem:[%s1281_s2] sm:$0xff]  ;;  %v92_v4 = vld [vmem:[%s1281_s2 + $0x18] sm:$0xff] }
  0x13   :  { %792 = vmatpush3.bf16.msra.mxu0 %v902_v9  ;;  %889 = vmatpush3.bf16.msra.mxu1 %v902_v9  ;;  %v1130_v9 = vld [vmem:[%s1282_s3] ss:$0 sm:$0xff] }
  0x14   :  { %793 = vmatprep.subr.bf16.mxu0 %v903_v10  ;;  %882 = vmatprep.subr.bf16.mxu1 %v903_v10 }
  0x17   :  { %794 = vmatpush3.bf16.msra.mxu0 %v904_v13  ;;  %890 = vmatpush3.bf16.msra.mxu1 %v904_v13 }
  0x18   :  { %795 = vmatprep.subr.bf16.mxu0 %v905_v14  ;;  %883 = vmatprep.subr.bf16.mxu1 %v905_v14 }
  0x1b   :  { %796 = vmatpush3.bf16.msra.mxu0 %v906_v15  ;;  %891 = vmatpush3.bf16.msra.mxu1 %v906_v15  ;;  %v1135_v15 = vld [vmem:[%s1283_s4] ss:$0 sm:$0xff] }
  0x1c   :  { %797 = vmatprep.subr.bf16.mxu0 %v907_v16  ;;  %884 = vmatprep.subr.bf16.mxu1 %v907_v16 }
  0x1f   :  { %798 = vmatpush3.bf16.msra.mxu0 %v908_v17  ;;  %892 = vmatpush3.bf16.msra.mxu1 %v908_v17 }
  0x20   :  { %857 = vmatprep.subr.bf16.mxu1 %v915_v19 }
  0x22   :  { %391 = vmatmul.mubr.bf16.vlgmr.msra.gmra.mrb[0].mxu0 %v909_v18  ;;  %439 = vmatmul.mubr.bf16.vlgmr.msra.gmra.mrb[0].mxu1 %v912_v20 }
  0x23   :  { %858 = vmatpush3.bf16.msra.mxu1 %v915_v19  ;;  %398 = vmatprep.mubr.bf16.mxu0 %v916_v21 }
  0x24   :  { %446 = vmatprep.mubr.bf16.mxu1 %v918_v22  ;;  %859 = vmatprep.subr.bf16.mxu1 %v922_v23 }
  0x27   :  { %860 = vmatpush3.bf16.msra.mxu1 %v922_v23 }
  0x2a   :  { %399 = vmatmul.mubr.bf16.gmra.mrb[4].mxu0 %v920_v24  ;;  %447 = vmatmul.mubr.bf16.gmra.mrb[4].mxu1 %v921_v25 }
  0x2b   :  { %406 = vmatprep.mubr.bf16.mxu0 %v923_v26  ;;  %861 = vmatprep.mubr.msk.bf16.mxu1 %vm333_vm0, %v925_v27 }
  0x32   :  { %407 = vmatmul.mubr.bf16.gmra.mrb[8].mxu0 %v926_v28  ;;  %862 = vmatmul.mubr.msk.bf16.vlgmr.msra.gmra.mrb[8].mxu1 %vm333_vm0, %v927_v29 }
  0x33   :  { %414 = vmatprep.mubr.bf16.mxu0 %v928_v30  ;;  %865 = vmatprep.mubr.msk.bf16.mxu1 %vm333_vm0, %v930_v31  ;;  %v93_v30 = vld [vmem:[%s1281_s2 + $0x20] sm:$0xff] }
  0x3a   :  { %415 = vmatmul.mubr.bf16.gmra.mrb[12].mxu0 %v931_v32  ;;  %866 = vmatmul.mubr.msk.bf16.gmra.mrb[12].mxu1 %vm333_vm0, %v932_v33 }
  0x3b   :  { %422 = vmatprep.mubr.bf16.mxu0 %v933_v34  ;;  %869 = vmatprep.mubr.msk.bf16.mxu1 %vm333_vm0, %v935_v35 }
  0x42   :  { %423 = vmatmul.mubr.bf16.gmra.mrb[16].mxu0 %v936_v36  ;;  %870 = vmatmul.mubr.msk.bf16.gmra.mrb[16].mxu1 %vm333_vm0, %v937_v37 }
  0x43   :  { %430 = vmatprep.mubr.bf16.mxu0 %v938_v38  ;;  %873 = vmatprep.mubr.msk.bf16.mxu1 %vm333_vm0, %v940_v39 }
  0x4a   :  { %431 = vmatmul.mubr.bf16.gmra.mrb[20].mxu0 %v941_v40  ;;  %874 = vmatmul.mubr.msk.bf16.gmra.mrb[20].mxu1 %vm333_vm0, %v942_v41  ;;  %v94_v40 = vld [vmem:[%s1281_s2 + $0x28] sm:$0xff] }
  0xf5   :  { %v799_v42 = vpop.f32.mrb[0].mxu0  ;;  %v835_v43 = vpop.f32.mrb[0].mxu1 }
  0xf6   :  { %v800_v44 = vpop.f32.mrb[1].mxu0  ;;  %v836_v45 = vpop.f32.mrb[1].mxu1 }
  0xf7   :  { %v801_v46 = vadd.f32 %v800_v44, %v799_v42  ;;  %v802_v47 = vpop.f32.mrb[2].mxu0  ;;  %v1107_v48 = vadd.f32 %v836_v45, %v835_v43  ;;  %v838_v49 = vpop.f32.mrb[2].mxu1  ;;  %v95_v43 = vld [vmem:[%s1281_s2 + $0x30] sm:$0xff] }
  0xf8   :  { %v803_v50 = vpop.f32.mrb[3].mxu0  ;;  %v839_v51 = vpop.f32.mrb[3].mxu1 }
  0xf9   :  { %v804_v52 = vadd.f32 %v803_v50, %v802_v47  ;;  %v1109_v53 = vadd.f32 %v839_v51, %v838_v49  ;;  %v393_v10 = vadd.f32 %v801_v46, %v89_v3 }
  0xfb   :  { %v396_v20 = vadd.f32 %v804_v52, %v90_v6 }
  0xfd   :  { %v805_v54 = vpop.f32.mrb[4].mxu0  ;;  %v841_v55 = vpop.f32.mrb[4].mxu1 }
  0xfe   :  { %v806_v56 = vpop.f32.mrb[5].mxu0  ;;  %v842_v57 = vpop.f32.mrb[5].mxu1 }
  0xff   :  { %v807_v58 = vadd.f32 %v806_v56, %v805_v54  ;;  %v808_v59 = vpop.f32.mrb[6].mxu0  ;;  %v1111_v60 = vadd.f32 %v842_v57, %v841_v55  ;;  %v844_v61 = vpop.f32.mrb[6].mxu1  ;;  %v96_v55 = vld [vmem:[%s1281_s2 + $0x38] sm:$0xff] }
 0x100   :  { %v809_v62 = vpop.f32.mrb[7].mxu0  ;;  %v845_v63 = vpop.f32.mrb[7].mxu1 }
 0x101   :  { %v810_v0 = vadd.f32 %v809_v62, %v808_v59  ;;  %v1113_v1 = vadd.f32 %v845_v63, %v844_v61  ;;  %v401_v5 = vadd.f32 %v807_v58, %v91_v2 }
 0x103   :  { %v404_v14 = vadd.f32 %v810_v0, %v92_v4 }
 0x105   :  { %v811_v7 = vpop.f32.mrb[8].mxu0  ;;  %v863_v8 = vpop.f32.mrb[8].mxu1 }
 0x106   :  { %v498_v11 = vadd.f32 %v863_v8, %v401_v5  ;;  %v812_v12 = vpop.f32.mrb[9].mxu0  ;;  %v489_v13 = vpop.f32.mrb[9].mxu1 }
 0x107   :  { %v813_v16 = vadd.f32 %v812_v12, %v811_v7  ;;  %v490_v17 = vadd.f32 %v489_v13, %v393_v10  ;;  %v814_v18 = vpop.f32.mrb[10].mxu0  ;;  %v864_v19 = vpop.f32.mrb[10].mxu1 }
 0x108   :  { %v561_v21 = vmul.f32 %v1130_v9, %v498_v11  ;;  %v501_v22 = vadd.f32 %v864_v19, %v404_v14  ;;  %v815_v23 = vpop.f32.mrb[11].mxu0  ;;  %v492_v24 = vpop.f32.mrb[11].mxu1  ;;  %v97_v14 = vld [vmem:[%s1281_s2 + $0x40] sm:$0xff] }
 0x109   :  { %v559_v25 = vmul.f32 %v1130_v9, %v490_v17  ;;  %v816_v26 = vadd.f32 %v815_v23, %v814_v18  ;;  %v493_v27 = vadd.f32 %v492_v24, %v396_v20  ;;  %v409_v39 = vadd.f32 %v813_v16, %v93_v30 }
 0x10a   :  { %v584_v28 = vadd.f32 %v1135_v15, %v561_v21  ;;  %v562_v29 = vmul.f32 %v1130_v9, %v501_v22 }
 0x10b   :  { %v582_v31 = vadd.f32 %v1135_v15, %v559_v25  ;;  %v560_v32 = vmul.f32 %v1130_v9, %v493_v27  ;;  %v412_v57 = vadd.f32 %v816_v26, %v94_v40  ;;  %v98_v25 = vld [vmem:[%s1281_s2 + $0x48] sm:$0xff] }
 0x10c   :  { %v600_v33 = vmax.f32 %v584_v28, 0.0  ;;  %v585_v34 = vadd.f32 %v1135_v15, %v562_v29 }
 0x10d   :  { %v598_v35 = vmax.f32 %v582_v31, 0.0  ;;  %v583_v36 = vadd.f32 %v1135_v15, %v560_v32  ;;  %v817_v37 = vpop.f32.mrb[12].mxu0  ;;  %v867_v38 = vpop.f32.mrb[12].mxu1  ;;  %v103_v31 = vld [vmem:[%s1281_s2 + $0x70] sm:$0xff] }
 0x10e   :  { %v769_v41 = vpack.c.bf16 %v600_v33, %v600_v33  ;;  %v601_v42 = vmax.f32 %v585_v34, 0.0  ;;  %v818_v44 = vpop.f32.mrb[13].mxu0  ;;  %v505_v45 = vpop.f32.mrb[13].mxu1  ;;  %v101_v33 = vld [vmem:[%s1281_s2 + $0x60] sm:$0xff] }
 0x10f   :  { %v767_v46 = vpack.c.bf16 %v598_v35, %v598_v35  ;;  %v599_v47 = vmax.f32 %v583_v36, 0.0  ;;  %v819_v49 = vadd.f32 %v818_v44, %v817_v37  ;;  %v506_v50 = vadd.f32 %v505_v45, %v409_v39  ;;  %v820_v51 = vpop.f32.mrb[14].mxu0  ;;  %v868_v52 = vpop.f32.mrb[14].mxu1 }
 0x110   :  { %681 = vst.msk [vmem:[%s1284_s5 + $0x8] sm:$0xf] %vm678_vm1, %v769_v41  ;;  %v770_v54 = vpack.c.bf16 %v601_v42, %v601_v42  ;;  %v821_v56 = vpop.f32.mrb[15].mxu0  ;;  %v508_v58 = vpop.f32.mrb[15].mxu1  ;;  %v449_v39 = vadd.f32 %v1111_v60, %v103_v31  ;;  %v441_v45 = vadd.f32 %v1107_v48, %v101_v33  ;;  %v99_v60 = vld [vmem:[%s1281_s2 + $0x50] sm:$0xff] }
 0x111   :  { %679 = vst.msk [vmem:[%s1284_s5] sm:$0xf] %vm678_vm1, %v767_v46  ;;  %v768_v59 = vpack.c.bf16 %v599_v47, %v599_v47  ;;  %v417_v61 = vadd.f32 %v819_v49, %v95_v43  ;;  %v563_v62 = vmul.f32 %v1130_v9, %v506_v50  ;;  %v822_v63 = vadd.f32 %v821_v56, %v820_v51  ;;  %v102_v46 = vld [vmem:[%s1281_s2 + $0x68] sm:$0xff] }
 0x112   :  { %682 = vst.msk [vmem:[%s1284_s5 + $0xc] sm:$0xf] %vm678_vm1, %v770_v54  ;;  %v509_v0 = vadd.f32 %v508_v58, %v412_v57 }
 0x113   :  { %680 = vst.msk [vmem:[%s1284_s5 + $0x4] sm:$0xf] %vm678_vm1, %v768_v59  ;;  %v514_v2 = vadd.f32 %v867_v38, %v417_v61  ;;  %v586_v3 = vadd.f32 %v1135_v15, %v563_v62  ;;  %v420_v4 = vadd.f32 %v822_v63, %v96_v55  ;;  %v104_v38 = vld [vmem:[%s1281_s2 + $0x78] sm:$0xff]  ;;  %v444_v62 = vadd.f32 %v1109_v53, %v102_v46 }
 0x114   :  { %v564_v5 = vmul.f32 %v1130_v9, %v509_v0  ;;  %v452_v51 = vadd.f32 %v1113_v1, %v104_v38 }
 0x115   :  { %v565_v6 = vmul.f32 %v1130_v9, %v514_v2  ;;  %v602_v7 = vmax.f32 %v586_v3, 0.0  ;;  %v517_v8 = vadd.f32 %v868_v52, %v420_v4  ;;  %v823_v10 = vpop.f32.mrb[16].mxu0  ;;  %v1177_v11 = vpop.f32.mrb[16].mxu1  ;;  %v100_v4 = vld [vmem:[%s1281_s2 + $0x58] sm:$0xff] }
 0x116   :  { %v587_v12 = vadd.f32 %v1135_v15, %v564_v5  ;;  %v824_v13 = vpop.f32.mrb[17].mxu0  ;;  %v521_v16 = vpop.f32.mrb[17].mxu1 }
 0x117   :  { %v588_v17 = vadd.f32 %v1135_v15, %v565_v6  ;;  %v771_v18 = vpack.c.bf16 %v602_v7, %v602_v7  ;;  %v566_v19 = vmul.f32 %v1130_v9, %v517_v8  ;;  %v825_v20 = vadd.f32 %v824_v13, %v823_v10  ;;  %v826_v21 = vpop.f32.mrb[18].mxu0  ;;  %v1185_v22 = vpop.f32.mrb[18].mxu1 }
 0x118   :  { %v603_v23 = vmax.f32 %v587_v12, 0.0  ;;  %v827_v24 = vpop.f32.mrb[19].mxu0  ;;  %v524_v26 = vpop.f32.mrb[19].mxu1 }
 0x119   :  { %v604_v27 = vmax.f32 %v588_v17, 0.0  ;;  %683 = vst.msk [vmem:[%s1284_s5 + $0x10] sm:$0xf] %vm678_vm1, %v771_v18  ;;  %v589_v28 = vadd.f32 %v1135_v15, %v566_v19  ;;  %v425_v29 = vadd.f32 %v825_v20, %v97_v14  ;;  %v828_v30 = vadd.f32 %v827_v24, %v826_v21 }
 0x11a   :  { %v772_v32 = vpack.c.bf16 %v603_v23, %v603_v23 }
 0x11b   :  { %v773_v34 = vpack.c.bf16 %v604_v27, %v604_v27  ;;  %v605_v35 = vmax.f32 %v589_v28, 0.0  ;;  %v522_v36 = vadd.f32 %v521_v16, %v425_v29  ;;  %v428_v37 = vadd.f32 %v828_v30, %v98_v25 }
 0x11c   :  { %684 = vst.msk [vmem:[%s1284_s5 + $0x14] sm:$0xf] %vm678_vm1, %v772_v32 }
 0x11d   :  { %685 = vst.msk [vmem:[%s1284_s5 + $0x18] sm:$0xf] %vm678_vm1, %v773_v34  ;;  %v774_v40 = vpack.c.bf16 %v605_v35, %v605_v35  ;;  %v567_v41 = vmul.f32 %v1130_v9, %v522_v36  ;;  %v525_v42 = vadd.f32 %v524_v26, %v428_v37  ;;  %v829_v43 = vpop.f32.mrb[20].mxu0  ;;  %v875_v44 = vpop.f32.mrb[20].mxu1 }
 0x11e   :  { %v546_v47 = vadd.f32 %v875_v44, %v449_v39  ;;  %v830_v49 = vpop.f32.mrb[21].mxu0  ;;  %v537_v50 = vpop.f32.mrb[21].mxu1 }
 0x11f   :  { %686 = vst.msk [vmem:[%s1284_s5 + $0x1c] sm:$0xf] %vm678_vm1, %v774_v40  ;;  %v590_v48 = vadd.f32 %v1135_v15, %v567_v41  ;;  %v568_v52 = vmul.f32 %v1130_v9, %v525_v42  ;;  %v831_v54 = vadd.f32 %v830_v49, %v829_v43  ;;  %v538_v55 = vadd.f32 %v537_v50, %v441_v45  ;;  %v832_v56 = vpop.f32.mrb[22].mxu0  ;;  %v876_v57 = vpop.f32.mrb[22].mxu1 }
 0x120   :  { %v573_v58 = vmul.f32 %v1130_v9, %v546_v47  ;;  %v549_v59 = vadd.f32 %v876_v57, %v452_v51  ;;  %v833_v61 = vpop.f32.mrb[23].mxu0  ;;  %v540_v1 = vpop.f32.mrb[23].mxu1 }
 0x121   :  { %v606_v63 = vmax.f32 %v590_v48, 0.0  ;;  %v591_v0 = vadd.f32 %v1135_v15, %v568_v52  ;;  %v433_v2 = vadd.f32 %v831_v54, %v99_v60  ;;  %v571_v3 = vmul.f32 %v1130_v9, %v538_v55 }
 0x122   :  { %v596_v5 = vadd.f32 %v1135_v15, %v573_v58  ;;  %v574_v6 = vmul.f32 %v1130_v9, %v549_v59  ;;  %v834_v7 = vadd.f32 %v833_v61, %v832_v56  ;;  %v541_v8 = vadd.f32 %v540_v1, %v444_v62 }
 0x123   :  { %v775_v10 = vpack.c.bf16 %v606_v63, %v606_v63  ;;  %v607_v12 = vmax.f32 %v591_v0, 0.0  ;;  %v530_v53 = vadd.f32 %v1177_v11, %v433_v2  ;;  %v594_v13 = vadd.f32 %v1135_v15, %v571_v3 }
 0x124   :  { %v612_v14 = vmax.f32 %v596_v5, 0.0  ;;  %v597_v16 = vadd.f32 %v1135_v15, %v574_v6  ;;  %v436_v17 = vadd.f32 %v834_v7, %v100_v4  ;;  %v572_v18 = vmul.f32 %v1130_v9, %v541_v8 }
 0x125   :  { %687 = vst.msk [vmem:[%s1284_s5 + $0x20] sm:$0xf] %vm678_vm1, %v775_v10  ;;  %v776_v19 = vpack.c.bf16 %v607_v12, %v607_v12  ;;  %v569_v20 = vmul.f32 %v1130_v9, %v530_v53  ;;  %v610_v21 = vmax.f32 %v594_v13, 0.0 }
 0x126   :  { %v781_v23 = vpack.c.bf16 %v612_v14, %v612_v14  ;;  %v613_v24 = vmax.f32 %v597_v16, 0.0  ;;  %v533_v11 = vadd.f32 %v1185_v22, %v436_v17  ;;  %v595_v25 = vadd.f32 %v1135_v15, %v572_v18 }
 0x127   :  { %688 = vst.msk [vmem:[%s1284_s5 + $0x24] sm:$0xf] %vm678_vm1, %v776_v19  ;;  %v592_v26 = vadd.f32 %v1135_v15, %v569_v20  ;;  %v779_v27 = vpack.c.bf16 %v610_v21, %v610_v21 }
 0x128   :  { %693 = vst.msk [vmem:[%s1284_s5 + $0x38] sm:$0xf] %vm678_vm1, %v781_v23  ;;  %v782_v28 = vpack.c.bf16 %v613_v24, %v613_v24  ;;  %v570_v29 = vmul.f32 %v1130_v9, %v533_v11  ;;  %v611_v30 = vmax.f32 %v595_v25, 0.0 }
 0x129   :  { %v608_v22 = vmax.f32 %v592_v26, 0.0  ;;  %691 = vst.msk [vmem:[%s1284_s5 + $0x30] sm:$0xf] %vm678_vm1, %v779_v27 }
 0x12a   :  { %694 = vst.msk [vmem:[%s1284_s5 + $0x3c] sm:$0xf] %vm678_vm1, %v782_v28  ;;  %v593_v31 = vadd.f32 %v1135_v15, %v570_v29  ;;  %v780_v32 = vpack.c.bf16 %v611_v30, %v611_v30 }
 0x12b   :  { %v777_v33 = vpack.c.bf16 %v608_v22, %v608_v22 }
 0x12c   :  { %v609_v34 = vmax.f32 %v593_v31, 0.0  ;;  %692 = vst.msk [vmem:[%s1284_s5 + $0x34] sm:$0xf] %vm678_vm1, %v780_v32 }
 0x12d   :  { %689 = vst.msk [vmem:[%s1284_s5 + $0x28] sm:$0xf] %vm678_vm1, %v777_v33 }
 0x12e   :  { %v778_v9 = vpack.c.bf16 %v609_v34, %v609_v34 }
 0x130   :  { %690 = vst.msk [vmem:[%s1284_s5 + $0x2c] sm:$0xf] %vm678_vm1, %v778_v9 }

// kernel: networks_forward.16
= control target key start
LH: loop header
LB: loop body
LE: loop exit
PB: predicated region body
PF: predicated region fallthrough
CT: control target
= control target key end

     0   :  { %vm200_vm0 = vcmask 261120   ;;  %vm347_vm1 = vcmask 519168   ;;  %s577_s1 = inlined_call_operand.vmem [shape: bf16[288,64], index: 1, kind: input, shape index: {}]   ;;  %s578_s0 = inlined_call_operand.vmem [shape: bf16[32,288], index: 0, kind: input, shape index: {}]   ;;  %s579_s2 = inlined_call_operand.vmem [shape: f32[1,64], index: 2, kind: input, shape index: {}]   ;;  %s580_s3 = inlined_call_operand.vmem [shape: f32[1,64], index: 3, kind: input, shape index: {}]   ;;  %s581_s4 = inlined_call_operand.vmem [shape: bf16[32,64], index: 4, kind: output, shape index: {}]  }
   0x1   :  { %v432_v0 = vld [vmem:[%s577_s1 + $0x40] sm:$0xff]   ;;  %v434_v2 = vld [vmem:[%s577_s1 + $0x48] sm:$0xff]   ;;  %v436_v4 = vld [vmem:[%s577_s1 + $0x50] sm:$0xff]  }
   0x2   :  { %v433_v1 = vld [vmem:[%s577_s1] sm:$0xff]   ;;  %392 = vmatprep.subr.bf16.mxu0 %v432_v0  ;;  %v435_v3 = vld [vmem:[%s577_s1 + $0x8] sm:$0xff]   ;;  %v437_v5 = vld [vmem:[%s577_s1 + $0x10] sm:$0xff]  }
   0x3   :  { %393 = vmatpush3.bf16.msra.mxu0 %v433_v1  ;;  %v438_v6 = vld [vmem:[%s577_s1 + $0x58] sm:$0xff]   ;;  %v440_v8 = vld [vmem:[%s577_s1 + $0x60] sm:$0xff]   ;;  %v442_v11 = vld [vmem:[%s577_s1 + $0x68] sm:$0xff]  }
   0x4   :  { %394 = vmatprep.subr.bf16.mxu0 %v434_v2  ;;  %v439_v7 = vld [vmem:[%s577_s1 + $0x18] sm:$0xff]   ;;  %v446_v9 = vld [vmem:[%s577_s1 + $0x80] sm:$0xff]   ;;  %v443_v12 = vld [vmem:[%s577_s1 + $0x28] sm:$0xff]  }
   0x5   :  { %v441_v10 = vld [vmem:[%s577_s1 + $0x20] sm:$0xff]   ;;  %424 = vmatprep.subr.bf16.mxu1 %v446_v9  ;;  %v449_v13 = vld [vmem:[%s577_s1 + $0x88] sm:$0xff]   ;;  %v444_v14 = vld [vmem:[%s577_s1 + $0x70] sm:$0xff]  }
   0x6   :  { %425 = vmatpush3.bf16.msra.mxu1 %v446_v9  ;;  %v452_v15 = vld [vmem:[%s578_s0 + $0x4] ss:$12 sps:$4 sm:$0xff]   ;;  %v453_v16 = vld [vmem:[%s578_s0 + $0x8] ss:$12 sps:$4 sm:$0xff]   ;;  %v454_v17 = vld [vmem:[%s578_s0 + $0x20] ss:$12 sps:$4 sm:$0xff]  }
   0x7   :  { %395 = vmatpush3.bf16.msra.mxu0 %v435_v3  ;;  %426 = vmatprep.subr.bf16.mxu1 %v449_v13  ;;  %v445_v18 = vld [vmem:[%s577_s1 + $0x30] sm:$0xff]   ;;  %v447_v19 = vld [vmem:[%s577_s1 + $0x78] sm:$0xff]   ;;  %v450_v21 = vld [vmem:[%s578_s0] ss:$12 sps:$4 sm:$0xff]  }
   0x8   :  { %396 = vmatprep.subr.bf16.mxu0 %v436_v4  ;;  %239 = vmatprep.mubr.bf16.mxu0 %v452_v15  ;;  %v448_v20 = vld [vmem:[%s577_s1 + $0x38] sm:$0xff]   ;;  %v382_v33 = vld [vmem:[%s579_s2] ss:$0 sm:$0xff] }
   0x9   :  { %428 = vmatprep.mubr.msk.bf16.mxu1 %vm200_vm0, %v453_v16  ;;  %v455_v22 = vld [vmem:[%s578_s0 + $0x1c] ss:$12 sps:$4 sm:$0xff]   ;;  %v457_v23 = vld [vmem:[%s578_s0 + $0x18] ss:$12 sps:$4 sm:$0xff]   ;;  %v383_v36 = vld [vmem:[%s580_s3] ss:$0 sm:$0xff] }
   0xa   :  { %427 = vmatpush3.bf16.msra.mxu1 %v449_v13 }
   0xb   :  { %397 = vmatpush3.bf16.msra.mxu0 %v437_v5 }
   0xc   :  { %398 = vmatprep.subr.bf16.mxu0 %v438_v6 }
   0xd   :  { %429 = vmatmul.mubr.msk.bf16.vlgmr.msra.gmra.mrb[0].mxu1 %vm200_vm0, %v454_v17 }
   0xf   :  { %399 = vmatpush3.bf16.msra.mxu0 %v439_v7 }
  0x10   :  { %400 = vmatprep.subr.bf16.mxu0 %v440_v8 }
  0x13   :  { %401 = vmatpush3.bf16.msra.mxu0 %v441_v10 }
  0x14   :  { %402 = vmatprep.subr.bf16.mxu0 %v442_v11 }
  0x17   :  { %403 = vmatpush3.bf16.msra.mxu0 %v443_v12 }
  0x18   :  { %404 = vmatprep.subr.bf16.mxu0 %v444_v14 }
  0x1b   :  { %405 = vmatpush3.bf16.msra.mxu0 %v445_v18 }
  0x1c   :  { %406 = vmatprep.subr.bf16.mxu0 %v447_v19 }
  0x1f   :  { %407 = vmatpush3.bf16.msra.mxu0 %v448_v20 }
  0x22   :  { %240 = vmatmul.mubr.bf16.vlgmr.msra.gmra.mrb[0].mxu0 %v450_v21 }
  0x23   :  { %247 = vmatprep.mubr.bf16.mxu0 %v455_v22 }
  0x2a   :  { %248 = vmatmul.mubr.bf16.gmra.mrb[4].mxu0 %v457_v23 }
  0xe0   :  { %v430_v24 = vpop.f32.mrb[0].mxu1 }
  0xe1   :  { %v290_v25 = vpop.f32.mrb[1].mxu1 }
  0xe2   :  { %v431_v26 = vpop.f32.mrb[2].mxu1 }
  0xe3   :  { %v293_v27 = vpop.f32.mrb[3].mxu1 }
  0xf5   :  { %v408_v28 = vpop.f32.mrb[0].mxu0 }
  0xf6   :  { %v409_v29 = vpop.f32.mrb[1].mxu0 }
  0xf7   :  { %v410_v30 = vadd.f32 %v409_v29, %v408_v28  ;;  %v411_v31 = vpop.f32.mrb[2].mxu0 }
  0xf8   :  { %v412_v32 = vpop.f32.mrb[3].mxu0 }
  0xf9   :  { %v413_v34 = vadd.f32 %v412_v32, %v411_v31  ;;  %v291_v35 = vadd.f32 %v410_v30, %v290_v25 }
  0xfb   :  { %v312_v37 = vmul.f32 %v382_v33, %v291_v35  ;;  %v294_v38 = vadd.f32 %v413_v34, %v293_v27 }
  0xfd   :  { %v323_v39 = vadd.f32 %v383_v36, %v312_v37  ;;  %v313_v40 = vmul.f32 %v382_v33, %v294_v38  ;;  %v414_v41 = vpop.f32.mrb[4].mxu0 }
  0xfe   :  { %v415_v42 = vpop.f32.mrb[5].mxu0 }
  0xff   :  { %v327_v43 = vmax.f32 %v323_v39, 0.0  ;;  %v324_v44 = vadd.f32 %v383_v36, %v313_v40  ;;  %v416_v45 = vadd.f32 %v415_v42, %v414_v41  ;;  %v417_v46 = vpop.f32.mrb[6].mxu0 }
 0x100   :  { %v418_v47 = vpop.f32.mrb[7].mxu0 }
 0x101   :  { %v388_v48 = vpack.c.bf16 %v327_v43, %v327_v43  ;;  %v328_v49 = vmax.f32 %v324_v44, 0.0  ;;  %v299_v50 = vadd.f32 %v430_v24, %v416_v45  ;;  %v419_v51 = vadd.f32 %v418_v47, %v417_v46 }
 0x103   :  { %348 = vst.msk [vmem:[%s581_s4] sm:$0xf] %vm347_vm1, %v388_v48  ;;  %v389_v52 = vpack.c.bf16 %v328_v49, %v328_v49  ;;  %v314_v53 = vmul.f32 %v382_v33, %v299_v50  ;;  %v302_v54 = vadd.f32 %v431_v26, %v419_v51 }
 0x105   :  { %349 = vst.msk [vmem:[%s581_s4 + $0x4] sm:$0xf] %vm347_vm1, %v389_v52  ;;  %v325_v55 = vadd.f32 %v383_v36, %v314_v53  ;;  %v315_v56 = vmul.f32 %v382_v33, %v302_v54 }
 0x107   :  { %v329_v57 = vmax.f32 %v325_v55, 0.0  ;;  %v326_v58 = vadd.f32 %v383_v36, %v315_v56 }
 0x109   :  { %v390_v59 = vpack.c.bf16 %v329_v57, %v329_v57  ;;  %v330_v60 = vmax.f32 %v326_v58, 0.0 }
 0x10b   :  { %350 = vst.msk [vmem:[%s581_s4 + $0x8] sm:$0xf] %vm347_vm1, %v390_v59  ;;  %v391_v61 = vpack.c.bf16 %v330_v60, %v330_v60 }
 0x10d   :  { %351 = vst.msk [vmem:[%s581_s4 + $0xc] sm:$0xf] %vm347_vm1, %v391_v61 }

// kernel: networks_forward.17
= control target key start
LH: loop header
LB: loop body
LE: loop exit
PB: predicated region body
PF: predicated region fallthrough
CT: control target
= control target key end

     0   :  { %vm48_vm0 = vcmask 261120   ;;  %vm126_vm1 = vcmask 523264   ;;  %s214_s1 = inlined_call_operand.vmem [shape: bf16[32,64], index: 1, kind: input, shape index: {}]   ;;  %s215_s0 = inlined_call_operand.vmem [shape: bf16[32,32], index: 0, kind: input, shape index: {}]   ;;  %s216_s2 = inlined_call_operand.vmem [shape: f32[1,64], index: 2, kind: input, shape index: {}]   ;;  %s217_s3 = inlined_call_operand.vmem [shape: f32[1,64], index: 3, kind: input, shape index: {}]   ;;  %s218_s4 = inlined_call_operand.vmem [shape: f32[32,64], index: 4, kind: output, shape index: {}]  }
   0x1   :  { %v155_v0 = vld [vmem:[%s214_s1] sm:$0xff]   ;;  %v156_v1 = vld [vmem:[%s214_s1 + $0x8] sm:$0xff]  }
   0x2   :  { %147 = vmatprep.subr.bf16.mxu0 %v155_v0  ;;  %v157_v2 = vld [vmem:[%s215_s0] sm:$0xff]   ;;  %v158_v3 = vld [vmem:[%s215_s0 + $0x8] sm:$0xff]  }
   0x3   :  { %148 = vmatpush3.bf16.msra.mxu0 %v155_v0  ;;  %151 = vmatprep.mubr.msk.bf16.mxu0 %vm48_vm0, %v157_v2  ;;  %v141_v4 = vld [vmem:[%s216_s2] ss:$0 sm:$0xff] }
   0x4   :  { %149 = vmatprep.subr.bf16.mxu0 %v156_v1  ;;  %v142_v6 = vld [vmem:[%s217_s3] ss:$0 sm:$0xff] }
   0x7   :  { %150 = vmatpush3.bf16.msra.mxu0 %v156_v1 }
   0xa   :  { %152 = vmatmul.mubr.msk.bf16.vlgmr.msra.gmra.mrb[0].mxu0 %vm48_vm0, %v158_v3 }
  0xdd   :  { %v153_v5 = vpop.f32.mrb[0].mxu0 }
  0xde   :  { %v113_v7 = vmul.f32 %v153_v5, %v141_v4  ;;  %v89_v8 = vpop.f32.mrb[1].mxu0 }
  0xdf   :  { %v111_v9 = vmul.f32 %v141_v4, %v89_v8  ;;  %v154_v10 = vpop.f32.mrb[2].mxu0 }
  0xe0   :  { %v124_v11 = vadd.f32 %v142_v6, %v113_v7  ;;  %v114_v12 = vmul.f32 %v154_v10, %v141_v4  ;;  %v92_v13 = vpop.f32.mrb[3].mxu0 }
  0xe1   :  { %v122_v14 = vadd.f32 %v142_v6, %v111_v9  ;;  %v112_v15 = vmul.f32 %v141_v4, %v92_v13 }
  0xe2   :  { %129 = vst.msk [vmem:[%s218_s4 + $0x10] sm:$0xff] %vm126_vm1, %v124_v11  ;;  %v125_v16 = vadd.f32 %v142_v6, %v114_v12 }
  0xe3   :  { %127 = vst.msk [vmem:[%s218_s4] sm:$0xff] %vm126_vm1, %v122_v14  ;;  %v123_v17 = vadd.f32 %v142_v6, %v112_v15 }
  0xe4   :  { %130 = vst.msk [vmem:[%s218_s4 + $0x18] sm:$0xff] %vm126_vm1, %v125_v16 }
  0xe5   :  { %128 = vst.msk [vmem:[%s218_s4 + $0x8] sm:$0xff] %vm126_vm1, %v123_v17 }

// kernel: networks_forward.18
= control target key start
LH: loop header
LB: loop body
LE: loop exit
PB: predicated region body
PF: predicated region fallthrough
CT: control target
= control target key end

     0   :  { %vm375_vm0 = vcmask 523264   ;;  %vm571_vm1 = vcmask 519168   ;;  %s960_s1 = inlined_call_operand.vmem [shape: bf16[576,64], index: 1, kind: input, shape index: {}]   ;;  %s961_s0 = inlined_call_operand.vmem [shape: bf16[32,576], index: 0, kind: input, shape index: {}]   ;;  %s962_s2 = inlined_call_operand.vmem [shape: f32[32,64], index: 2, kind: input, shape index: {}]   ;;  %s963_s3 = inlined_call_operand.vmem [shape: f32[1,64], index: 3, kind: input, shape index: {}]   ;;  %s964_s4 = inlined_call_operand.vmem [shape: f32[1,64], index: 4, kind: input, shape index: {}]   ;;  %s965_s5 = inlined_call_operand.vmem [shape: bf16[32,64], index: 5, kind: output, shape index: {}]  }
   0x1   :  { %v712_v0 = vld [vmem:[%s960_s1 + $0x40] sm:$0xff]   ;;  %v716_v4 = vld [vmem:[%s960_s1 + $0x48] sm:$0xff]   ;;  %v720_v8 = vld [vmem:[%s960_s1 + $0x50] sm:$0xff]  }
   0x2   :  { %v713_v1 = vld [vmem:[%s960_s1] sm:$0xff]   ;;  %638 = vmatprep.subr.bf16.mxu0 %v712_v0  ;;  %v717_v5 = vld [vmem:[%s960_s1 + $0x8] sm:$0xff]   ;;  %v721_v9 = vld [vmem:[%s960_s1 + $0x10] sm:$0xff]  }
   0x3   :  { %v714_v2 = vld [vmem:[%s960_s1 + $0xc0] sm:$0xff]   ;;  %639 = vmatpush3.bf16.msra.mxu0 %v713_v1  ;;  %v718_v6 = vld [vmem:[%s960_s1 + $0xc8] sm:$0xff]   ;;  %v722_v10 = vld [vmem:[%s960_s1 + $0xd0] sm:$0xff]  }
   0x4   :  { %v715_v3 = vld [vmem:[%s960_s1 + $0x80] sm:$0xff]   ;;  %666 = vmatprep.subr.bf16.mxu1 %v714_v2  ;;  %640 = vmatprep.subr.bf16.mxu0 %v716_v4  ;;  %v719_v7 = vld [vmem:[%s960_s1 + $0x88] sm:$0xff]   ;;  %v723_v11 = vld [vmem:[%s960_s1 + $0x90] sm:$0xff]  }
   0x5   :  { %667 = vmatpush3.bf16.msra.mxu1 %v715_v3  ;;  %v724_v12 = vld [vmem:[%s960_s1 + $0x58] sm:$0xff]   ;;  %v728_v16 = vld [vmem:[%s960_s1 + $0x60] sm:$0xff]   ;;  %v732_v20 = vld [vmem:[%s960_s1 + $0x68] sm:$0xff]  }
   0x6   :  { %668 = vmatprep.subr.bf16.mxu1 %v718_v6  ;;  %v725_v13 = vld [vmem:[%s960_s1 + $0x18] sm:$0xff]   ;;  %v729_v17 = vld [vmem:[%s960_s1 + $0x20] sm:$0xff]   ;;  %v733_v21 = vld [vmem:[%s960_s1 + $0x28] sm:$0xff]  }
   0x7   :  { %641 = vmatpush3.bf16.msra.mxu0 %v717_v5  ;;  %v726_v14 = vld [vmem:[%s960_s1 + $0xd8] sm:$0xff]   ;;  %v730_v18 = vld [vmem:[%s960_s1 + $0xe0] sm:$0xff]   ;;  %v734_v22 = vld [vmem:[%s960_s1 + $0xe8] sm:$0xff]  }
   0x8   :  { %642 = vmatprep.subr.bf16.mxu0 %v720_v8  ;;  %v727_v15 = vld [vmem:[%s960_s1 + $0x98] sm:$0xff]   ;;  %v731_v19 = vld [vmem:[%s960_s1 + $0xa0] sm:$0xff]   ;;  %v735_v23 = vld [vmem:[%s960_s1 + $0xa8] sm:$0xff]  }
   0x9   :  { %669 = vmatpush3.bf16.msra.mxu1 %v719_v7  ;;  %v736_v24 = vld [vmem:[%s960_s1 + $0x70] sm:$0xff]   ;;  %v740_v28 = vld [vmem:[%s960_s1 + $0x78] sm:$0xff]   ;;  %v747_v34 = vld [vmem:[%s960_s1 + $0x100] sm:$0xff]  }
   0xa   :  { %670 = vmatprep.subr.bf16.mxu1 %v722_v10  ;;  %v737_v25 = vld [vmem:[%s960_s1 + $0x30] sm:$0xff]   ;;  %v741_v29 = vld [vmem:[%s960_s1 + $0x38] sm:$0xff]   ;;  %v750_v36 = vld [vmem:[%s961_s0 + $0xc] ss:$20 sps:$4 sm:$0xff]  }
   0xb   :  { %643 = vmatpush3.bf16.msra.mxu0 %v721_v9  ;;  %v738_v26 = vld [vmem:[%s960_s1 + $0xf0] sm:$0xff]   ;;  %v742_v30 = vld [vmem:[%s960_s1 + $0xf8] sm:$0xff]   ;;  %v751_v37 = vld [vmem:[%s960_s1 + $0x108] sm:$0xff]   ;;  %463 = vmatprep.mubr.bf16.mxu1 %v750_v36 }
   0xc   :  { %644 = vmatprep.subr.bf16.mxu0 %v724_v12  ;;  %v739_v27 = vld [vmem:[%s960_s1 + $0xb0] sm:$0xff]   ;;  %v745_v32 = vld [vmem:[%s961_s0 + $0x4] ss:$20 sps:$4 sm:$0xff]   ;;  %v748_v35 = vld [vmem:[%s961_s0 + $0x8] ss:$20 sps:$4 sm:$0xff]  }
   0xd   :  { %671 = vmatpush3.bf16.msra.mxu1 %v723_v11  ;;  %v743_v31 = vld [vmem:[%s961_s0] ss:$20 sps:$4 sm:$0xff]   ;;  %v746_v33 = vld [vmem:[%s960_s1 + $0xb8] sm:$0xff]   ;;  %414 = vmatprep.mubr.bf16.mxu0 %v745_v32  ;;  %v758_v42 = vld [vmem:[%s961_s0 + $0x30] ss:$20 sps:$4 sm:$0xff]  }
   0xe   :  { %672 = vmatprep.subr.bf16.mxu1 %v726_v14  ;;  %v752_v38 = vld [vmem:[%s961_s0 + $0x2c] ss:$20 sps:$4 sm:$0xff]   ;;  %v754_v39 = vld [vmem:[%s961_s0 + $0x28] ss:$20 sps:$4 sm:$0xff]   ;;  %v755_v40 = vld [vmem:[%s960_s1 + $0x110] sm:$0xff]  }
   0xf   :  { %645 = vmatpush3.bf16.msra.mxu0 %v725_v13  ;;  %v756_v41 = vld [vmem:[%s961_s0 + $0x34] ss:$20 sps:$4 sm:$0xff]   ;;  %v759_v43 = vld [vmem:[%s960_s1 + $0x118] sm:$0xff]   ;;  %v760_v44 = vld [vmem:[%s961_s0 + $0x10] ss:$20 sps:$4 sm:$0xff]  }
  0x10   :  { %646 = vmatprep.subr.bf16.mxu0 %v728_v16  ;;  %v761_v45 = vld [vmem:[%s961_s0 + $0x38] ss:$20 sps:$4 sm:$0xff]   ;;  %v105_v47 = vld [vmem:[%s962_s2] sm:$0xff]  ;;  %v107_v0 = vld [vmem:[%s962_s2 + $0x10] sm:$0xff] }
  0x11   :  { %673 = vmatpush3.bf16.msra.mxu1 %v727_v15  ;;  %v106_v52 = vld [vmem:[%s962_s2 + $0x8] sm:$0xff]  ;;  %v108_v6 = vld [vmem:[%s962_s2 + $0x18] sm:$0xff] }
  0x12   :  { %674 = vmatprep.subr.bf16.mxu1 %v730_v18  ;;  %v628_v18 = vld [vmem:[%s963_s3] ss:$0 sm:$0xff] }
  0x13   :  { %647 = vmatpush3.bf16.msra.mxu0 %v729_v17 }
  0x14   :  { %648 = vmatprep.subr.bf16.mxu0 %v732_v20 }
  0x15   :  { %675 = vmatpush3.bf16.msra.mxu1 %v731_v19 }
  0x16   :  { %676 = vmatprep.subr.bf16.mxu1 %v734_v22  ;;  %v629_v22 = vld [vmem:[%s964_s4] ss:$0 sm:$0xff] }
  0x17   :  { %649 = vmatpush3.bf16.msra.mxu0 %v733_v21 }
  0x18   :  { %650 = vmatprep.subr.bf16.mxu0 %v736_v24 }
  0x19   :  { %677 = vmatpush3.bf16.msra.mxu1 %v735_v23 }
  0x1a   :  { %678 = vmatprep.subr.bf16.mxu1 %v738_v26 }
  0x1b   :  { %651 = vmatpush3.bf16.msra.mxu0 %v737_v25 }
  0x1c   :  { %652 = vmatprep.subr.bf16.mxu0 %v740_v28 }
  0x1d   :  { %679 = vmatpush3.bf16.msra.mxu1 %v739_v27 }
  0x1e   :  { %680 = vmatprep.subr.bf16.mxu1 %v742_v30 }
  0x1f   :  { %653 = vmatpush3.bf16.msra.mxu0 %v741_v29 }
  0x20   :  { %700 = vmatprep.subr.bf16.mxu0 %v747_v34 }
  0x21   :  { %681 = vmatpush3.bf16.msra.mxu1 %v746_v33 }
  0x22   :  { %415 = vmatmul.mubr.bf16.vlgmr.msra.gmra.mrb[0].mxu0 %v743_v31 }
  0x23   :  { %701 = vmatpush3.bf16.msra.mxu0 %v747_v34  ;;  %422 = vmatprep.mubr.bf16.mxu0 %v752_v38 }
  0x24   :  { %464 = vmatmul.mubr.bf16.vlgmr.msra.gmra.mrb[0].mxu1 %v748_v35  ;;  %702 = vmatprep.subr.bf16.mxu0 %v751_v37 }
  0x25   :  { %471 = vmatprep.mubr.bf16.mxu1 %v756_v41 }
  0x27   :  { %703 = vmatpush3.bf16.msra.mxu0 %v751_v37 }
  0x28   :  { %704 = vmatprep.subr.bf16.mxu0 %v755_v40 }
  0x2a   :  { %423 = vmatmul.mubr.bf16.gmra.mrb[4].mxu0 %v754_v39 }
  0x2b   :  { %708 = vmatprep.mubr.msk.bf16.mxu0 %vm375_vm0, %v760_v44  ;;  %705 = vmatpush3.bf16.msra.mxu0 %v755_v40 }
  0x2c   :  { %472 = vmatmul.mubr.bf16.gmra.mrb[4].mxu1 %v758_v42  ;;  %706 = vmatprep.subr.bf16.mxu0 %v759_v43 }
  0x2f   :  { %707 = vmatpush3.bf16.msra.mxu0 %v759_v43 }
  0x32   :  { %709 = vmatmul.mubr.msk.bf16.vlgmr.msra.gmra.mrb[8].mxu0 %vm375_vm0, %v761_v45 }
  0xf5   :  { %v654_v46 = vpop.f32.mrb[0].mxu0 }
  0xf6   :  { %v655_v48 = vpop.f32.mrb[1].mxu0 }
  0xf7   :  { %v656_v49 = vadd.f32 %v655_v48, %v654_v46  ;;  %v657_v50 = vpop.f32.mrb[2].mxu0  ;;  %v682_v51 = vpop.f32.mrb[0].mxu1 }
  0xf8   :  { %v658_v53 = vpop.f32.mrb[3].mxu0  ;;  %v683_v56 = vpop.f32.mrb[1].mxu1 }
  0xf9   :  { %v417_v54 = vadd.f32 %v656_v49, %v105_v47  ;;  %v659_v55 = vadd.f32 %v658_v53, %v657_v50  ;;  %v684_v57 = vadd.f32 %v683_v56, %v682_v51  ;;  %v685_v58 = vpop.f32.mrb[2].mxu1 }
  0xfa   :  { %v686_v60 = vpop.f32.mrb[3].mxu1 }
  0xfb   :  { %v420_v59 = vadd.f32 %v659_v55, %v106_v52  ;;  %v687_v61 = vadd.f32 %v686_v60, %v685_v58  ;;  %v466_v62 = vadd.f32 %v684_v57, %v417_v54 }
  0xfd   :  { %v660_v63 = vpop.f32.mrb[4].mxu0  ;;  %v469_v2 = vadd.f32 %v687_v61, %v420_v59 }
  0xfe   :  { %v661_v1 = vpop.f32.mrb[5].mxu0 }
  0xff   :  { %v662_v3 = vadd.f32 %v661_v1, %v660_v63  ;;  %v663_v4 = vpop.f32.mrb[6].mxu0  ;;  %v688_v5 = vpop.f32.mrb[4].mxu1 }
 0x100   :  { %v664_v7 = vpop.f32.mrb[7].mxu0  ;;  %v689_v10 = vpop.f32.mrb[5].mxu1 }
 0x101   :  { %v425_v8 = vadd.f32 %v662_v3, %v107_v0  ;;  %v665_v9 = vadd.f32 %v664_v7, %v663_v4  ;;  %v690_v11 = vadd.f32 %v689_v10, %v688_v5  ;;  %v691_v12 = vpop.f32.mrb[6].mxu1 }
 0x102   :  { %v692_v14 = vpop.f32.mrb[7].mxu1 }
 0x103   :  { %v428_v13 = vadd.f32 %v665_v9, %v108_v6  ;;  %v693_v15 = vadd.f32 %v692_v14, %v691_v12  ;;  %v474_v16 = vadd.f32 %v690_v11, %v425_v8 }
 0x105   :  { %v710_v17 = vpop.f32.mrb[8].mxu0  ;;  %v477_v19 = vadd.f32 %v693_v15, %v428_v13 }
 0x106   :  { %v523_v20 = vadd.f32 %v710_v17, %v474_v16  ;;  %v514_v21 = vpop.f32.mrb[9].mxu0 }
 0x107   :  { %v515_v23 = vadd.f32 %v514_v21, %v466_v62  ;;  %v711_v24 = vpop.f32.mrb[10].mxu0 }
 0x108   :  { %v538_v25 = vmul.f32 %v628_v18, %v523_v20  ;;  %v526_v26 = vadd.f32 %v711_v24, %v477_v19  ;;  %v517_v27 = vpop.f32.mrb[11].mxu0 }
 0x109   :  { %v536_v28 = vmul.f32 %v628_v18, %v515_v23  ;;  %v518_v29 = vadd.f32 %v517_v27, %v469_v2 }
 0x10a   :  { %v549_v30 = vadd.f32 %v629_v22, %v538_v25  ;;  %v539_v31 = vmul.f32 %v628_v18, %v526_v26 }
 0x10b   :  { %v547_v32 = vadd.f32 %v629_v22, %v536_v28  ;;  %v537_v33 = vmul.f32 %v628_v18, %v518_v29 }
 0x10c   :  { %v553_v34 = vmax.f32 %v549_v30, 0.0  ;;  %v550_v35 = vadd.f32 %v629_v22, %v539_v31 }
 0x10d   :  { %v551_v36 = vmax.f32 %v547_v32, 0.0  ;;  %v548_v37 = vadd.f32 %v629_v22, %v537_v33 }
 0x10e   :  { %v636_v38 = vpack.c.bf16 %v553_v34, %v553_v34  ;;  %v554_v39 = vmax.f32 %v550_v35, 0.0 }
 0x10f   :  { %v634_v40 = vpack.c.bf16 %v551_v36, %v551_v36  ;;  %v552_v41 = vmax.f32 %v548_v37, 0.0 }
 0x110   :  { %574 = vst.msk [vmem:[%s965_s5 + $0x8] sm:$0xf] %vm571_vm1, %v636_v38  ;;  %v637_v42 = vpack.c.bf16 %v554_v39, %v554_v39 }
 0x111   :  { %572 = vst.msk [vmem:[%s965_s5] sm:$0xf] %vm571_vm1, %v634_v40  ;;  %v635_v43 = vpack.c.bf16 %v552_v41, %v552_v41 }
 0x112   :  { %575 = vst.msk [vmem:[%s965_s5 + $0xc] sm:$0xf] %vm571_vm1, %v637_v42 }
 0x113   :  { %573 = vst.msk [vmem:[%s965_s5 + $0x4] sm:$0xf] %vm571_vm1, %v635_v43 }

// kernel: networks_forward.19
= control target key start
LH: loop header
LB: loop body
LE: loop exit
PB: predicated region body
PF: predicated region fallthrough
CT: control target
= control target key end

     0   :  { %v230_v3 = vmov 0.0|0.0   ;;  %vm231_vm0 = vmmov 0   ;;  %v232_v6 = vmov 0.0   ;;  %vm23_vm1 = vcmask 523264   ;;  %s304_s0 = inlined_call_operand.vmem [shape: bf16[2,16,64], index: 0, kind: input, shape index: {}]   ;;  %s305_s1 = inlined_call_operand.vmem [shape: f32[64,10], index: 1, kind: input, shape index: {}]   ;;  %s306_s2 = inlined_call_operand.vmem [shape: f32[1,10], index: 2, kind: input, shape index: {}]   ;;  %s307_s3 = inlined_call_operand.hbm [shape: f32[2,10], index: 3, kind: output, shape index: {}]  }
   0x1   :  { %v44_v0 = vld [vmem:[%s305_s1] sm:$0xff]  ;;  %v45_v1 = vld [vmem:[%s305_s1 + $0x8] sm:$0xff]  ;;  %v46_v2 = vld [vmem:[%s305_s1 + $0x10] sm:$0xff]  ;;  %190 = vmatprep.subr.bf16.mxu0 %v230_v3  ;;  %187 = vmatprep.mubr.msk.f32.mxu0 %vm231_vm0, %v232_v6 }
   0x2   :  { %v191_v4 = vpack.c.bf16 %v45_v1, %v44_v0  ;;  %v47_v5 = vld [vmem:[%s305_s1 + $0x18] sm:$0xff]  ;;  %v154_v7 = vld [vmem:[%s304_s0] sm:$0xff]   ;;  %v161_v11 = vld [vmem:[%s304_s0 + $0x8] sm:$0xff]  }
   0x3   :  { %v194_v8 = vpack.c.bf16 %v47_v5, %v46_v2  ;;  %v155_v9 = vunpack.c.l.bf16 %v154_v7  ;;  %v156_v10 = vunpack.c.h.bf16 %v154_v7 }
   0x4   :  { %192 = vmatpush3.bf16.msra.mxu0 %v191_v4 }
   0x5   :  { %8 = vsyncpa [#allocation3], 0  ;;  %193 = vmatprep.subr.bf16.mxu0 %v230_v3  ;;  %v48_v12 = vld [vmem:[%s305_s1 + $0x20] sm:$0xff]  ;;  %v49_v13 = vld [vmem:[%s305_s1 + $0x28] sm:$0xff]  ;;  %v159_v14 = vunpack.c.l.bf16 %v161_v11  ;;  %v160_v15 = vunpack.c.h.bf16 %v161_v11  ;;  %v24_v16 = vsel %vm23_vm1, %v155_v9, 0.0  ;;  %v25_v17 = vsel %vm23_vm1, %v156_v10, 0.0 }
   0x6   :  { %v26_v18 = vadd.f32 %v25_v17, %v24_v16  ;;  %v197_v21 = vpack.c.bf16 %v49_v13, %v48_v12  ;;  %v50_v23 = vld [vmem:[%s305_s1 + $0x30] sm:$0xff]  ;;  %v51_v24 = vld [vmem:[%s305_s1 + $0x38] sm:$0xff]  ;;  %vm61_vm2 = vcmask 1041409   ;;  %v151_v41 = vld [vmem:[%s306_s2] ss:$0 sm:$0xff]  ;;  %s233_s5 = smov [#allocation2]  }
   0x7   :  { %v33_v19 = vsel %vm23_vm1, %v159_v14, 0.0  ;;  %v34_v20 = vsel %vm23_vm1, %v160_v15, 0.0  ;;  %v200_v28 = vpack.c.bf16 %v51_v24, %v50_v23  ;;  %s143_s6 = sshll.u32 %s233_s5, 4  ;;  %vm135_vm3 = vcmask 74752   ;;  %s144_s6 = int_to_ptr.vmem [resolvable:$true] %s143_s6 }
   0x8   :  { %195 = vmatpush3.bf16.msra.mxu0 %v194_v8  ;;  %v35_v22 = vadd.f32 %v34_v20, %v33_v19  ;;  %v27_v25 = vrot.slane %v26_v18, 4  ;;  %s206_s7 = scalar_lea.vmem %s144_s6, 32  ;;  %p211_p1 = scmp.lt.s32.totalorder %s144_s6, %s144_s6 }
   0x9   :  { %196 = vmatprep.subr.bf16.mxu0 %v230_v3  ;;  %p207_p0 = scmp.ne.s32.totalorder %s144_s6, %s206_s7  ;;  %p212_p2 = scmp.lt.s32.totalorder %s206_s7, %s206_s7 }
   0xa   :  { %v36_v26 = vrot.slane %v35_v22, 4  ;;  %v28_v27 = vadd.f32 %v27_v25, %v26_v18 }
   0xb   :  { %p213_p3 = por %p212_p2, %p211_p1 }
   0xc   :  { %198 = vmatpush3.bf16.msra.mxu0 %v197_v21  ;;  %v37_v29 = vadd.f32 %v36_v26, %v35_v22  ;;  %v29_v30 = vrot.slane %v28_v27, 2 }
   0xd   :  { %199 = vmatprep.subr.bf16.mxu0 %v230_v3  ;;  %p214_p4 = pnand %p213_p3, %p207_p0 }
   0xe   :  { %v38_v31 = vrot.slane %v37_v29, 2  ;;  %v30_v32 = vadd.f32 %v29_v30, %v28_v27 }
  0x10   :  { %201 = vmatpush3.bf16.msra.mxu0 %v200_v28  ;;  %v39_v33 = vadd.f32 %v38_v31, %v37_v29  ;;  %v31_v34 = vrot.slane %v30_v32, 1 }
  0x12   :  { %v40_v35 = vrot.slane %v39_v33, 1  ;;  %v32_v36 = vadd.f32 %v31_v34, %v30_v32 }
  0x14   :  { %v41_v37 = vadd.f32 %v40_v35, %v39_v33  ;;  %v42_v38 = vmul.f32 0.0625, %v32_v36 }
  0x16   :  { %v43_v39 = vmul.f32 0.0625, %v41_v37 }
  0x18   :  { %v62_v40 = vsel %vm61_vm2, %v43_v39, %v42_v38 }
  0x19   :  { %188 = vmatmul.mubr.msk.f32.vlgmr.msra.gmra.mrb[0].mxu0 %vm23_vm1, %v62_v40 }
  0xec   :  { %v131_v42 = vpop.f32.mrb[0].mxu0 }
  0xed   :  { %v132_v43 = vadd.f32 %v151_v41, %v131_v42  ;;  %v189_v44 = vpop.f32.mrb[1].mxu0 }
  0xef   :  { %136 = vst.msk [vmem:[#allocation2] sm:$0x3] %vm135_vm3, %v132_v43 }
  0xf0   :  { %217 = shalt.err (!%p214_p4)
}
  0xf1   :  { %s218_s10 = scalar_lea.hbm %s307_s3, 32 }
  0xf2   :  { %p219_p5 = scmp.ne.s32.totalorder %s307_s3, %s218_s10  ;;  %p222_p6 = scmp.lt.u32.totalorder %s218_s10, %s307_s3 }
  0xf4   :  { %p224_p7 = pnand %p222_p6, %p219_p5 }
  0xf6   :  { %227 = shalt.err (!%p224_p7)
}
  0xf7   :  { %146 = dma.vmem_to_hbm [thread:$0]  %s144_s6, 32, %s307_s3, [#allocation3]  }
  0xf8   :  { %228 = dma.done.wait [#allocation3], 32  }
  0xf9   :  { %229 = vsyncadd [#allocation3], 4294967264 }
  0xfa   :  { %150 = vsyncpa [#allocation3], 1 }

</bundles_post_ra>
